<compile_context>
chip_gen: v7x
topology: tpu7x:2x2x1
jax: 0.10.0
libtpu: 0.0.40
codegen_flags: <defaults>
</compile_context>

<pallas_src>
import jax
import jax.numpy as jnp
from jax.experimental import pallas as pl
from jax.experimental.pallas import tpu as pltpu


# ----------------------------------------------------------------------------
# Exact-erf GELU (matches torch.nn.GELU default; tanh approx not used).
# ----------------------------------------------------------------------------
def _erf(x):
    # Abramowitz & Stegun 7.1.26 polynomial, max abs error ~1.5e-7 (f32 level).
    p = 0.3275911
    a1, a2, a3, a4, a5 = (0.254829592, -0.284496736, 1.421413741,
                          -1.453152027, 1.061405429)
    ax = jnp.abs(x)
    t = 1.0 / (1.0 + p * ax)
    poly = ((((a5 * t + a4) * t + a3) * t + a2) * t + a1) * t
    y = 1.0 - poly * jnp.exp(-ax * ax)
    return jnp.where(x < 0, -y, y)


def _gelu(x):
    return 0.5 * x * (1.0 + _erf(x * 0.7071067811865476))


# ----------------------------------------------------------------------------
# Fused MRConv kernel (one grid step = one batch element, all work in VMEM).
# ----------------------------------------------------------------------------
def _make_mrconv_kernel(in_dim, dim, kparams, H, W):
    """kparams: ((kh, kw, ph, pw),) * 3 — static per-branch conv geometry."""
    C = in_dim
    HW = H * W

    def kernel(x_ref, w1t_ref, b1_ref,
               w2t0_ref, b20_ref, w2t1_ref, b21_ref, w2t2_ref, b22_ref,
               row_ref, col_ref, o_ref):
        xb = x_ref[0].astype(jnp.float32)        # (C, HW)   lane-dense
        row = row_ref[...]                       # (1, HW)   int32 row index
        col = col_ref[...]                       # (1, HW)   int32 col index

        # ---- 1x1 conv + bias (channel mixing) -------------------------------
        if C <= 32:
            # Tiny channel count: exact-f32 VPU contraction. Each weight column
            # is a leading-axis ref read (no width-1 lane slices / relayouts).
            acc = jnp.zeros((C, HW), jnp.float32)
            for i in range(C):
                acc = acc + w1t_ref[i] * xb[i:i + 1, :]      # (C,1) * (1,HW)
            y = acc + b1_ref[...]
        else:
            # Larger channel counts: contract on the MXU.
            w1t = w1t_ref[...][:, :, 0]                      # (C_in, C_out)
            y = jax.lax.dot_general(
                w1t, xb, (((0,), (0,)), ((), ())),
                preferred_element_type=jnp.float32) + b1_ref[...]

        # ---- depthwise conv + bias + GELU -----------------------------------
        # 'same' zero padding is realized with pltpu.roll on the flattened
        # spatial axis plus row/column border masks (no padded copies).
        def dw_gelu(z, wt_ref, b_ref, kh, kw, ph, pw):
            acc = jnp.zeros((dim, HW), jnp.float32)
            for i in range(kh):
                di = i - ph
                for j in range(kw):
                    dj = j - pw
                    off = di * W + dj                        # flattened offset
                    shifted = pltpu.roll(z, (-off) % HW, 1) if off != 0 else z
                    m = None
                    if di < 0:
                        m = row >= -di
                    elif di > 0:
                        m = row < H - di
                    if dj < 0:
                        cmask = col >= -dj
                        m = cmask if m is None else m & cmask
                    elif dj > 0:
                        cmask = col < W - dj
                        m = cmask if m is None else m & cmask
                    tap = shifted if m is None else jnp.where(m, shifted, 0.0)
                    acc = acc + wt_ref[i * kw + j] * tap     # (dim,1)*(dim,HW)
            return _gelu(acc + b_ref[...])

        (kh0, kw0, ph0, pw0), (kh1, kw1, ph1, pw1), (kh2, kw2, ph2, pw2) = kparams
        dm = dim
        # chunk(y, 3) + sequential branches, all in registers (no HBM traffic)
        s1 = dw_gelu(y[0:dm, :], w2t0_ref, b20_ref, kh0, kw0, ph0, pw0)
        s2 = dw_gelu(y[dm:2 * dm, :] + s1, w2t1_ref, b21_ref, kh1, kw1, ph1, pw1)
        s3 = dw_gelu(y[2 * dm:3 * dm, :] + s2, w2t2_ref, b22_ref, kh2, kw2, ph2, pw2)

        # ---- channel concat + residual + GELU (in-register) -----------------
        o_ref[0, 0:dm, :] = _gelu(s1 + xb[0:dm, :]).astype(o_ref.dtype)
        o_ref[0, dm:2 * dm, :] = _gelu(s2 + xb[dm:2 * dm, :]).astype(o_ref.dtype)
        o_ref[0, 2 * dm:3 * dm, :] = _gelu(s3 + xb[2 * dm:3 * dm, :]).astype(o_ref.dtype)

    return kernel


def _vmem_limit_bytes(C, HW, dtype):
    """Generation-aware VMEM scoping (64 MiB physical on v7x, 128 on v5e/v6e)."""
    item = jnp.dtype(dtype).itemsize
    # double-buffered x/out blocks + f32 working set (y, branch temps, taps)
    need = 4 * C * HW * item + 12 * C * HW * 4 + (8 << 20)
    try:
        phys = pltpu.get_tpu_info().vmem_capacity_bytes
    except Exception:
        phys = 64 << 20
    return int(max(16 << 20, min(need, (phys * 3) // 4)))


# ----------------------------------------------------------------------------
# Module wrapper (mirrors the PyTorch MRConv forward)
# ----------------------------------------------------------------------------
class MRConvJax:
    def __init__(self, in_dim, out_dim, kernel_size, padding, key):
        assert in_dim % 3 == 0, "in_dim must be divisible by 3"
        # TODO(synk): grouped conv with a channel multiplier (out_dim != in_dim)
        # is not implemented; the residual `+ input` requires out_dim == in_dim.
        assert out_dim == in_dim, "residual add requires out_dim == in_dim"
        self.in_dim = in_dim
        self.dim = in_dim // 3
        k = kernel_size
        self.kshapes = [(k, k), (2 * k - 1, k), (k, 2 * k - 1)]
        if padding == "same":
            assert k % 2 == 1, "'same' padding requires odd kernel_size"
            self.pads = [((kh - 1) // 2, (kw - 1) // 2) for kh, kw in self.kshapes]
        else:
            p = padding if isinstance(padding, tuple) else (padding, padding)
            self.pads = [p, p, p]
        # The sequential adds / residual require every branch to keep H x W.
        for (kh, kw), (ph, pw) in zip(self.kshapes, self.pads):
            assert 2 * ph == kh - 1 and 2 * pw == kw - 1, (
                "padding must preserve spatial size for all three branches "
                "(use padding='same')")

        keys = jax.random.split(key, 8)
        scale = 0.1
        self.w1 = scale * jax.random.normal(keys[0], (in_dim, in_dim), jnp.float32)
        self.b1 = scale * jax.random.normal(keys[1], (in_dim,), jnp.float32)
        self.w2 = [scale * jax.random.normal(keys[2 + i], (self.dim,) + self.kshapes[i],
                                             jnp.float32) for i in range(3)]
        self.b2 = [scale * jax.random.normal(keys[5 + i], (self.dim,), jnp.float32)
                   for i in range(3)]

    def __call__(self, x):
        N, C, H, W = x.shape
        assert C == self.in_dim
        HW = H * W
        dim = self.dim
        xf = x.reshape(N, C, HW)

        # 1x1 weights transposed so kernel reads columns via leading-axis index.
        w1t = self.w1.T.reshape(C, C, 1)            # [i, o, 0] = w1[o, i]
        b1c = self.b1.reshape(C, 1)

        kparams = []
        dw_args = []
        dw_specs = []
        for br in range(3):
            kh, kw = self.kshapes[br]
            ph, pw = self.pads[br]
            kparams.append((kh, kw, ph, pw))
            w2t = self.w2[br].reshape(dim, kh * kw).T.reshape(kh * kw, dim, 1)
            dw_args += [w2t, self.b2[br].reshape(dim, 1)]
            dw_specs += [pl.BlockSpec((kh * kw, dim, 1), lambda n: (0, 0, 0)),
                         pl.BlockSpec((dim, 1), lambda n: (0, 0))]

        # Row / column index maps for the flattened spatial axis (border masks).
        rows = jnp.repeat(jnp.arange(H, dtype=jnp.int32), W).reshape(1, HW)
        cols = jnp.tile(jnp.arange(W, dtype=jnp.int32), H).reshape(1, HW)

        in_specs = ([pl.BlockSpec((1, C, HW), lambda n: (n, 0, 0)),
                     pl.BlockSpec((C, C, 1), lambda n: (0, 0, 0)),
                     pl.BlockSpec((C, 1), lambda n: (0, 0))]
                    + dw_specs
                    + [pl.BlockSpec((1, HW), lambda n: (0, 0)),
                       pl.BlockSpec((1, HW), lambda n: (0, 0))])

        out = pl.pallas_call(
            _make_mrconv_kernel(C, dim, tuple(kparams), H, W),
            out_shape=jax.ShapeDtypeStruct((N, C, HW), x.dtype),
            grid_spec=pltpu.PrefetchScalarGridSpec(
                num_scalar_prefetch=0,
                grid=(N,),
                in_specs=in_specs,
                out_specs=pl.BlockSpec((1, C, HW), lambda n: (n, 0, 0)),
            ),
            compiler_params=pltpu.CompilerParams(
                dimension_semantics=("parallel",),
                vmem_limit_bytes=_vmem_limit_bytes(C, HW, x.dtype),
            ),
        )(xf, w1t, b1c, *dw_args, rows, cols)
        return out.reshape(N, C, H, W)


# ----------------------------------------------------------------------------
# Pure-JAX reference (same math, no Pallas; exact-erf GELU like torch default)
# ----------------------------------------------------------------------------
def mrconv_reference(x, mod):
    hi = jax.lax.Precision.HIGHEST
    y = jnp.einsum("oi,nihw->nohw", mod.w1, x, precision=hi) + mod.b1[None, :, None, None]
    d = mod.dim
    c0, c1, c2 = y[:, :d], y[:, d:2 * d], y[:, 2 * d:]

    def dw(u, w, b, pads):
        out = jax.lax.conv_general_dilated(
            u, w[:, None, :, :], window_strides=(1, 1),
            padding=((pads[0], pads[0]), (pads[1], pads[1])),
            dimension_numbers=("NCHW", "OIHW", "NCHW"),
            feature_group_count=u.shape[1], precision=hi)
        return out + b[None, :, None, None]

    gelu = lambda t: jax.nn.gelu(t, approximate=False)
    s1 = gelu(dw(c0, mod.w2[0], mod.b2[0], mod.pads[0]))
    s2 = gelu(dw(c1 + s1, mod.w2[1], mod.b2[1], mod.pads[1]))
    s3 = gelu(dw(c2 + s2, mod.w2[2], mod.b2[2], mod.pads[2]))
    return gelu(jnp.concatenate([s1, s2, s3], axis=1) + x)


if __name__ == "__main__":
    key = jax.random.PRNGKey(0)
    kx, kp = jax.random.split(key)

    N, C, H, W = 2, 6, 16, 16          # in_dim = out_dim = 6 (divisible by 3)
    x = jax.random.normal(kx, (N, C, H, W), dtype=jnp.float32)

    # kernel_size=3 with 'same' padding so all branch outputs keep H x W
    # (required for the sequential adds and the final residual).
    mod = MRConvJax(in_dim=C, out_dim=C, kernel_size=3, padding="same", key=kp)

    fwd = jax.jit(mod.__call__)
    y = fwd(x)
    jax.block_until_ready(y)

    y_ref = mrconv_reference(x, mod)
    assert y.shape == (N, C, H, W)
    err = float(jnp.max(jnp.abs(y - y_ref)))
    assert err < 1e-4, f"mismatch vs reference, max|d|={err}"

    print("KERNEL_OK")
</pallas_src>

<mosaic_0001>
module attributes {stable_mosaic.version = 11 : i64} {
  func.func @kernel(%arg0: i32, %arg1: memref<1x6x256xf32, #tpu.memory_space<vmem>>, %arg2: memref<6x6x1xf32, #tpu.memory_space<vmem>>, %arg3: memref<6x1xf32, #tpu.memory_space<vmem>>, %arg4: memref<9x2x1xf32, #tpu.memory_space<vmem>>, %arg5: memref<2x1xf32, #tpu.memory_space<vmem>>, %arg6: memref<15x2x1xf32, #tpu.memory_space<vmem>>, %arg7: memref<2x1xf32, #tpu.memory_space<vmem>>, %arg8: memref<15x2x1xf32, #tpu.memory_space<vmem>>, %arg9: memref<2x1xf32, #tpu.memory_space<vmem>>, %arg10: memref<1x256xi32, #tpu.memory_space<vmem>>, %arg11: memref<1x256xi32, #tpu.memory_space<vmem>>, %arg12: memref<1x6x256xf32, #tpu.memory_space<vmem>>) attributes {dimension_semantics = [#tpu.dimension_semantics<parallel>], iteration_bounds = array<i64: 2>, scalar_prefetch = 0 : i64, scratch_operands = 0 : i64, tpu.core_type = #tpu.core_type<tc>, window_params = [{transform_indices = @transform_0, window_bounds = array<i64: 1, 6, 256>}, {pipeline_mode = #tpu.pipeline_mode<synchronous>, transform_indices = @transform_1, window_bounds = array<i64: 6, 6, 1>}, {pipeline_mode = #tpu.pipeline_mode<synchronous>, transform_indices = @transform_2, window_bounds = array<i64: 6, 1>}, {pipeline_mode = #tpu.pipeline_mode<synchronous>, transform_indices = @transform_3, window_bounds = array<i64: 9, 2, 1>}, {pipeline_mode = #tpu.pipeline_mode<synchronous>, transform_indices = @transform_4, window_bounds = array<i64: 2, 1>}, {pipeline_mode = #tpu.pipeline_mode<synchronous>, transform_indices = @transform_5, window_bounds = array<i64: 15, 2, 1>}, {pipeline_mode = #tpu.pipeline_mode<synchronous>, transform_indices = @transform_6, window_bounds = array<i64: 2, 1>}, {pipeline_mode = #tpu.pipeline_mode<synchronous>, transform_indices = @transform_7, window_bounds = array<i64: 15, 2, 1>}, {pipeline_mode = #tpu.pipeline_mode<synchronous>, transform_indices = @transform_8, window_bounds = array<i64: 2, 1>}, {pipeline_mode = #tpu.pipeline_mode<synchronous>, transform_indices = @transform_9, window_bounds = array<i64: 1, 256>}, {pipeline_mode = #tpu.pipeline_mode<synchronous>, transform_indices = @transform_10, window_bounds = array<i64: 1, 256>}, {transform_indices = @transform_11, window_bounds = array<i64: 1, 6, 256>}]} {
    %c0 = arith.constant 0 : index
    %c0_0 = arith.constant 0 : index
    %c0_1 = arith.constant 0 : index
    %0 = vector.load %arg1[%c0, %c0_0, %c0_1] : memref<1x6x256xf32, #tpu.memory_space<vmem>>, vector<1x6x256xf32>
    %1 = vector.shape_cast %0 : vector<1x6x256xf32> to vector<6x256xf32>
    %c0_2 = arith.constant 0 : index
    %c0_3 = arith.constant 0 : index
    %2 = vector.load %arg10[%c0_2, %c0_3] : memref<1x256xi32, #tpu.memory_space<vmem>>, vector<1x256xi32>
    %c0_4 = arith.constant 0 : index
    %c0_5 = arith.constant 0 : index
    %3 = vector.load %arg11[%c0_4, %c0_5] : memref<1x256xi32, #tpu.memory_space<vmem>>, vector<1x256xi32>
    %cst = arith.constant 0.000000e+00 : f32
    %4 = vector.broadcast %cst : f32 to vector<6x256xf32>
    %c0_6 = arith.constant 0 : index
    %c0_7 = arith.constant 0 : index
    %c0_8 = arith.constant 0 : index
    %5 = vector.load %arg2[%c0_6, %c0_7, %c0_8] : memref<6x6x1xf32, #tpu.memory_space<vmem>>, vector<1x6x1xf32>
    %6 = vector.shape_cast %5 : vector<1x6x1xf32> to vector<6x1xf32>
    %7 = vector.extract_strided_slice %1 {offsets = [0, 0], sizes = [1, 256], strides = [1, 1]} : vector<6x256xf32> to vector<1x256xf32>
    %8 = vector.broadcast %6 : vector<6x1xf32> to vector<6x256xf32>
    %9 = vector.broadcast %7 : vector<1x256xf32> to vector<6x256xf32>
    %10 = arith.mulf %8, %9 : vector<6x256xf32>
    %11 = arith.addf %4, %10 : vector<6x256xf32>
    %c1 = arith.constant 1 : index
    %c0_9 = arith.constant 0 : index
    %c0_10 = arith.constant 0 : index
    %12 = vector.load %arg2[%c1, %c0_9, %c0_10] : memref<6x6x1xf32, #tpu.memory_space<vmem>>, vector<1x6x1xf32>
    %13 = vector.shape_cast %12 : vector<1x6x1xf32> to vector<6x1xf32>
    %14 = vector.extract_strided_slice %1 {offsets = [1, 0], sizes = [1, 256], strides = [1, 1]} : vector<6x256xf32> to vector<1x256xf32>
    %15 = vector.broadcast %13 : vector<6x1xf32> to vector<6x256xf32>
    %16 = vector.broadcast %14 : vector<1x256xf32> to vector<6x256xf32>
    %17 = arith.mulf %15, %16 : vector<6x256xf32>
    %18 = arith.addf %11, %17 : vector<6x256xf32>
    %c2 = arith.constant 2 : index
    %c0_11 = arith.constant 0 : index
    %c0_12 = arith.constant 0 : index
    %19 = vector.load %arg2[%c2, %c0_11, %c0_12] : memref<6x6x1xf32, #tpu.memory_space<vmem>>, vector<1x6x1xf32>
    %20 = vector.shape_cast %19 : vector<1x6x1xf32> to vector<6x1xf32>
    %21 = vector.extract_strided_slice %1 {offsets = [2, 0], sizes = [1, 256], strides = [1, 1]} : vector<6x256xf32> to vector<1x256xf32>
    %22 = vector.broadcast %20 : vector<6x1xf32> to vector<6x256xf32>
    %23 = vector.broadcast %21 : vector<1x256xf32> to vector<6x256xf32>
    %24 = arith.mulf %22, %23 : vector<6x256xf32>
    %25 = arith.addf %18, %24 : vector<6x256xf32>
    %c3 = arith.constant 3 : index
    %c0_13 = arith.constant 0 : index
    %c0_14 = arith.constant 0 : index
    %26 = vector.load %arg2[%c3, %c0_13, %c0_14] : memref<6x6x1xf32, #tpu.memory_space<vmem>>, vector<1x6x1xf32>
    %27 = vector.shape_cast %26 : vector<1x6x1xf32> to vector<6x1xf32>
    %28 = vector.extract_strided_slice %1 {offsets = [3, 0], sizes = [1, 256], strides = [1, 1]} : vector<6x256xf32> to vector<1x256xf32>
    %29 = vector.broadcast %27 : vector<6x1xf32> to vector<6x256xf32>
    %30 = vector.broadcast %28 : vector<1x256xf32> to vector<6x256xf32>
    %31 = arith.mulf %29, %30 : vector<6x256xf32>
    %32 = arith.addf %25, %31 : vector<6x256xf32>
    %c4 = arith.constant 4 : index
    %c0_15 = arith.constant 0 : index
    %c0_16 = arith.constant 0 : index
    %33 = vector.load %arg2[%c4, %c0_15, %c0_16] : memref<6x6x1xf32, #tpu.memory_space<vmem>>, vector<1x6x1xf32>
    %34 = vector.shape_cast %33 : vector<1x6x1xf32> to vector<6x1xf32>
    %35 = vector.extract_strided_slice %1 {offsets = [4, 0], sizes = [1, 256], strides = [1, 1]} : vector<6x256xf32> to vector<1x256xf32>
    %36 = vector.broadcast %34 : vector<6x1xf32> to vector<6x256xf32>
    %37 = vector.broadcast %35 : vector<1x256xf32> to vector<6x256xf32>
    %38 = arith.mulf %36, %37 : vector<6x256xf32>
    %39 = arith.addf %32, %38 : vector<6x256xf32>
    %c5 = arith.constant 5 : index
    %c0_17 = arith.constant 0 : index
    %c0_18 = arith.constant 0 : index
    %40 = vector.load %arg2[%c5, %c0_17, %c0_18] : memref<6x6x1xf32, #tpu.memory_space<vmem>>, vector<1x6x1xf32>
    %41 = vector.shape_cast %40 : vector<1x6x1xf32> to vector<6x1xf32>
    %42 = vector.extract_strided_slice %1 {offsets = [5, 0], sizes = [1, 256], strides = [1, 1]} : vector<6x256xf32> to vector<1x256xf32>
    %43 = vector.broadcast %41 : vector<6x1xf32> to vector<6x256xf32>
    %44 = vector.broadcast %42 : vector<1x256xf32> to vector<6x256xf32>
    %45 = arith.mulf %43, %44 : vector<6x256xf32>
    %46 = arith.addf %39, %45 : vector<6x256xf32>
    %c0_19 = arith.constant 0 : index
    %c0_20 = arith.constant 0 : index
    %47 = vector.load %arg3[%c0_19, %c0_20] : memref<6x1xf32, #tpu.memory_space<vmem>>, vector<6x1xf32>
    %48 = vector.broadcast %47 : vector<6x1xf32> to vector<6x256xf32>
    %49 = arith.addf %46, %48 : vector<6x256xf32>
    %50 = vector.extract_strided_slice %49 {offsets = [0, 0], sizes = [2, 256], strides = [1, 1]} : vector<6x256xf32> to vector<2x256xf32>
    %cst_21 = arith.constant 0.000000e+00 : f32
    %51 = vector.broadcast %cst_21 : f32 to vector<2x256xf32>
    %c17_i32 = arith.constant 17 : i32
    %52 = tpu.dynamic_rotate %50 by %c17_i32 dim 1 : vector<2x256xf32>, i32 -> vector<2x256xf32>
    %c1_i32 = arith.constant 1 : i32
    %53 = vector.broadcast %c1_i32 : i32 to vector<1x256xi32>
    %54 = arith.cmpi sge, %2, %53 : vector<1x256xi32>
    %c1_i32_22 = arith.constant 1 : i32
    %55 = vector.broadcast %c1_i32_22 : i32 to vector<1x256xi32>
    %56 = arith.cmpi sge, %3, %55 : vector<1x256xi32>
    %57 = arith.andi %54, %56 : vector<1x256xi1>
    %cst_23 = arith.constant 0.000000e+00 : f32
    %58 = vector.shape_cast %57 : vector<1x256xi1> to vector<1x256xi1>
    %59 = vector.broadcast %58 : vector<1x256xi1> to vector<2x256xi1>
    %60 = vector.broadcast %cst_23 : f32 to vector<2x256xf32>
    %61 = arith.select %59, %52, %60 : vector<2x256xi1>, vector<2x256xf32>
    %c0_24 = arith.constant 0 : index
    %c0_25 = arith.constant 0 : index
    %c0_26 = arith.constant 0 : index
    %62 = vector.load %arg4[%c0_24, %c0_25, %c0_26] : memref<9x2x1xf32, #tpu.memory_space<vmem>>, vector<1x2x1xf32>
    %63 = vector.shape_cast %62 : vector<1x2x1xf32> to vector<2x1xf32>
    %64 = vector.broadcast %63 : vector<2x1xf32> to vector<2x256xf32>
    %65 = arith.mulf %64, %61 : vector<2x256xf32>
    %66 = arith.addf %51, %65 : vector<2x256xf32>
    %c16_i32 = arith.constant 16 : i32
    %67 = tpu.dynamic_rotate %50 by %c16_i32 dim 1 : vector<2x256xf32>, i32 -> vector<2x256xf32>
    %c1_i32_27 = arith.constant 1 : i32
    %68 = vector.broadcast %c1_i32_27 : i32 to vector<1x256xi32>
    %69 = arith.cmpi sge, %2, %68 : vector<1x256xi32>
    %cst_28 = arith.constant 0.000000e+00 : f32
    %70 = vector.shape_cast %69 : vector<1x256xi1> to vector<1x256xi1>
    %71 = vector.broadcast %70 : vector<1x256xi1> to vector<2x256xi1>
    %72 = vector.broadcast %cst_28 : f32 to vector<2x256xf32>
    %73 = arith.select %71, %67, %72 : vector<2x256xi1>, vector<2x256xf32>
    %c1_29 = arith.constant 1 : index
    %c0_30 = arith.constant 0 : index
    %c0_31 = arith.constant 0 : index
    %74 = vector.load %arg4[%c1_29, %c0_30, %c0_31] : memref<9x2x1xf32, #tpu.memory_space<vmem>>, vector<1x2x1xf32>
    %75 = vector.shape_cast %74 : vector<1x2x1xf32> to vector<2x1xf32>
    %76 = vector.broadcast %75 : vector<2x1xf32> to vector<2x256xf32>
    %77 = arith.mulf %76, %73 : vector<2x256xf32>
    %78 = arith.addf %66, %77 : vector<2x256xf32>
    %c15_i32 = arith.constant 15 : i32
    %79 = tpu.dynamic_rotate %50 by %c15_i32 dim 1 : vector<2x256xf32>, i32 -> vector<2x256xf32>
    %c1_i32_32 = arith.constant 1 : i32
    %80 = vector.broadcast %c1_i32_32 : i32 to vector<1x256xi32>
    %81 = arith.cmpi sge, %2, %80 : vector<1x256xi32>
    %c15_i32_33 = arith.constant 15 : i32
    %82 = vector.broadcast %c15_i32_33 : i32 to vector<1x256xi32>
    %83 = arith.cmpi slt, %3, %82 : vector<1x256xi32>
    %84 = arith.andi %81, %83 : vector<1x256xi1>
    %cst_34 = arith.constant 0.000000e+00 : f32
    %85 = vector.shape_cast %84 : vector<1x256xi1> to vector<1x256xi1>
    %86 = vector.broadcast %85 : vector<1x256xi1> to vector<2x256xi1>
    %87 = vector.broadcast %cst_34 : f32 to vector<2x256xf32>
    %88 = arith.select %86, %79, %87 : vector<2x256xi1>, vector<2x256xf32>
    %c2_35 = arith.constant 2 : index
    %c0_36 = arith.constant 0 : index
    %c0_37 = arith.constant 0 : index
    %89 = vector.load %arg4[%c2_35, %c0_36, %c0_37] : memref<9x2x1xf32, #tpu.memory_space<vmem>>, vector<1x2x1xf32>
    %90 = vector.shape_cast %89 : vector<1x2x1xf32> to vector<2x1xf32>
    %91 = vector.broadcast %90 : vector<2x1xf32> to vector<2x256xf32>
    %92 = arith.mulf %91, %88 : vector<2x256xf32>
    %93 = arith.addf %78, %92 : vector<2x256xf32>
    %c1_i32_38 = arith.constant 1 : i32
    %94 = tpu.dynamic_rotate %50 by %c1_i32_38 dim 1 : vector<2x256xf32>, i32 -> vector<2x256xf32>
    %c1_i32_39 = arith.constant 1 : i32
    %95 = vector.broadcast %c1_i32_39 : i32 to vector<1x256xi32>
    %96 = arith.cmpi sge, %3, %95 : vector<1x256xi32>
    %cst_40 = arith.constant 0.000000e+00 : f32
    %97 = vector.shape_cast %96 : vector<1x256xi1> to vector<1x256xi1>
    %98 = vector.broadcast %97 : vector<1x256xi1> to vector<2x256xi1>
    %99 = vector.broadcast %cst_40 : f32 to vector<2x256xf32>
    %100 = arith.select %98, %94, %99 : vector<2x256xi1>, vector<2x256xf32>
    %c3_41 = arith.constant 3 : index
    %c0_42 = arith.constant 0 : index
    %c0_43 = arith.constant 0 : index
    %101 = vector.load %arg4[%c3_41, %c0_42, %c0_43] : memref<9x2x1xf32, #tpu.memory_space<vmem>>, vector<1x2x1xf32>
    %102 = vector.shape_cast %101 : vector<1x2x1xf32> to vector<2x1xf32>
    %103 = vector.broadcast %102 : vector<2x1xf32> to vector<2x256xf32>
    %104 = arith.mulf %103, %100 : vector<2x256xf32>
    %105 = arith.addf %93, %104 : vector<2x256xf32>
    %c4_44 = arith.constant 4 : index
    %c0_45 = arith.constant 0 : index
    %c0_46 = arith.constant 0 : index
    %106 = vector.load %arg4[%c4_44, %c0_45, %c0_46] : memref<9x2x1xf32, #tpu.memory_space<vmem>>, vector<1x2x1xf32>
    %107 = vector.shape_cast %106 : vector<1x2x1xf32> to vector<2x1xf32>
    %108 = vector.broadcast %107 : vector<2x1xf32> to vector<2x256xf32>
    %109 = arith.mulf %108, %50 : vector<2x256xf32>
    %110 = arith.addf %105, %109 : vector<2x256xf32>
    %c255_i32 = arith.constant 255 : i32
    %111 = tpu.dynamic_rotate %50 by %c255_i32 dim 1 : vector<2x256xf32>, i32 -> vector<2x256xf32>
    %c15_i32_47 = arith.constant 15 : i32
    %112 = vector.broadcast %c15_i32_47 : i32 to vector<1x256xi32>
    %113 = arith.cmpi slt, %3, %112 : vector<1x256xi32>
    %cst_48 = arith.constant 0.000000e+00 : f32
    %114 = vector.shape_cast %113 : vector<1x256xi1> to vector<1x256xi1>
    %115 = vector.broadcast %114 : vector<1x256xi1> to vector<2x256xi1>
    %116 = vector.broadcast %cst_48 : f32 to vector<2x256xf32>
    %117 = arith.select %115, %111, %116 : vector<2x256xi1>, vector<2x256xf32>
    %c5_49 = arith.constant 5 : index
    %c0_50 = arith.constant 0 : index
    %c0_51 = arith.constant 0 : index
    %118 = vector.load %arg4[%c5_49, %c0_50, %c0_51] : memref<9x2x1xf32, #tpu.memory_space<vmem>>, vector<1x2x1xf32>
    %119 = vector.shape_cast %118 : vector<1x2x1xf32> to vector<2x1xf32>
    %120 = vector.broadcast %119 : vector<2x1xf32> to vector<2x256xf32>
    %121 = arith.mulf %120, %117 : vector<2x256xf32>
    %122 = arith.addf %110, %121 : vector<2x256xf32>
    %c241_i32 = arith.constant 241 : i32
    %123 = tpu.dynamic_rotate %50 by %c241_i32 dim 1 : vector<2x256xf32>, i32 -> vector<2x256xf32>
    %c15_i32_52 = arith.constant 15 : i32
    %124 = vector.broadcast %c15_i32_52 : i32 to vector<1x256xi32>
    %125 = arith.cmpi slt, %2, %124 : vector<1x256xi32>
    %c1_i32_53 = arith.constant 1 : i32
    %126 = vector.broadcast %c1_i32_53 : i32 to vector<1x256xi32>
    %127 = arith.cmpi sge, %3, %126 : vector<1x256xi32>
    %128 = arith.andi %125, %127 : vector<1x256xi1>
    %cst_54 = arith.constant 0.000000e+00 : f32
    %129 = vector.shape_cast %128 : vector<1x256xi1> to vector<1x256xi1>
    %130 = vector.broadcast %129 : vector<1x256xi1> to vector<2x256xi1>
    %131 = vector.broadcast %cst_54 : f32 to vector<2x256xf32>
    %132 = arith.select %130, %123, %131 : vector<2x256xi1>, vector<2x256xf32>
    %c6 = arith.constant 6 : index
    %c0_55 = arith.constant 0 : index
    %c0_56 = arith.constant 0 : index
    %133 = vector.load %arg4[%c6, %c0_55, %c0_56] : memref<9x2x1xf32, #tpu.memory_space<vmem>>, vector<1x2x1xf32>
    %134 = vector.shape_cast %133 : vector<1x2x1xf32> to vector<2x1xf32>
    %135 = vector.broadcast %134 : vector<2x1xf32> to vector<2x256xf32>
    %136 = arith.mulf %135, %132 : vector<2x256xf32>
    %137 = arith.addf %122, %136 : vector<2x256xf32>
    %c240_i32 = arith.constant 240 : i32
    %138 = tpu.dynamic_rotate %50 by %c240_i32 dim 1 : vector<2x256xf32>, i32 -> vector<2x256xf32>
    %c15_i32_57 = arith.constant 15 : i32
    %139 = vector.broadcast %c15_i32_57 : i32 to vector<1x256xi32>
    %140 = arith.cmpi slt, %2, %139 : vector<1x256xi32>
    %cst_58 = arith.constant 0.000000e+00 : f32
    %141 = vector.shape_cast %140 : vector<1x256xi1> to vector<1x256xi1>
    %142 = vector.broadcast %141 : vector<1x256xi1> to vector<2x256xi1>
    %143 = vector.broadcast %cst_58 : f32 to vector<2x256xf32>
    %144 = arith.select %142, %138, %143 : vector<2x256xi1>, vector<2x256xf32>
    %c7 = arith.constant 7 : index
    %c0_59 = arith.constant 0 : index
    %c0_60 = arith.constant 0 : index
    %145 = vector.load %arg4[%c7, %c0_59, %c0_60] : memref<9x2x1xf32, #tpu.memory_space<vmem>>, vector<1x2x1xf32>
    %146 = vector.shape_cast %145 : vector<1x2x1xf32> to vector<2x1xf32>
    %147 = vector.broadcast %146 : vector<2x1xf32> to vector<2x256xf32>
    %148 = arith.mulf %147, %144 : vector<2x256xf32>
    %149 = arith.addf %137, %148 : vector<2x256xf32>
    %c239_i32 = arith.constant 239 : i32
    %150 = tpu.dynamic_rotate %50 by %c239_i32 dim 1 : vector<2x256xf32>, i32 -> vector<2x256xf32>
    %c15_i32_61 = arith.constant 15 : i32
    %151 = vector.broadcast %c15_i32_61 : i32 to vector<1x256xi32>
    %152 = arith.cmpi slt, %2, %151 : vector<1x256xi32>
    %c15_i32_62 = arith.constant 15 : i32
    %153 = vector.broadcast %c15_i32_62 : i32 to vector<1x256xi32>
    %154 = arith.cmpi slt, %3, %153 : vector<1x256xi32>
    %155 = arith.andi %152, %154 : vector<1x256xi1>
    %cst_63 = arith.constant 0.000000e+00 : f32
    %156 = vector.shape_cast %155 : vector<1x256xi1> to vector<1x256xi1>
    %157 = vector.broadcast %156 : vector<1x256xi1> to vector<2x256xi1>
    %158 = vector.broadcast %cst_63 : f32 to vector<2x256xf32>
    %159 = arith.select %157, %150, %158 : vector<2x256xi1>, vector<2x256xf32>
    %c8 = arith.constant 8 : index
    %c0_64 = arith.constant 0 : index
    %c0_65 = arith.constant 0 : index
    %160 = vector.load %arg4[%c8, %c0_64, %c0_65] : memref<9x2x1xf32, #tpu.memory_space<vmem>>, vector<1x2x1xf32>
    %161 = vector.shape_cast %160 : vector<1x2x1xf32> to vector<2x1xf32>
    %162 = vector.broadcast %161 : vector<2x1xf32> to vector<2x256xf32>
    %163 = arith.mulf %162, %159 : vector<2x256xf32>
    %164 = arith.addf %149, %163 : vector<2x256xf32>
    %c0_66 = arith.constant 0 : index
    %c0_67 = arith.constant 0 : index
    %165 = vector.load %arg5[%c0_66, %c0_67] : memref<2x1xf32, #tpu.memory_space<vmem>>, vector<2x1xf32>
    %166 = vector.broadcast %165 : vector<2x1xf32> to vector<2x256xf32>
    %167 = arith.addf %164, %166 : vector<2x256xf32>
    %cst_68 = arith.constant 5.000000e-01 : f32
    %168 = vector.broadcast %cst_68 : f32 to vector<2x256xf32>
    %169 = arith.mulf %168, %167 : vector<2x256xf32>
    %cst_69 = arith.constant 0.707106769 : f32
    %170 = vector.broadcast %cst_69 : f32 to vector<2x256xf32>
    %171 = arith.mulf %167, %170 : vector<2x256xf32>
    %172 = math.absf %171 : vector<2x256xf32>
    %cst_70 = arith.constant 0.327591091 : f32
    %173 = vector.broadcast %cst_70 : f32 to vector<2x256xf32>
    %174 = arith.mulf %173, %172 : vector<2x256xf32>
    %cst_71 = arith.constant 1.000000e+00 : f32
    %175 = vector.broadcast %cst_71 : f32 to vector<2x256xf32>
    %176 = arith.addf %175, %174 : vector<2x256xf32>
    %cst_72 = arith.constant 1.000000e+00 : f32
    %177 = vector.broadcast %cst_72 : f32 to vector<2x256xf32>
    %178 = arith.divf %177, %176 : vector<2x256xf32>
    %cst_73 = arith.constant 1.06140542 : f32
    %179 = vector.broadcast %cst_73 : f32 to vector<2x256xf32>
    %180 = arith.mulf %179, %178 : vector<2x256xf32>
    %cst_74 = arith.constant -1.45315206 : f32
    %181 = vector.broadcast %cst_74 : f32 to vector<2x256xf32>
    %182 = arith.addf %180, %181 : vector<2x256xf32>
    %183 = arith.mulf %182, %178 : vector<2x256xf32>
    %cst_75 = arith.constant 1.42141378 : f32
    %184 = vector.broadcast %cst_75 : f32 to vector<2x256xf32>
    %185 = arith.addf %183, %184 : vector<2x256xf32>
    %186 = arith.mulf %185, %178 : vector<2x256xf32>
    %cst_76 = arith.constant -0.284496725 : f32
    %187 = vector.broadcast %cst_76 : f32 to vector<2x256xf32>
    %188 = arith.addf %186, %187 : vector<2x256xf32>
    %189 = arith.mulf %188, %178 : vector<2x256xf32>
    %cst_77 = arith.constant 0.254829586 : f32
    %190 = vector.broadcast %cst_77 : f32 to vector<2x256xf32>
    %191 = arith.addf %189, %190 : vector<2x256xf32>
    %192 = arith.mulf %191, %178 : vector<2x256xf32>
    %cst_78 = arith.constant 0.000000e+00 : f32
    %193 = vector.broadcast %cst_78 : f32 to vector<2x256xf32>
    %194 = arith.subf %193, %172 : vector<2x256xf32>
    %195 = arith.mulf %194, %172 : vector<2x256xf32>
    %196 = math.exp %195 : vector<2x256xf32>
    %197 = arith.mulf %192, %196 : vector<2x256xf32>
    %cst_79 = arith.constant 1.000000e+00 : f32
    %198 = vector.broadcast %cst_79 : f32 to vector<2x256xf32>
    %199 = arith.subf %198, %197 : vector<2x256xf32>
    %cst_80 = arith.constant 0.000000e+00 : f32
    %200 = vector.broadcast %cst_80 : f32 to vector<2x256xf32>
    %201 = arith.cmpf olt, %171, %200 : vector<2x256xf32>
    %cst_81 = arith.constant 0.000000e+00 : f32
    %202 = vector.broadcast %cst_81 : f32 to vector<2x256xf32>
    %203 = arith.subf %202, %199 : vector<2x256xf32>
    %204 = arith.select %201, %203, %199 : vector<2x256xi1>, vector<2x256xf32>
    %cst_82 = arith.constant 1.000000e+00 : f32
    %205 = vector.broadcast %cst_82 : f32 to vector<2x256xf32>
    %206 = arith.addf %205, %204 : vector<2x256xf32>
    %207 = arith.mulf %169, %206 : vector<2x256xf32>
    %208 = vector.extract_strided_slice %49 {offsets = [2, 0], sizes = [2, 256], strides = [1, 1]} : vector<6x256xf32> to vector<2x256xf32>
    %209 = arith.addf %208, %207 : vector<2x256xf32>
    %cst_83 = arith.constant 0.000000e+00 : f32
    %210 = vector.broadcast %cst_83 : f32 to vector<2x256xf32>
    %c33_i32 = arith.constant 33 : i32
    %211 = tpu.dynamic_rotate %209 by %c33_i32 dim 1 : vector<2x256xf32>, i32 -> vector<2x256xf32>
    %c2_i32 = arith.constant 2 : i32
    %212 = vector.broadcast %c2_i32 : i32 to vector<1x256xi32>
    %213 = arith.cmpi sge, %2, %212 : vector<1x256xi32>
    %c1_i32_84 = arith.constant 1 : i32
    %214 = vector.broadcast %c1_i32_84 : i32 to vector<1x256xi32>
    %215 = arith.cmpi sge, %3, %214 : vector<1x256xi32>
    %216 = arith.andi %213, %215 : vector<1x256xi1>
    %cst_85 = arith.constant 0.000000e+00 : f32
    %217 = vector.shape_cast %216 : vector<1x256xi1> to vector<1x256xi1>
    %218 = vector.broadcast %217 : vector<1x256xi1> to vector<2x256xi1>
    %219 = vector.broadcast %cst_85 : f32 to vector<2x256xf32>
    %220 = arith.select %218, %211, %219 : vector<2x256xi1>, vector<2x256xf32>
    %c0_86 = arith.constant 0 : index
    %c0_87 = arith.constant 0 : index
    %c0_88 = arith.constant 0 : index
    %221 = vector.load %arg6[%c0_86, %c0_87, %c0_88] : memref<15x2x1xf32, #tpu.memory_space<vmem>>, vector<1x2x1xf32>
    %222 = vector.shape_cast %221 : vector<1x2x1xf32> to vector<2x1xf32>
    %223 = vector.broadcast %222 : vector<2x1xf32> to vector<2x256xf32>
    %224 = arith.mulf %223, %220 : vector<2x256xf32>
    %225 = arith.addf %210, %224 : vector<2x256xf32>
    %c32_i32 = arith.constant 32 : i32
    %226 = tpu.dynamic_rotate %209 by %c32_i32 dim 1 : vector<2x256xf32>, i32 -> vector<2x256xf32>
    %c2_i32_89 = arith.constant 2 : i32
    %227 = vector.broadcast %c2_i32_89 : i32 to vector<1x256xi32>
    %228 = arith.cmpi sge, %2, %227 : vector<1x256xi32>
    %cst_90 = arith.constant 0.000000e+00 : f32
    %229 = vector.shape_cast %228 : vector<1x256xi1> to vector<1x256xi1>
    %230 = vector.broadcast %229 : vector<1x256xi1> to vector<2x256xi1>
    %231 = vector.broadcast %cst_90 : f32 to vector<2x256xf32>
    %232 = arith.select %230, %226, %231 : vector<2x256xi1>, vector<2x256xf32>
    %c1_91 = arith.constant 1 : index
    %c0_92 = arith.constant 0 : index
    %c0_93 = arith.constant 0 : index
    %233 = vector.load %arg6[%c1_91, %c0_92, %c0_93] : memref<15x2x1xf32, #tpu.memory_space<vmem>>, vector<1x2x1xf32>
    %234 = vector.shape_cast %233 : vector<1x2x1xf32> to vector<2x1xf32>
    %235 = vector.broadcast %234 : vector<2x1xf32> to vector<2x256xf32>
    %236 = arith.mulf %235, %232 : vector<2x256xf32>
    %237 = arith.addf %225, %236 : vector<2x256xf32>
    %c31_i32 = arith.constant 31 : i32
    %238 = tpu.dynamic_rotate %209 by %c31_i32 dim 1 : vector<2x256xf32>, i32 -> vector<2x256xf32>
    %c2_i32_94 = arith.constant 2 : i32
    %239 = vector.broadcast %c2_i32_94 : i32 to vector<1x256xi32>
    %240 = arith.cmpi sge, %2, %239 : vector<1x256xi32>
    %c15_i32_95 = arith.constant 15 : i32
    %241 = vector.broadcast %c15_i32_95 : i32 to vector<1x256xi32>
    %242 = arith.cmpi slt, %3, %241 : vector<1x256xi32>
    %243 = arith.andi %240, %242 : vector<1x256xi1>
    %cst_96 = arith.constant 0.000000e+00 : f32
    %244 = vector.shape_cast %243 : vector<1x256xi1> to vector<1x256xi1>
    %245 = vector.broadcast %244 : vector<1x256xi1> to vector<2x256xi1>
    %246 = vector.broadcast %cst_96 : f32 to vector<2x256xf32>
    %247 = arith.select %245, %238, %246 : vector<2x256xi1>, vector<2x256xf32>
    %c2_97 = arith.constant 2 : index
    %c0_98 = arith.constant 0 : index
    %c0_99 = arith.constant 0 : index
    %248 = vector.load %arg6[%c2_97, %c0_98, %c0_99] : memref<15x2x1xf32, #tpu.memory_space<vmem>>, vector<1x2x1xf32>
    %249 = vector.shape_cast %248 : vector<1x2x1xf32> to vector<2x1xf32>
    %250 = vector.broadcast %249 : vector<2x1xf32> to vector<2x256xf32>
    %251 = arith.mulf %250, %247 : vector<2x256xf32>
    %252 = arith.addf %237, %251 : vector<2x256xf32>
    %c17_i32_100 = arith.constant 17 : i32
    %253 = tpu.dynamic_rotate %209 by %c17_i32_100 dim 1 : vector<2x256xf32>, i32 -> vector<2x256xf32>
    %c1_i32_101 = arith.constant 1 : i32
    %254 = vector.broadcast %c1_i32_101 : i32 to vector<1x256xi32>
    %255 = arith.cmpi sge, %2, %254 : vector<1x256xi32>
    %c1_i32_102 = arith.constant 1 : i32
    %256 = vector.broadcast %c1_i32_102 : i32 to vector<1x256xi32>
    %257 = arith.cmpi sge, %3, %256 : vector<1x256xi32>
    %258 = arith.andi %255, %257 : vector<1x256xi1>
    %cst_103 = arith.constant 0.000000e+00 : f32
    %259 = vector.shape_cast %258 : vector<1x256xi1> to vector<1x256xi1>
    %260 = vector.broadcast %259 : vector<1x256xi1> to vector<2x256xi1>
    %261 = vector.broadcast %cst_103 : f32 to vector<2x256xf32>
    %262 = arith.select %260, %253, %261 : vector<2x256xi1>, vector<2x256xf32>
    %c3_104 = arith.constant 3 : index
    %c0_105 = arith.constant 0 : index
    %c0_106 = arith.constant 0 : index
    %263 = vector.load %arg6[%c3_104, %c0_105, %c0_106] : memref<15x2x1xf32, #tpu.memory_space<vmem>>, vector<1x2x1xf32>
    %264 = vector.shape_cast %263 : vector<1x2x1xf32> to vector<2x1xf32>
    %265 = vector.broadcast %264 : vector<2x1xf32> to vector<2x256xf32>
    %266 = arith.mulf %265, %262 : vector<2x256xf32>
    %267 = arith.addf %252, %266 : vector<2x256xf32>
    %c16_i32_107 = arith.constant 16 : i32
    %268 = tpu.dynamic_rotate %209 by %c16_i32_107 dim 1 : vector<2x256xf32>, i32 -> vector<2x256xf32>
    %c1_i32_108 = arith.constant 1 : i32
    %269 = vector.broadcast %c1_i32_108 : i32 to vector<1x256xi32>
    %270 = arith.cmpi sge, %2, %269 : vector<1x256xi32>
    %cst_109 = arith.constant 0.000000e+00 : f32
    %271 = vector.shape_cast %270 : vector<1x256xi1> to vector<1x256xi1>
    %272 = vector.broadcast %271 : vector<1x256xi1> to vector<2x256xi1>
    %273 = vector.broadcast %cst_109 : f32 to vector<2x256xf32>
    %274 = arith.select %272, %268, %273 : vector<2x256xi1>, vector<2x256xf32>
    %c4_110 = arith.constant 4 : index
    %c0_111 = arith.constant 0 : index
    %c0_112 = arith.constant 0 : index
    %275 = vector.load %arg6[%c4_110, %c0_111, %c0_112] : memref<15x2x1xf32, #tpu.memory_space<vmem>>, vector<1x2x1xf32>
    %276 = vector.shape_cast %275 : vector<1x2x1xf32> to vector<2x1xf32>
    %277 = vector.broadcast %276 : vector<2x1xf32> to vector<2x256xf32>
    %278 = arith.mulf %277, %274 : vector<2x256xf32>
    %279 = arith.addf %267, %278 : vector<2x256xf32>
    %c15_i32_113 = arith.constant 15 : i32
    %280 = tpu.dynamic_rotate %209 by %c15_i32_113 dim 1 : vector<2x256xf32>, i32 -> vector<2x256xf32>
    %c1_i32_114 = arith.constant 1 : i32
    %281 = vector.broadcast %c1_i32_114 : i32 to vector<1x256xi32>
    %282 = arith.cmpi sge, %2, %281 : vector<1x256xi32>
    %c15_i32_115 = arith.constant 15 : i32
    %283 = vector.broadcast %c15_i32_115 : i32 to vector<1x256xi32>
    %284 = arith.cmpi slt, %3, %283 : vector<1x256xi32>
    %285 = arith.andi %282, %284 : vector<1x256xi1>
    %cst_116 = arith.constant 0.000000e+00 : f32
    %286 = vector.shape_cast %285 : vector<1x256xi1> to vector<1x256xi1>
    %287 = vector.broadcast %286 : vector<1x256xi1> to vector<2x256xi1>
    %288 = vector.broadcast %cst_116 : f32 to vector<2x256xf32>
    %289 = arith.select %287, %280, %288 : vector<2x256xi1>, vector<2x256xf32>
    %c5_117 = arith.constant 5 : index
    %c0_118 = arith.constant 0 : index
    %c0_119 = arith.constant 0 : index
    %290 = vector.load %arg6[%c5_117, %c0_118, %c0_119] : memref<15x2x1xf32, #tpu.memory_space<vmem>>, vector<1x2x1xf32>
    %291 = vector.shape_cast %290 : vector<1x2x1xf32> to vector<2x1xf32>
    %292 = vector.broadcast %291 : vector<2x1xf32> to vector<2x256xf32>
    %293 = arith.mulf %292, %289 : vector<2x256xf32>
    %294 = arith.addf %279, %293 : vector<2x256xf32>
    %c1_i32_120 = arith.constant 1 : i32
    %295 = tpu.dynamic_rotate %209 by %c1_i32_120 dim 1 : vector<2x256xf32>, i32 -> vector<2x256xf32>
    %c1_i32_121 = arith.constant 1 : i32
    %296 = vector.broadcast %c1_i32_121 : i32 to vector<1x256xi32>
    %297 = arith.cmpi sge, %3, %296 : vector<1x256xi32>
    %cst_122 = arith.constant 0.000000e+00 : f32
    %298 = vector.shape_cast %297 : vector<1x256xi1> to vector<1x256xi1>
    %299 = vector.broadcast %298 : vector<1x256xi1> to vector<2x256xi1>
    %300 = vector.broadcast %cst_122 : f32 to vector<2x256xf32>
    %301 = arith.select %299, %295, %300 : vector<2x256xi1>, vector<2x256xf32>
    %c6_123 = arith.constant 6 : index
    %c0_124 = arith.constant 0 : index
    %c0_125 = arith.constant 0 : index
    %302 = vector.load %arg6[%c6_123, %c0_124, %c0_125] : memref<15x2x1xf32, #tpu.memory_space<vmem>>, vector<1x2x1xf32>
    %303 = vector.shape_cast %302 : vector<1x2x1xf32> to vector<2x1xf32>
    %304 = vector.broadcast %303 : vector<2x1xf32> to vector<2x256xf32>
    %305 = arith.mulf %304, %301 : vector<2x256xf32>
    %306 = arith.addf %294, %305 : vector<2x256xf32>
    %c7_126 = arith.constant 7 : index
    %c0_127 = arith.constant 0 : index
    %c0_128 = arith.constant 0 : index
    %307 = vector.load %arg6[%c7_126, %c0_127, %c0_128] : memref<15x2x1xf32, #tpu.memory_space<vmem>>, vector<1x2x1xf32>
    %308 = vector.shape_cast %307 : vector<1x2x1xf32> to vector<2x1xf32>
    %309 = vector.broadcast %308 : vector<2x1xf32> to vector<2x256xf32>
    %310 = arith.mulf %309, %209 : vector<2x256xf32>
    %311 = arith.addf %306, %310 : vector<2x256xf32>
    %c255_i32_129 = arith.constant 255 : i32
    %312 = tpu.dynamic_rotate %209 by %c255_i32_129 dim 1 : vector<2x256xf32>, i32 -> vector<2x256xf32>
    %c15_i32_130 = arith.constant 15 : i32
    %313 = vector.broadcast %c15_i32_130 : i32 to vector<1x256xi32>
    %314 = arith.cmpi slt, %3, %313 : vector<1x256xi32>
    %cst_131 = arith.constant 0.000000e+00 : f32
    %315 = vector.shape_cast %314 : vector<1x256xi1> to vector<1x256xi1>
    %316 = vector.broadcast %315 : vector<1x256xi1> to vector<2x256xi1>
    %317 = vector.broadcast %cst_131 : f32 to vector<2x256xf32>
    %318 = arith.select %316, %312, %317 : vector<2x256xi1>, vector<2x256xf32>
    %c8_132 = arith.constant 8 : index
    %c0_133 = arith.constant 0 : index
    %c0_134 = arith.constant 0 : index
    %319 = vector.load %arg6[%c8_132, %c0_133, %c0_134] : memref<15x2x1xf32, #tpu.memory_space<vmem>>, vector<1x2x1xf32>
    %320 = vector.shape_cast %319 : vector<1x2x1xf32> to vector<2x1xf32>
    %321 = vector.broadcast %320 : vector<2x1xf32> to vector<2x256xf32>
    %322 = arith.mulf %321, %318 : vector<2x256xf32>
    %323 = arith.addf %311, %322 : vector<2x256xf32>
    %c241_i32_135 = arith.constant 241 : i32
    %324 = tpu.dynamic_rotate %209 by %c241_i32_135 dim 1 : vector<2x256xf32>, i32 -> vector<2x256xf32>
    %c15_i32_136 = arith.constant 15 : i32
    %325 = vector.broadcast %c15_i32_136 : i32 to vector<1x256xi32>
    %326 = arith.cmpi slt, %2, %325 : vector<1x256xi32>
    %c1_i32_137 = arith.constant 1 : i32
    %327 = vector.broadcast %c1_i32_137 : i32 to vector<1x256xi32>
    %328 = arith.cmpi sge, %3, %327 : vector<1x256xi32>
    %329 = arith.andi %326, %328 : vector<1x256xi1>
    %cst_138 = arith.constant 0.000000e+00 : f32
    %330 = vector.shape_cast %329 : vector<1x256xi1> to vector<1x256xi1>
    %331 = vector.broadcast %330 : vector<1x256xi1> to vector<2x256xi1>
    %332 = vector.broadcast %cst_138 : f32 to vector<2x256xf32>
    %333 = arith.select %331, %324, %332 : vector<2x256xi1>, vector<2x256xf32>
    %c9 = arith.constant 9 : index
    %c0_139 = arith.constant 0 : index
    %c0_140 = arith.constant 0 : index
    %334 = vector.load %arg6[%c9, %c0_139, %c0_140] : memref<15x2x1xf32, #tpu.memory_space<vmem>>, vector<1x2x1xf32>
    %335 = vector.shape_cast %334 : vector<1x2x1xf32> to vector<2x1xf32>
    %336 = vector.broadcast %335 : vector<2x1xf32> to vector<2x256xf32>
    %337 = arith.mulf %336, %333 : vector<2x256xf32>
    %338 = arith.addf %323, %337 : vector<2x256xf32>
    %c240_i32_141 = arith.constant 240 : i32
    %339 = tpu.dynamic_rotate %209 by %c240_i32_141 dim 1 : vector<2x256xf32>, i32 -> vector<2x256xf32>
    %c15_i32_142 = arith.constant 15 : i32
    %340 = vector.broadcast %c15_i32_142 : i32 to vector<1x256xi32>
    %341 = arith.cmpi slt, %2, %340 : vector<1x256xi32>
    %cst_143 = arith.constant 0.000000e+00 : f32
    %342 = vector.shape_cast %341 : vector<1x256xi1> to vector<1x256xi1>
    %343 = vector.broadcast %342 : vector<1x256xi1> to vector<2x256xi1>
    %344 = vector.broadcast %cst_143 : f32 to vector<2x256xf32>
    %345 = arith.select %343, %339, %344 : vector<2x256xi1>, vector<2x256xf32>
    %c10 = arith.constant 10 : index
    %c0_144 = arith.constant 0 : index
    %c0_145 = arith.constant 0 : index
    %346 = vector.load %arg6[%c10, %c0_144, %c0_145] : memref<15x2x1xf32, #tpu.memory_space<vmem>>, vector<1x2x1xf32>
    %347 = vector.shape_cast %346 : vector<1x2x1xf32> to vector<2x1xf32>
    %348 = vector.broadcast %347 : vector<2x1xf32> to vector<2x256xf32>
    %349 = arith.mulf %348, %345 : vector<2x256xf32>
    %350 = arith.addf %338, %349 : vector<2x256xf32>
    %c239_i32_146 = arith.constant 239 : i32
    %351 = tpu.dynamic_rotate %209 by %c239_i32_146 dim 1 : vector<2x256xf32>, i32 -> vector<2x256xf32>
    %c15_i32_147 = arith.constant 15 : i32
    %352 = vector.broadcast %c15_i32_147 : i32 to vector<1x256xi32>
    %353 = arith.cmpi slt, %2, %352 : vector<1x256xi32>
    %c15_i32_148 = arith.constant 15 : i32
    %354 = vector.broadcast %c15_i32_148 : i32 to vector<1x256xi32>
    %355 = arith.cmpi slt, %3, %354 : vector<1x256xi32>
    %356 = arith.andi %353, %355 : vector<1x256xi1>
    %cst_149 = arith.constant 0.000000e+00 : f32
    %357 = vector.shape_cast %356 : vector<1x256xi1> to vector<1x256xi1>
    %358 = vector.broadcast %357 : vector<1x256xi1> to vector<2x256xi1>
    %359 = vector.broadcast %cst_149 : f32 to vector<2x256xf32>
    %360 = arith.select %358, %351, %359 : vector<2x256xi1>, vector<2x256xf32>
    %c11 = arith.constant 11 : index
    %c0_150 = arith.constant 0 : index
    %c0_151 = arith.constant 0 : index
    %361 = vector.load %arg6[%c11, %c0_150, %c0_151] : memref<15x2x1xf32, #tpu.memory_space<vmem>>, vector<1x2x1xf32>
    %362 = vector.shape_cast %361 : vector<1x2x1xf32> to vector<2x1xf32>
    %363 = vector.broadcast %362 : vector<2x1xf32> to vector<2x256xf32>
    %364 = arith.mulf %363, %360 : vector<2x256xf32>
    %365 = arith.addf %350, %364 : vector<2x256xf32>
    %c225_i32 = arith.constant 225 : i32
    %366 = tpu.dynamic_rotate %209 by %c225_i32 dim 1 : vector<2x256xf32>, i32 -> vector<2x256xf32>
    %c14_i32 = arith.constant 14 : i32
    %367 = vector.broadcast %c14_i32 : i32 to vector<1x256xi32>
    %368 = arith.cmpi slt, %2, %367 : vector<1x256xi32>
    %c1_i32_152 = arith.constant 1 : i32
    %369 = vector.broadcast %c1_i32_152 : i32 to vector<1x256xi32>
    %370 = arith.cmpi sge, %3, %369 : vector<1x256xi32>
    %371 = arith.andi %368, %370 : vector<1x256xi1>
    %cst_153 = arith.constant 0.000000e+00 : f32
    %372 = vector.shape_cast %371 : vector<1x256xi1> to vector<1x256xi1>
    %373 = vector.broadcast %372 : vector<1x256xi1> to vector<2x256xi1>
    %374 = vector.broadcast %cst_153 : f32 to vector<2x256xf32>
    %375 = arith.select %373, %366, %374 : vector<2x256xi1>, vector<2x256xf32>
    %c12 = arith.constant 12 : index
    %c0_154 = arith.constant 0 : index
    %c0_155 = arith.constant 0 : index
    %376 = vector.load %arg6[%c12, %c0_154, %c0_155] : memref<15x2x1xf32, #tpu.memory_space<vmem>>, vector<1x2x1xf32>
    %377 = vector.shape_cast %376 : vector<1x2x1xf32> to vector<2x1xf32>
    %378 = vector.broadcast %377 : vector<2x1xf32> to vector<2x256xf32>
    %379 = arith.mulf %378, %375 : vector<2x256xf32>
    %380 = arith.addf %365, %379 : vector<2x256xf32>
    %c224_i32 = arith.constant 224 : i32
    %381 = tpu.dynamic_rotate %209 by %c224_i32 dim 1 : vector<2x256xf32>, i32 -> vector<2x256xf32>
    %c14_i32_156 = arith.constant 14 : i32
    %382 = vector.broadcast %c14_i32_156 : i32 to vector<1x256xi32>
    %383 = arith.cmpi slt, %2, %382 : vector<1x256xi32>
    %cst_157 = arith.constant 0.000000e+00 : f32
    %384 = vector.shape_cast %383 : vector<1x256xi1> to vector<1x256xi1>
    %385 = vector.broadcast %384 : vector<1x256xi1> to vector<2x256xi1>
    %386 = vector.broadcast %cst_157 : f32 to vector<2x256xf32>
    %387 = arith.select %385, %381, %386 : vector<2x256xi1>, vector<2x256xf32>
    %c13 = arith.constant 13 : index
    %c0_158 = arith.constant 0 : index
    %c0_159 = arith.constant 0 : index
    %388 = vector.load %arg6[%c13, %c0_158, %c0_159] : memref<15x2x1xf32, #tpu.memory_space<vmem>>, vector<1x2x1xf32>
    %389 = vector.shape_cast %388 : vector<1x2x1xf32> to vector<2x1xf32>
    %390 = vector.broadcast %389 : vector<2x1xf32> to vector<2x256xf32>
    %391 = arith.mulf %390, %387 : vector<2x256xf32>
    %392 = arith.addf %380, %391 : vector<2x256xf32>
    %c223_i32 = arith.constant 223 : i32
    %393 = tpu.dynamic_rotate %209 by %c223_i32 dim 1 : vector<2x256xf32>, i32 -> vector<2x256xf32>
    %c14_i32_160 = arith.constant 14 : i32
    %394 = vector.broadcast %c14_i32_160 : i32 to vector<1x256xi32>
    %395 = arith.cmpi slt, %2, %394 : vector<1x256xi32>
    %c15_i32_161 = arith.constant 15 : i32
    %396 = vector.broadcast %c15_i32_161 : i32 to vector<1x256xi32>
    %397 = arith.cmpi slt, %3, %396 : vector<1x256xi32>
    %398 = arith.andi %395, %397 : vector<1x256xi1>
    %cst_162 = arith.constant 0.000000e+00 : f32
    %399 = vector.shape_cast %398 : vector<1x256xi1> to vector<1x256xi1>
    %400 = vector.broadcast %399 : vector<1x256xi1> to vector<2x256xi1>
    %401 = vector.broadcast %cst_162 : f32 to vector<2x256xf32>
    %402 = arith.select %400, %393, %401 : vector<2x256xi1>, vector<2x256xf32>
    %c14 = arith.constant 14 : index
    %c0_163 = arith.constant 0 : index
    %c0_164 = arith.constant 0 : index
    %403 = vector.load %arg6[%c14, %c0_163, %c0_164] : memref<15x2x1xf32, #tpu.memory_space<vmem>>, vector<1x2x1xf32>
    %404 = vector.shape_cast %403 : vector<1x2x1xf32> to vector<2x1xf32>
    %405 = vector.broadcast %404 : vector<2x1xf32> to vector<2x256xf32>
    %406 = arith.mulf %405, %402 : vector<2x256xf32>
    %407 = arith.addf %392, %406 : vector<2x256xf32>
    %c0_165 = arith.constant 0 : index
    %c0_166 = arith.constant 0 : index
    %408 = vector.load %arg7[%c0_165, %c0_166] : memref<2x1xf32, #tpu.memory_space<vmem>>, vector<2x1xf32>
    %409 = vector.broadcast %408 : vector<2x1xf32> to vector<2x256xf32>
    %410 = arith.addf %407, %409 : vector<2x256xf32>
    %cst_167 = arith.constant 5.000000e-01 : f32
    %411 = vector.broadcast %cst_167 : f32 to vector<2x256xf32>
    %412 = arith.mulf %411, %410 : vector<2x256xf32>
    %cst_168 = arith.constant 0.707106769 : f32
    %413 = vector.broadcast %cst_168 : f32 to vector<2x256xf32>
    %414 = arith.mulf %410, %413 : vector<2x256xf32>
    %415 = math.absf %414 : vector<2x256xf32>
    %cst_169 = arith.constant 0.327591091 : f32
    %416 = vector.broadcast %cst_169 : f32 to vector<2x256xf32>
    %417 = arith.mulf %416, %415 : vector<2x256xf32>
    %cst_170 = arith.constant 1.000000e+00 : f32
    %418 = vector.broadcast %cst_170 : f32 to vector<2x256xf32>
    %419 = arith.addf %418, %417 : vector<2x256xf32>
    %cst_171 = arith.constant 1.000000e+00 : f32
    %420 = vector.broadcast %cst_171 : f32 to vector<2x256xf32>
    %421 = arith.divf %420, %419 : vector<2x256xf32>
    %cst_172 = arith.constant 1.06140542 : f32
    %422 = vector.broadcast %cst_172 : f32 to vector<2x256xf32>
    %423 = arith.mulf %422, %421 : vector<2x256xf32>
    %cst_173 = arith.constant -1.45315206 : f32
    %424 = vector.broadcast %cst_173 : f32 to vector<2x256xf32>
    %425 = arith.addf %423, %424 : vector<2x256xf32>
    %426 = arith.mulf %425, %421 : vector<2x256xf32>
    %cst_174 = arith.constant 1.42141378 : f32
    %427 = vector.broadcast %cst_174 : f32 to vector<2x256xf32>
    %428 = arith.addf %426, %427 : vector<2x256xf32>
    %429 = arith.mulf %428, %421 : vector<2x256xf32>
    %cst_175 = arith.constant -0.284496725 : f32
    %430 = vector.broadcast %cst_175 : f32 to vector<2x256xf32>
    %431 = arith.addf %429, %430 : vector<2x256xf32>
    %432 = arith.mulf %431, %421 : vector<2x256xf32>
    %cst_176 = arith.constant 0.254829586 : f32
    %433 = vector.broadcast %cst_176 : f32 to vector<2x256xf32>
    %434 = arith.addf %432, %433 : vector<2x256xf32>
    %435 = arith.mulf %434, %421 : vector<2x256xf32>
    %cst_177 = arith.constant 0.000000e+00 : f32
    %436 = vector.broadcast %cst_177 : f32 to vector<2x256xf32>
    %437 = arith.subf %436, %415 : vector<2x256xf32>
    %438 = arith.mulf %437, %415 : vector<2x256xf32>
    %439 = math.exp %438 : vector<2x256xf32>
    %440 = arith.mulf %435, %439 : vector<2x256xf32>
    %cst_178 = arith.constant 1.000000e+00 : f32
    %441 = vector.broadcast %cst_178 : f32 to vector<2x256xf32>
    %442 = arith.subf %441, %440 : vector<2x256xf32>
    %cst_179 = arith.constant 0.000000e+00 : f32
    %443 = vector.broadcast %cst_179 : f32 to vector<2x256xf32>
    %444 = arith.cmpf olt, %414, %443 : vector<2x256xf32>
    %cst_180 = arith.constant 0.000000e+00 : f32
    %445 = vector.broadcast %cst_180 : f32 to vector<2x256xf32>
    %446 = arith.subf %445, %442 : vector<2x256xf32>
    %447 = arith.select %444, %446, %442 : vector<2x256xi1>, vector<2x256xf32>
    %cst_181 = arith.constant 1.000000e+00 : f32
    %448 = vector.broadcast %cst_181 : f32 to vector<2x256xf32>
    %449 = arith.addf %448, %447 : vector<2x256xf32>
    %450 = arith.mulf %412, %449 : vector<2x256xf32>
    %451 = vector.extract_strided_slice %49 {offsets = [4, 0], sizes = [2, 256], strides = [1, 1]} : vector<6x256xf32> to vector<2x256xf32>
    %452 = arith.addf %451, %450 : vector<2x256xf32>
    %cst_182 = arith.constant 0.000000e+00 : f32
    %453 = vector.broadcast %cst_182 : f32 to vector<2x256xf32>
    %c18_i32 = arith.constant 18 : i32
    %454 = tpu.dynamic_rotate %452 by %c18_i32 dim 1 : vector<2x256xf32>, i32 -> vector<2x256xf32>
    %c1_i32_183 = arith.constant 1 : i32
    %455 = vector.broadcast %c1_i32_183 : i32 to vector<1x256xi32>
    %456 = arith.cmpi sge, %2, %455 : vector<1x256xi32>
    %c2_i32_184 = arith.constant 2 : i32
    %457 = vector.broadcast %c2_i32_184 : i32 to vector<1x256xi32>
    %458 = arith.cmpi sge, %3, %457 : vector<1x256xi32>
    %459 = arith.andi %456, %458 : vector<1x256xi1>
    %cst_185 = arith.constant 0.000000e+00 : f32
    %460 = vector.shape_cast %459 : vector<1x256xi1> to vector<1x256xi1>
    %461 = vector.broadcast %460 : vector<1x256xi1> to vector<2x256xi1>
    %462 = vector.broadcast %cst_185 : f32 to vector<2x256xf32>
    %463 = arith.select %461, %454, %462 : vector<2x256xi1>, vector<2x256xf32>
    %c0_186 = arith.constant 0 : index
    %c0_187 = arith.constant 0 : index
    %c0_188 = arith.constant 0 : index
    %464 = vector.load %arg8[%c0_186, %c0_187, %c0_188] : memref<15x2x1xf32, #tpu.memory_space<vmem>>, vector<1x2x1xf32>
    %465 = vector.shape_cast %464 : vector<1x2x1xf32> to vector<2x1xf32>
    %466 = vector.broadcast %465 : vector<2x1xf32> to vector<2x256xf32>
    %467 = arith.mulf %466, %463 : vector<2x256xf32>
    %468 = arith.addf %453, %467 : vector<2x256xf32>
    %c17_i32_189 = arith.constant 17 : i32
    %469 = tpu.dynamic_rotate %452 by %c17_i32_189 dim 1 : vector<2x256xf32>, i32 -> vector<2x256xf32>
    %c1_i32_190 = arith.constant 1 : i32
    %470 = vector.broadcast %c1_i32_190 : i32 to vector<1x256xi32>
    %471 = arith.cmpi sge, %2, %470 : vector<1x256xi32>
    %c1_i32_191 = arith.constant 1 : i32
    %472 = vector.broadcast %c1_i32_191 : i32 to vector<1x256xi32>
    %473 = arith.cmpi sge, %3, %472 : vector<1x256xi32>
    %474 = arith.andi %471, %473 : vector<1x256xi1>
    %cst_192 = arith.constant 0.000000e+00 : f32
    %475 = vector.shape_cast %474 : vector<1x256xi1> to vector<1x256xi1>
    %476 = vector.broadcast %475 : vector<1x256xi1> to vector<2x256xi1>
    %477 = vector.broadcast %cst_192 : f32 to vector<2x256xf32>
    %478 = arith.select %476, %469, %477 : vector<2x256xi1>, vector<2x256xf32>
    %c1_193 = arith.constant 1 : index
    %c0_194 = arith.constant 0 : index
    %c0_195 = arith.constant 0 : index
    %479 = vector.load %arg8[%c1_193, %c0_194, %c0_195] : memref<15x2x1xf32, #tpu.memory_space<vmem>>, vector<1x2x1xf32>
    %480 = vector.shape_cast %479 : vector<1x2x1xf32> to vector<2x1xf32>
    %481 = vector.broadcast %480 : vector<2x1xf32> to vector<2x256xf32>
    %482 = arith.mulf %481, %478 : vector<2x256xf32>
    %483 = arith.addf %468, %482 : vector<2x256xf32>
    %c16_i32_196 = arith.constant 16 : i32
    %484 = tpu.dynamic_rotate %452 by %c16_i32_196 dim 1 : vector<2x256xf32>, i32 -> vector<2x256xf32>
    %c1_i32_197 = arith.constant 1 : i32
    %485 = vector.broadcast %c1_i32_197 : i32 to vector<1x256xi32>
    %486 = arith.cmpi sge, %2, %485 : vector<1x256xi32>
    %cst_198 = arith.constant 0.000000e+00 : f32
    %487 = vector.shape_cast %486 : vector<1x256xi1> to vector<1x256xi1>
    %488 = vector.broadcast %487 : vector<1x256xi1> to vector<2x256xi1>
    %489 = vector.broadcast %cst_198 : f32 to vector<2x256xf32>
    %490 = arith.select %488, %484, %489 : vector<2x256xi1>, vector<2x256xf32>
    %c2_199 = arith.constant 2 : index
    %c0_200 = arith.constant 0 : index
    %c0_201 = arith.constant 0 : index
    %491 = vector.load %arg8[%c2_199, %c0_200, %c0_201] : memref<15x2x1xf32, #tpu.memory_space<vmem>>, vector<1x2x1xf32>
    %492 = vector.shape_cast %491 : vector<1x2x1xf32> to vector<2x1xf32>
    %493 = vector.broadcast %492 : vector<2x1xf32> to vector<2x256xf32>
    %494 = arith.mulf %493, %490 : vector<2x256xf32>
    %495 = arith.addf %483, %494 : vector<2x256xf32>
    %c15_i32_202 = arith.constant 15 : i32
    %496 = tpu.dynamic_rotate %452 by %c15_i32_202 dim 1 : vector<2x256xf32>, i32 -> vector<2x256xf32>
    %c1_i32_203 = arith.constant 1 : i32
    %497 = vector.broadcast %c1_i32_203 : i32 to vector<1x256xi32>
    %498 = arith.cmpi sge, %2, %497 : vector<1x256xi32>
    %c15_i32_204 = arith.constant 15 : i32
    %499 = vector.broadcast %c15_i32_204 : i32 to vector<1x256xi32>
    %500 = arith.cmpi slt, %3, %499 : vector<1x256xi32>
    %501 = arith.andi %498, %500 : vector<1x256xi1>
    %cst_205 = arith.constant 0.000000e+00 : f32
    %502 = vector.shape_cast %501 : vector<1x256xi1> to vector<1x256xi1>
    %503 = vector.broadcast %502 : vector<1x256xi1> to vector<2x256xi1>
    %504 = vector.broadcast %cst_205 : f32 to vector<2x256xf32>
    %505 = arith.select %503, %496, %504 : vector<2x256xi1>, vector<2x256xf32>
    %c3_206 = arith.constant 3 : index
    %c0_207 = arith.constant 0 : index
    %c0_208 = arith.constant 0 : index
    %506 = vector.load %arg8[%c3_206, %c0_207, %c0_208] : memref<15x2x1xf32, #tpu.memory_space<vmem>>, vector<1x2x1xf32>
    %507 = vector.shape_cast %506 : vector<1x2x1xf32> to vector<2x1xf32>
    %508 = vector.broadcast %507 : vector<2x1xf32> to vector<2x256xf32>
    %509 = arith.mulf %508, %505 : vector<2x256xf32>
    %510 = arith.addf %495, %509 : vector<2x256xf32>
    %c14_i32_209 = arith.constant 14 : i32
    %511 = tpu.dynamic_rotate %452 by %c14_i32_209 dim 1 : vector<2x256xf32>, i32 -> vector<2x256xf32>
    %c1_i32_210 = arith.constant 1 : i32
    %512 = vector.broadcast %c1_i32_210 : i32 to vector<1x256xi32>
    %513 = arith.cmpi sge, %2, %512 : vector<1x256xi32>
    %c14_i32_211 = arith.constant 14 : i32
    %514 = vector.broadcast %c14_i32_211 : i32 to vector<1x256xi32>
    %515 = arith.cmpi slt, %3, %514 : vector<1x256xi32>
    %516 = arith.andi %513, %515 : vector<1x256xi1>
    %cst_212 = arith.constant 0.000000e+00 : f32
    %517 = vector.shape_cast %516 : vector<1x256xi1> to vector<1x256xi1>
    %518 = vector.broadcast %517 : vector<1x256xi1> to vector<2x256xi1>
    %519 = vector.broadcast %cst_212 : f32 to vector<2x256xf32>
    %520 = arith.select %518, %511, %519 : vector<2x256xi1>, vector<2x256xf32>
    %c4_213 = arith.constant 4 : index
    %c0_214 = arith.constant 0 : index
    %c0_215 = arith.constant 0 : index
    %521 = vector.load %arg8[%c4_213, %c0_214, %c0_215] : memref<15x2x1xf32, #tpu.memory_space<vmem>>, vector<1x2x1xf32>
    %522 = vector.shape_cast %521 : vector<1x2x1xf32> to vector<2x1xf32>
    %523 = vector.broadcast %522 : vector<2x1xf32> to vector<2x256xf32>
    %524 = arith.mulf %523, %520 : vector<2x256xf32>
    %525 = arith.addf %510, %524 : vector<2x256xf32>
    %c2_i32_216 = arith.constant 2 : i32
    %526 = tpu.dynamic_rotate %452 by %c2_i32_216 dim 1 : vector<2x256xf32>, i32 -> vector<2x256xf32>
    %c2_i32_217 = arith.constant 2 : i32
    %527 = vector.broadcast %c2_i32_217 : i32 to vector<1x256xi32>
    %528 = arith.cmpi sge, %3, %527 : vector<1x256xi32>
    %cst_218 = arith.constant 0.000000e+00 : f32
    %529 = vector.shape_cast %528 : vector<1x256xi1> to vector<1x256xi1>
    %530 = vector.broadcast %529 : vector<1x256xi1> to vector<2x256xi1>
    %531 = vector.broadcast %cst_218 : f32 to vector<2x256xf32>
    %532 = arith.select %530, %526, %531 : vector<2x256xi1>, vector<2x256xf32>
    %c5_219 = arith.constant 5 : index
    %c0_220 = arith.constant 0 : index
    %c0_221 = arith.constant 0 : index
    %533 = vector.load %arg8[%c5_219, %c0_220, %c0_221] : memref<15x2x1xf32, #tpu.memory_space<vmem>>, vector<1x2x1xf32>
    %534 = vector.shape_cast %533 : vector<1x2x1xf32> to vector<2x1xf32>
    %535 = vector.broadcast %534 : vector<2x1xf32> to vector<2x256xf32>
    %536 = arith.mulf %535, %532 : vector<2x256xf32>
    %537 = arith.addf %525, %536 : vector<2x256xf32>
    %c1_i32_222 = arith.constant 1 : i32
    %538 = tpu.dynamic_rotate %452 by %c1_i32_222 dim 1 : vector<2x256xf32>, i32 -> vector<2x256xf32>
    %c1_i32_223 = arith.constant 1 : i32
    %539 = vector.broadcast %c1_i32_223 : i32 to vector<1x256xi32>
    %540 = arith.cmpi sge, %3, %539 : vector<1x256xi32>
    %cst_224 = arith.constant 0.000000e+00 : f32
    %541 = vector.shape_cast %540 : vector<1x256xi1> to vector<1x256xi1>
    %542 = vector.broadcast %541 : vector<1x256xi1> to vector<2x256xi1>
    %543 = vector.broadcast %cst_224 : f32 to vector<2x256xf32>
    %544 = arith.select %542, %538, %543 : vector<2x256xi1>, vector<2x256xf32>
    %c6_225 = arith.constant 6 : index
    %c0_226 = arith.constant 0 : index
    %c0_227 = arith.constant 0 : index
    %545 = vector.load %arg8[%c6_225, %c0_226, %c0_227] : memref<15x2x1xf32, #tpu.memory_space<vmem>>, vector<1x2x1xf32>
    %546 = vector.shape_cast %545 : vector<1x2x1xf32> to vector<2x1xf32>
    %547 = vector.broadcast %546 : vector<2x1xf32> to vector<2x256xf32>
    %548 = arith.mulf %547, %544 : vector<2x256xf32>
    %549 = arith.addf %537, %548 : vector<2x256xf32>
    %c7_228 = arith.constant 7 : index
    %c0_229 = arith.constant 0 : index
    %c0_230 = arith.constant 0 : index
    %550 = vector.load %arg8[%c7_228, %c0_229, %c0_230] : memref<15x2x1xf32, #tpu.memory_space<vmem>>, vector<1x2x1xf32>
    %551 = vector.shape_cast %550 : vector<1x2x1xf32> to vector<2x1xf32>
    %552 = vector.broadcast %551 : vector<2x1xf32> to vector<2x256xf32>
    %553 = arith.mulf %552, %452 : vector<2x256xf32>
    %554 = arith.addf %549, %553 : vector<2x256xf32>
    %c255_i32_231 = arith.constant 255 : i32
    %555 = tpu.dynamic_rotate %452 by %c255_i32_231 dim 1 : vector<2x256xf32>, i32 -> vector<2x256xf32>
    %c15_i32_232 = arith.constant 15 : i32
    %556 = vector.broadcast %c15_i32_232 : i32 to vector<1x256xi32>
    %557 = arith.cmpi slt, %3, %556 : vector<1x256xi32>
    %cst_233 = arith.constant 0.000000e+00 : f32
    %558 = vector.shape_cast %557 : vector<1x256xi1> to vector<1x256xi1>
    %559 = vector.broadcast %558 : vector<1x256xi1> to vector<2x256xi1>
    %560 = vector.broadcast %cst_233 : f32 to vector<2x256xf32>
    %561 = arith.select %559, %555, %560 : vector<2x256xi1>, vector<2x256xf32>
    %c8_234 = arith.constant 8 : index
    %c0_235 = arith.constant 0 : index
    %c0_236 = arith.constant 0 : index
    %562 = vector.load %arg8[%c8_234, %c0_235, %c0_236] : memref<15x2x1xf32, #tpu.memory_space<vmem>>, vector<1x2x1xf32>
    %563 = vector.shape_cast %562 : vector<1x2x1xf32> to vector<2x1xf32>
    %564 = vector.broadcast %563 : vector<2x1xf32> to vector<2x256xf32>
    %565 = arith.mulf %564, %561 : vector<2x256xf32>
    %566 = arith.addf %554, %565 : vector<2x256xf32>
    %c254_i32 = arith.constant 254 : i32
    %567 = tpu.dynamic_rotate %452 by %c254_i32 dim 1 : vector<2x256xf32>, i32 -> vector<2x256xf32>
    %c14_i32_237 = arith.constant 14 : i32
    %568 = vector.broadcast %c14_i32_237 : i32 to vector<1x256xi32>
    %569 = arith.cmpi slt, %3, %568 : vector<1x256xi32>
    %cst_238 = arith.constant 0.000000e+00 : f32
    %570 = vector.shape_cast %569 : vector<1x256xi1> to vector<1x256xi1>
    %571 = vector.broadcast %570 : vector<1x256xi1> to vector<2x256xi1>
    %572 = vector.broadcast %cst_238 : f32 to vector<2x256xf32>
    %573 = arith.select %571, %567, %572 : vector<2x256xi1>, vector<2x256xf32>
    %c9_239 = arith.constant 9 : index
    %c0_240 = arith.constant 0 : index
    %c0_241 = arith.constant 0 : index
    %574 = vector.load %arg8[%c9_239, %c0_240, %c0_241] : memref<15x2x1xf32, #tpu.memory_space<vmem>>, vector<1x2x1xf32>
    %575 = vector.shape_cast %574 : vector<1x2x1xf32> to vector<2x1xf32>
    %576 = vector.broadcast %575 : vector<2x1xf32> to vector<2x256xf32>
    %577 = arith.mulf %576, %573 : vector<2x256xf32>
    %578 = arith.addf %566, %577 : vector<2x256xf32>
    %c242_i32 = arith.constant 242 : i32
    %579 = tpu.dynamic_rotate %452 by %c242_i32 dim 1 : vector<2x256xf32>, i32 -> vector<2x256xf32>
    %c15_i32_242 = arith.constant 15 : i32
    %580 = vector.broadcast %c15_i32_242 : i32 to vector<1x256xi32>
    %581 = arith.cmpi slt, %2, %580 : vector<1x256xi32>
    %c2_i32_243 = arith.constant 2 : i32
    %582 = vector.broadcast %c2_i32_243 : i32 to vector<1x256xi32>
    %583 = arith.cmpi sge, %3, %582 : vector<1x256xi32>
    %584 = arith.andi %581, %583 : vector<1x256xi1>
    %cst_244 = arith.constant 0.000000e+00 : f32
    %585 = vector.shape_cast %584 : vector<1x256xi1> to vector<1x256xi1>
    %586 = vector.broadcast %585 : vector<1x256xi1> to vector<2x256xi1>
    %587 = vector.broadcast %cst_244 : f32 to vector<2x256xf32>
    %588 = arith.select %586, %579, %587 : vector<2x256xi1>, vector<2x256xf32>
    %c10_245 = arith.constant 10 : index
    %c0_246 = arith.constant 0 : index
    %c0_247 = arith.constant 0 : index
    %589 = vector.load %arg8[%c10_245, %c0_246, %c0_247] : memref<15x2x1xf32, #tpu.memory_space<vmem>>, vector<1x2x1xf32>
    %590 = vector.shape_cast %589 : vector<1x2x1xf32> to vector<2x1xf32>
    %591 = vector.broadcast %590 : vector<2x1xf32> to vector<2x256xf32>
    %592 = arith.mulf %591, %588 : vector<2x256xf32>
    %593 = arith.addf %578, %592 : vector<2x256xf32>
    %c241_i32_248 = arith.constant 241 : i32
    %594 = tpu.dynamic_rotate %452 by %c241_i32_248 dim 1 : vector<2x256xf32>, i32 -> vector<2x256xf32>
    %c15_i32_249 = arith.constant 15 : i32
    %595 = vector.broadcast %c15_i32_249 : i32 to vector<1x256xi32>
    %596 = arith.cmpi slt, %2, %595 : vector<1x256xi32>
    %c1_i32_250 = arith.constant 1 : i32
    %597 = vector.broadcast %c1_i32_250 : i32 to vector<1x256xi32>
    %598 = arith.cmpi sge, %3, %597 : vector<1x256xi32>
    %599 = arith.andi %596, %598 : vector<1x256xi1>
    %cst_251 = arith.constant 0.000000e+00 : f32
    %600 = vector.shape_cast %599 : vector<1x256xi1> to vector<1x256xi1>
    %601 = vector.broadcast %600 : vector<1x256xi1> to vector<2x256xi1>
    %602 = vector.broadcast %cst_251 : f32 to vector<2x256xf32>
    %603 = arith.select %601, %594, %602 : vector<2x256xi1>, vector<2x256xf32>
    %c11_252 = arith.constant 11 : index
    %c0_253 = arith.constant 0 : index
    %c0_254 = arith.constant 0 : index
    %604 = vector.load %arg8[%c11_252, %c0_253, %c0_254] : memref<15x2x1xf32, #tpu.memory_space<vmem>>, vector<1x2x1xf32>
    %605 = vector.shape_cast %604 : vector<1x2x1xf32> to vector<2x1xf32>
    %606 = vector.broadcast %605 : vector<2x1xf32> to vector<2x256xf32>
    %607 = arith.mulf %606, %603 : vector<2x256xf32>
    %608 = arith.addf %593, %607 : vector<2x256xf32>
    %c240_i32_255 = arith.constant 240 : i32
    %609 = tpu.dynamic_rotate %452 by %c240_i32_255 dim 1 : vector<2x256xf32>, i32 -> vector<2x256xf32>
    %c15_i32_256 = arith.constant 15 : i32
    %610 = vector.broadcast %c15_i32_256 : i32 to vector<1x256xi32>
    %611 = arith.cmpi slt, %2, %610 : vector<1x256xi32>
    %cst_257 = arith.constant 0.000000e+00 : f32
    %612 = vector.shape_cast %611 : vector<1x256xi1> to vector<1x256xi1>
    %613 = vector.broadcast %612 : vector<1x256xi1> to vector<2x256xi1>
    %614 = vector.broadcast %cst_257 : f32 to vector<2x256xf32>
    %615 = arith.select %613, %609, %614 : vector<2x256xi1>, vector<2x256xf32>
    %c12_258 = arith.constant 12 : index
    %c0_259 = arith.constant 0 : index
    %c0_260 = arith.constant 0 : index
    %616 = vector.load %arg8[%c12_258, %c0_259, %c0_260] : memref<15x2x1xf32, #tpu.memory_space<vmem>>, vector<1x2x1xf32>
    %617 = vector.shape_cast %616 : vector<1x2x1xf32> to vector<2x1xf32>
    %618 = vector.broadcast %617 : vector<2x1xf32> to vector<2x256xf32>
    %619 = arith.mulf %618, %615 : vector<2x256xf32>
    %620 = arith.addf %608, %619 : vector<2x256xf32>
    %c239_i32_261 = arith.constant 239 : i32
    %621 = tpu.dynamic_rotate %452 by %c239_i32_261 dim 1 : vector<2x256xf32>, i32 -> vector<2x256xf32>
    %c15_i32_262 = arith.constant 15 : i32
    %622 = vector.broadcast %c15_i32_262 : i32 to vector<1x256xi32>
    %623 = arith.cmpi slt, %2, %622 : vector<1x256xi32>
    %c15_i32_263 = arith.constant 15 : i32
    %624 = vector.broadcast %c15_i32_263 : i32 to vector<1x256xi32>
    %625 = arith.cmpi slt, %3, %624 : vector<1x256xi32>
    %626 = arith.andi %623, %625 : vector<1x256xi1>
    %cst_264 = arith.constant 0.000000e+00 : f32
    %627 = vector.shape_cast %626 : vector<1x256xi1> to vector<1x256xi1>
    %628 = vector.broadcast %627 : vector<1x256xi1> to vector<2x256xi1>
    %629 = vector.broadcast %cst_264 : f32 to vector<2x256xf32>
    %630 = arith.select %628, %621, %629 : vector<2x256xi1>, vector<2x256xf32>
    %c13_265 = arith.constant 13 : index
    %c0_266 = arith.constant 0 : index
    %c0_267 = arith.constant 0 : index
    %631 = vector.load %arg8[%c13_265, %c0_266, %c0_267] : memref<15x2x1xf32, #tpu.memory_space<vmem>>, vector<1x2x1xf32>
    %632 = vector.shape_cast %631 : vector<1x2x1xf32> to vector<2x1xf32>
    %633 = vector.broadcast %632 : vector<2x1xf32> to vector<2x256xf32>
    %634 = arith.mulf %633, %630 : vector<2x256xf32>
    %635 = arith.addf %620, %634 : vector<2x256xf32>
    %c238_i32 = arith.constant 238 : i32
    %636 = tpu.dynamic_rotate %452 by %c238_i32 dim 1 : vector<2x256xf32>, i32 -> vector<2x256xf32>
    %c15_i32_268 = arith.constant 15 : i32
    %637 = vector.broadcast %c15_i32_268 : i32 to vector<1x256xi32>
    %638 = arith.cmpi slt, %2, %637 : vector<1x256xi32>
    %c14_i32_269 = arith.constant 14 : i32
    %639 = vector.broadcast %c14_i32_269 : i32 to vector<1x256xi32>
    %640 = arith.cmpi slt, %3, %639 : vector<1x256xi32>
    %641 = arith.andi %638, %640 : vector<1x256xi1>
    %cst_270 = arith.constant 0.000000e+00 : f32
    %642 = vector.shape_cast %641 : vector<1x256xi1> to vector<1x256xi1>
    %643 = vector.broadcast %642 : vector<1x256xi1> to vector<2x256xi1>
    %644 = vector.broadcast %cst_270 : f32 to vector<2x256xf32>
    %645 = arith.select %643, %636, %644 : vector<2x256xi1>, vector<2x256xf32>
    %c14_271 = arith.constant 14 : index
    %c0_272 = arith.constant 0 : index
    %c0_273 = arith.constant 0 : index
    %646 = vector.load %arg8[%c14_271, %c0_272, %c0_273] : memref<15x2x1xf32, #tpu.memory_space<vmem>>, vector<1x2x1xf32>
    %647 = vector.shape_cast %646 : vector<1x2x1xf32> to vector<2x1xf32>
    %648 = vector.broadcast %647 : vector<2x1xf32> to vector<2x256xf32>
    %649 = arith.mulf %648, %645 : vector<2x256xf32>
    %650 = arith.addf %635, %649 : vector<2x256xf32>
    %c0_274 = arith.constant 0 : index
    %c0_275 = arith.constant 0 : index
    %651 = vector.load %arg9[%c0_274, %c0_275] : memref<2x1xf32, #tpu.memory_space<vmem>>, vector<2x1xf32>
    %652 = vector.broadcast %651 : vector<2x1xf32> to vector<2x256xf32>
    %653 = arith.addf %650, %652 : vector<2x256xf32>
    %cst_276 = arith.constant 5.000000e-01 : f32
    %654 = vector.broadcast %cst_276 : f32 to vector<2x256xf32>
    %655 = arith.mulf %654, %653 : vector<2x256xf32>
    %cst_277 = arith.constant 0.707106769 : f32
    %656 = vector.broadcast %cst_277 : f32 to vector<2x256xf32>
    %657 = arith.mulf %653, %656 : vector<2x256xf32>
    %658 = math.absf %657 : vector<2x256xf32>
    %cst_278 = arith.constant 0.327591091 : f32
    %659 = vector.broadcast %cst_278 : f32 to vector<2x256xf32>
    %660 = arith.mulf %659, %658 : vector<2x256xf32>
    %cst_279 = arith.constant 1.000000e+00 : f32
    %661 = vector.broadcast %cst_279 : f32 to vector<2x256xf32>
    %662 = arith.addf %661, %660 : vector<2x256xf32>
    %cst_280 = arith.constant 1.000000e+00 : f32
    %663 = vector.broadcast %cst_280 : f32 to vector<2x256xf32>
    %664 = arith.divf %663, %662 : vector<2x256xf32>
    %cst_281 = arith.constant 1.06140542 : f32
    %665 = vector.broadcast %cst_281 : f32 to vector<2x256xf32>
    %666 = arith.mulf %665, %664 : vector<2x256xf32>
    %cst_282 = arith.constant -1.45315206 : f32
    %667 = vector.broadcast %cst_282 : f32 to vector<2x256xf32>
    %668 = arith.addf %666, %667 : vector<2x256xf32>
    %669 = arith.mulf %668, %664 : vector<2x256xf32>
    %cst_283 = arith.constant 1.42141378 : f32
    %670 = vector.broadcast %cst_283 : f32 to vector<2x256xf32>
    %671 = arith.addf %669, %670 : vector<2x256xf32>
    %672 = arith.mulf %671, %664 : vector<2x256xf32>
    %cst_284 = arith.constant -0.284496725 : f32
    %673 = vector.broadcast %cst_284 : f32 to vector<2x256xf32>
    %674 = arith.addf %672, %673 : vector<2x256xf32>
    %675 = arith.mulf %674, %664 : vector<2x256xf32>
    %cst_285 = arith.constant 0.254829586 : f32
    %676 = vector.broadcast %cst_285 : f32 to vector<2x256xf32>
    %677 = arith.addf %675, %676 : vector<2x256xf32>
    %678 = arith.mulf %677, %664 : vector<2x256xf32>
    %cst_286 = arith.constant 0.000000e+00 : f32
    %679 = vector.broadcast %cst_286 : f32 to vector<2x256xf32>
    %680 = arith.subf %679, %658 : vector<2x256xf32>
    %681 = arith.mulf %680, %658 : vector<2x256xf32>
    %682 = math.exp %681 : vector<2x256xf32>
    %683 = arith.mulf %678, %682 : vector<2x256xf32>
    %cst_287 = arith.constant 1.000000e+00 : f32
    %684 = vector.broadcast %cst_287 : f32 to vector<2x256xf32>
    %685 = arith.subf %684, %683 : vector<2x256xf32>
    %cst_288 = arith.constant 0.000000e+00 : f32
    %686 = vector.broadcast %cst_288 : f32 to vector<2x256xf32>
    %687 = arith.cmpf olt, %657, %686 : vector<2x256xf32>
    %cst_289 = arith.constant 0.000000e+00 : f32
    %688 = vector.broadcast %cst_289 : f32 to vector<2x256xf32>
    %689 = arith.subf %688, %685 : vector<2x256xf32>
    %690 = arith.select %687, %689, %685 : vector<2x256xi1>, vector<2x256xf32>
    %cst_290 = arith.constant 1.000000e+00 : f32
    %691 = vector.broadcast %cst_290 : f32 to vector<2x256xf32>
    %692 = arith.addf %691, %690 : vector<2x256xf32>
    %693 = arith.mulf %655, %692 : vector<2x256xf32>
    %694 = vector.extract_strided_slice %1 {offsets = [0, 0], sizes = [2, 256], strides = [1, 1]} : vector<6x256xf32> to vector<2x256xf32>
    %695 = arith.addf %207, %694 : vector<2x256xf32>
    %cst_291 = arith.constant 5.000000e-01 : f32
    %696 = vector.broadcast %cst_291 : f32 to vector<2x256xf32>
    %697 = arith.mulf %696, %695 : vector<2x256xf32>
    %cst_292 = arith.constant 0.707106769 : f32
    %698 = vector.broadcast %cst_292 : f32 to vector<2x256xf32>
    %699 = arith.mulf %695, %698 : vector<2x256xf32>
    %700 = math.absf %699 : vector<2x256xf32>
    %cst_293 = arith.constant 0.327591091 : f32
    %701 = vector.broadcast %cst_293 : f32 to vector<2x256xf32>
    %702 = arith.mulf %701, %700 : vector<2x256xf32>
    %cst_294 = arith.constant 1.000000e+00 : f32
    %703 = vector.broadcast %cst_294 : f32 to vector<2x256xf32>
    %704 = arith.addf %703, %702 : vector<2x256xf32>
    %cst_295 = arith.constant 1.000000e+00 : f32
    %705 = vector.broadcast %cst_295 : f32 to vector<2x256xf32>
    %706 = arith.divf %705, %704 : vector<2x256xf32>
    %cst_296 = arith.constant 1.06140542 : f32
    %707 = vector.broadcast %cst_296 : f32 to vector<2x256xf32>
    %708 = arith.mulf %707, %706 : vector<2x256xf32>
    %cst_297 = arith.constant -1.45315206 : f32
    %709 = vector.broadcast %cst_297 : f32 to vector<2x256xf32>
    %710 = arith.addf %708, %709 : vector<2x256xf32>
    %711 = arith.mulf %710, %706 : vector<2x256xf32>
    %cst_298 = arith.constant 1.42141378 : f32
    %712 = vector.broadcast %cst_298 : f32 to vector<2x256xf32>
    %713 = arith.addf %711, %712 : vector<2x256xf32>
    %714 = arith.mulf %713, %706 : vector<2x256xf32>
    %cst_299 = arith.constant -0.284496725 : f32
    %715 = vector.broadcast %cst_299 : f32 to vector<2x256xf32>
    %716 = arith.addf %714, %715 : vector<2x256xf32>
    %717 = arith.mulf %716, %706 : vector<2x256xf32>
    %cst_300 = arith.constant 0.254829586 : f32
    %718 = vector.broadcast %cst_300 : f32 to vector<2x256xf32>
    %719 = arith.addf %717, %718 : vector<2x256xf32>
    %720 = arith.mulf %719, %706 : vector<2x256xf32>
    %cst_301 = arith.constant 0.000000e+00 : f32
    %721 = vector.broadcast %cst_301 : f32 to vector<2x256xf32>
    %722 = arith.subf %721, %700 : vector<2x256xf32>
    %723 = arith.mulf %722, %700 : vector<2x256xf32>
    %724 = math.exp %723 : vector<2x256xf32>
    %725 = arith.mulf %720, %724 : vector<2x256xf32>
    %cst_302 = arith.constant 1.000000e+00 : f32
    %726 = vector.broadcast %cst_302 : f32 to vector<2x256xf32>
    %727 = arith.subf %726, %725 : vector<2x256xf32>
    %cst_303 = arith.constant 0.000000e+00 : f32
    %728 = vector.broadcast %cst_303 : f32 to vector<2x256xf32>
    %729 = arith.cmpf olt, %699, %728 : vector<2x256xf32>
    %cst_304 = arith.constant 0.000000e+00 : f32
    %730 = vector.broadcast %cst_304 : f32 to vector<2x256xf32>
    %731 = arith.subf %730, %727 : vector<2x256xf32>
    %732 = arith.select %729, %731, %727 : vector<2x256xi1>, vector<2x256xf32>
    %cst_305 = arith.constant 1.000000e+00 : f32
    %733 = vector.broadcast %cst_305 : f32 to vector<2x256xf32>
    %734 = arith.addf %733, %732 : vector<2x256xf32>
    %735 = arith.mulf %697, %734 : vector<2x256xf32>
    %c0_306 = arith.constant 0 : index
    %c0_307 = arith.constant 0 : index
    %c0_308 = arith.constant 0 : index
    %736 = vector.load %arg12[%c0_306, %c0_307, %c0_308] : memref<1x6x256xf32, #tpu.memory_space<vmem>>, vector<1x2x256xf32>
    %737 = vector.shape_cast %736 : vector<1x2x256xf32> to vector<2x256xf32>
    %738 = vector.shape_cast %735 : vector<2x256xf32> to vector<1x2x256xf32>
    tpu.vector_store %arg12[%c0_306, %c0_307, %c0_308], %738 {strides = array<i32>} : memref<1x6x256xf32, #tpu.memory_space<vmem>>, vector<1x2x256xf32>,
    %739 = vector.extract_strided_slice %1 {offsets = [2, 0], sizes = [2, 256], strides = [1, 1]} : vector<6x256xf32> to vector<2x256xf32>
    %740 = arith.addf %450, %739 : vector<2x256xf32>
    %cst_309 = arith.constant 5.000000e-01 : f32
    %741 = vector.broadcast %cst_309 : f32 to vector<2x256xf32>
    %742 = arith.mulf %741, %740 : vector<2x256xf32>
    %cst_310 = arith.constant 0.707106769 : f32
    %743 = vector.broadcast %cst_310 : f32 to vector<2x256xf32>
    %744 = arith.mulf %740, %743 : vector<2x256xf32>
    %745 = math.absf %744 : vector<2x256xf32>
    %cst_311 = arith.constant 0.327591091 : f32
    %746 = vector.broadcast %cst_311 : f32 to vector<2x256xf32>
    %747 = arith.mulf %746, %745 : vector<2x256xf32>
    %cst_312 = arith.constant 1.000000e+00 : f32
    %748 = vector.broadcast %cst_312 : f32 to vector<2x256xf32>
    %749 = arith.addf %748, %747 : vector<2x256xf32>
    %cst_313 = arith.constant 1.000000e+00 : f32
    %750 = vector.broadcast %cst_313 : f32 to vector<2x256xf32>
    %751 = arith.divf %750, %749 : vector<2x256xf32>
    %cst_314 = arith.constant 1.06140542 : f32
    %752 = vector.broadcast %cst_314 : f32 to vector<2x256xf32>
    %753 = arith.mulf %752, %751 : vector<2x256xf32>
    %cst_315 = arith.constant -1.45315206 : f32
    %754 = vector.broadcast %cst_315 : f32 to vector<2x256xf32>
    %755 = arith.addf %753, %754 : vector<2x256xf32>
    %756 = arith.mulf %755, %751 : vector<2x256xf32>
    %cst_316 = arith.constant 1.42141378 : f32
    %757 = vector.broadcast %cst_316 : f32 to vector<2x256xf32>
    %758 = arith.addf %756, %757 : vector<2x256xf32>
    %759 = arith.mulf %758, %751 : vector<2x256xf32>
    %cst_317 = arith.constant -0.284496725 : f32
    %760 = vector.broadcast %cst_317 : f32 to vector<2x256xf32>
    %761 = arith.addf %759, %760 : vector<2x256xf32>
    %762 = arith.mulf %761, %751 : vector<2x256xf32>
    %cst_318 = arith.constant 0.254829586 : f32
    %763 = vector.broadcast %cst_318 : f32 to vector<2x256xf32>
    %764 = arith.addf %762, %763 : vector<2x256xf32>
    %765 = arith.mulf %764, %751 : vector<2x256xf32>
    %cst_319 = arith.constant 0.000000e+00 : f32
    %766 = vector.broadcast %cst_319 : f32 to vector<2x256xf32>
    %767 = arith.subf %766, %745 : vector<2x256xf32>
    %768 = arith.mulf %767, %745 : vector<2x256xf32>
    %769 = math.exp %768 : vector<2x256xf32>
    %770 = arith.mulf %765, %769 : vector<2x256xf32>
    %cst_320 = arith.constant 1.000000e+00 : f32
    %771 = vector.broadcast %cst_320 : f32 to vector<2x256xf32>
    %772 = arith.subf %771, %770 : vector<2x256xf32>
    %cst_321 = arith.constant 0.000000e+00 : f32
    %773 = vector.broadcast %cst_321 : f32 to vector<2x256xf32>
    %774 = arith.cmpf olt, %744, %773 : vector<2x256xf32>
    %cst_322 = arith.constant 0.000000e+00 : f32
    %775 = vector.broadcast %cst_322 : f32 to vector<2x256xf32>
    %776 = arith.subf %775, %772 : vector<2x256xf32>
    %777 = arith.select %774, %776, %772 : vector<2x256xi1>, vector<2x256xf32>
    %cst_323 = arith.constant 1.000000e+00 : f32
    %778 = vector.broadcast %cst_323 : f32 to vector<2x256xf32>
    %779 = arith.addf %778, %777 : vector<2x256xf32>
    %780 = arith.mulf %742, %779 : vector<2x256xf32>
    %c0_324 = arith.constant 0 : index
    %c2_325 = arith.constant 2 : index
    %c0_326 = arith.constant 0 : index
    %781 = vector.load %arg12[%c0_324, %c2_325, %c0_326] : memref<1x6x256xf32, #tpu.memory_space<vmem>>, vector<1x2x256xf32>
    %782 = vector.shape_cast %781 : vector<1x2x256xf32> to vector<2x256xf32>
    %783 = vector.shape_cast %780 : vector<2x256xf32> to vector<1x2x256xf32>
    tpu.vector_store %arg12[%c0_324, %c2_325, %c0_326], %783 {strides = array<i32>} : memref<1x6x256xf32, #tpu.memory_space<vmem>>, vector<1x2x256xf32>,
    %784 = vector.extract_strided_slice %1 {offsets = [4, 0], sizes = [2, 256], strides = [1, 1]} : vector<6x256xf32> to vector<2x256xf32>
    %785 = arith.addf %693, %784 : vector<2x256xf32>
    %cst_327 = arith.constant 5.000000e-01 : f32
    %786 = vector.broadcast %cst_327 : f32 to vector<2x256xf32>
    %787 = arith.mulf %786, %785 : vector<2x256xf32>
    %cst_328 = arith.constant 0.707106769 : f32
    %788 = vector.broadcast %cst_328 : f32 to vector<2x256xf32>
    %789 = arith.mulf %785, %788 : vector<2x256xf32>
    %790 = math.absf %789 : vector<2x256xf32>
    %cst_329 = arith.constant 0.327591091 : f32
    %791 = vector.broadcast %cst_329 : f32 to vector<2x256xf32>
    %792 = arith.mulf %791, %790 : vector<2x256xf32>
    %cst_330 = arith.constant 1.000000e+00 : f32
    %793 = vector.broadcast %cst_330 : f32 to vector<2x256xf32>
    %794 = arith.addf %793, %792 : vector<2x256xf32>
    %cst_331 = arith.constant 1.000000e+00 : f32
    %795 = vector.broadcast %cst_331 : f32 to vector<2x256xf32>
    %796 = arith.divf %795, %794 : vector<2x256xf32>
    %cst_332 = arith.constant 1.06140542 : f32
    %797 = vector.broadcast %cst_332 : f32 to vector<2x256xf32>
    %798 = arith.mulf %797, %796 : vector<2x256xf32>
    %cst_333 = arith.constant -1.45315206 : f32
    %799 = vector.broadcast %cst_333 : f32 to vector<2x256xf32>
    %800 = arith.addf %798, %799 : vector<2x256xf32>
    %801 = arith.mulf %800, %796 : vector<2x256xf32>
    %cst_334 = arith.constant 1.42141378 : f32
    %802 = vector.broadcast %cst_334 : f32 to vector<2x256xf32>
    %803 = arith.addf %801, %802 : vector<2x256xf32>
    %804 = arith.mulf %803, %796 : vector<2x256xf32>
    %cst_335 = arith.constant -0.284496725 : f32
    %805 = vector.broadcast %cst_335 : f32 to vector<2x256xf32>
    %806 = arith.addf %804, %805 : vector<2x256xf32>
    %807 = arith.mulf %806, %796 : vector<2x256xf32>
    %cst_336 = arith.constant 0.254829586 : f32
    %808 = vector.broadcast %cst_336 : f32 to vector<2x256xf32>
    %809 = arith.addf %807, %808 : vector<2x256xf32>
    %810 = arith.mulf %809, %796 : vector<2x256xf32>
    %cst_337 = arith.constant 0.000000e+00 : f32
    %811 = vector.broadcast %cst_337 : f32 to vector<2x256xf32>
    %812 = arith.subf %811, %790 : vector<2x256xf32>
    %813 = arith.mulf %812, %790 : vector<2x256xf32>
    %814 = math.exp %813 : vector<2x256xf32>
    %815 = arith.mulf %810, %814 : vector<2x256xf32>
    %cst_338 = arith.constant 1.000000e+00 : f32
    %816 = vector.broadcast %cst_338 : f32 to vector<2x256xf32>
    %817 = arith.subf %816, %815 : vector<2x256xf32>
    %cst_339 = arith.constant 0.000000e+00 : f32
    %818 = vector.broadcast %cst_339 : f32 to vector<2x256xf32>
    %819 = arith.cmpf olt, %789, %818 : vector<2x256xf32>
    %cst_340 = arith.constant 0.000000e+00 : f32
    %820 = vector.broadcast %cst_340 : f32 to vector<2x256xf32>
    %821 = arith.subf %820, %817 : vector<2x256xf32>
    %822 = arith.select %819, %821, %817 : vector<2x256xi1>, vector<2x256xf32>
    %cst_341 = arith.constant 1.000000e+00 : f32
    %823 = vector.broadcast %cst_341 : f32 to vector<2x256xf32>
    %824 = arith.addf %823, %822 : vector<2x256xf32>
    %825 = arith.mulf %787, %824 : vector<2x256xf32>
    %c0_342 = arith.constant 0 : index
    %c4_343 = arith.constant 4 : index
    %c0_344 = arith.constant 0 : index
    %826 = vector.load %arg12[%c0_342, %c4_343, %c0_344] : memref<1x6x256xf32, #tpu.memory_space<vmem>>, vector<1x2x256xf32>
    %827 = vector.shape_cast %826 : vector<1x2x256xf32> to vector<2x256xf32>
    %828 = vector.shape_cast %825 : vector<2x256xf32> to vector<1x2x256xf32>
    tpu.vector_store %arg12[%c0_342, %c4_343, %c0_344], %828 {strides = array<i32>} : memref<1x6x256xf32, #tpu.memory_space<vmem>>, vector<1x2x256xf32>,
    return
  }
  func.func @transform_0(%arg0: i32) -> (i32, i32, i32) {
    %c0_i32 = arith.constant 0 : i32
    %c0_i32_0 = arith.constant 0 : i32
    %c0_i32_1 = arith.constant 0 : i32
    return %arg0, %c0_i32, %c0_i32_0 : i32, i32, i32
  }
  func.func @transform_1(%arg0: i32) -> (i32, i32, i32) {
    %c0_i32 = arith.constant 0 : i32
    %c0_i32_0 = arith.constant 0 : i32
    %c0_i32_1 = arith.constant 0 : i32
    %c0_i32_2 = arith.constant 0 : i32
    return %c0_i32, %c0_i32_0, %c0_i32_1 : i32, i32, i32
  }
  func.func @transform_2(%arg0: i32) -> (i32, i32) {
    %c0_i32 = arith.constant 0 : i32
    %c0_i32_0 = arith.constant 0 : i32
    %c0_i32_1 = arith.constant 0 : i32
    return %c0_i32, %c0_i32_0 : i32, i32
  }
  func.func @transform_3(%arg0: i32) -> (i32, i32, i32) {
    %c0_i32 = arith.constant 0 : i32
    %c0_i32_0 = arith.constant 0 : i32
    %c0_i32_1 = arith.constant 0 : i32
    %c0_i32_2 = arith.constant 0 : i32
    return %c0_i32, %c0_i32_0, %c0_i32_1 : i32, i32, i32
  }
  func.func @transform_4(%arg0: i32) -> (i32, i32) {
    %c0_i32 = arith.constant 0 : i32
    %c0_i32_0 = arith.constant 0 : i32
    %c0_i32_1 = arith.constant 0 : i32
    return %c0_i32, %c0_i32_0 : i32, i32
  }
  func.func @transform_5(%arg0: i32) -> (i32, i32, i32) {
    %c0_i32 = arith.constant 0 : i32
    %c0_i32_0 = arith.constant 0 : i32
    %c0_i32_1 = arith.constant 0 : i32
    %c0_i32_2 = arith.constant 0 : i32
    return %c0_i32, %c0_i32_0, %c0_i32_1 : i32, i32, i32
  }
  func.func @transform_6(%arg0: i32) -> (i32, i32) {
    %c0_i32 = arith.constant 0 : i32
    %c0_i32_0 = arith.constant 0 : i32
    %c0_i32_1 = arith.constant 0 : i32
    return %c0_i32, %c0_i32_0 : i32, i32
  }
  func.func @transform_7(%arg0: i32) -> (i32, i32, i32) {
    %c0_i32 = arith.constant 0 : i32
    %c0_i32_0 = arith.constant 0 : i32
    %c0_i32_1 = arith.constant 0 : i32
    %c0_i32_2 = arith.constant 0 : i32
    return %c0_i32, %c0_i32_0, %c0_i32_1 : i32, i32, i32
  }
  func.func @transform_8(%arg0: i32) -> (i32, i32) {
    %c0_i32 = arith.constant 0 : i32
    %c0_i32_0 = arith.constant 0 : i32
    %c0_i32_1 = arith.constant 0 : i32
    return %c0_i32, %c0_i32_0 : i32, i32
  }
  func.func @transform_9(%arg0: i32) -> (i32, i32) {
    %c0_i32 = arith.constant 0 : i32
    %c0_i32_0 = arith.constant 0 : i32
    %c0_i32_1 = arith.constant 0 : i32
    return %c0_i32, %c0_i32_0 : i32, i32
  }
  func.func @transform_10(%arg0: i32) -> (i32, i32) {
    %c0_i32 = arith.constant 0 : i32
    %c0_i32_0 = arith.constant 0 : i32
    %c0_i32_1 = arith.constant 0 : i32
    return %c0_i32, %c0_i32_0 : i32, i32
  }
  func.func @transform_11(%arg0: i32) -> (i32, i32, i32) {
    %c0_i32 = arith.constant 0 : i32
    %c0_i32_0 = arith.constant 0 : i32
    %c0_i32_1 = arith.constant 0 : i32
    return %arg0, %c0_i32, %c0_i32_0 : i32, i32, i32
  }
}

</mosaic_0001>

<bundles_post_ra>
// kernel: tile.9
= control target key start
LH: loop header
LB: loop body
LE: loop exit
PB: predicated region body
PF: predicated region fallthrough
CT: control target
= control target key end

     0   :  { %s7_s6 = smov 3  ;;  %s21_s9 = smov 3  ;;  %vm4_vm0 = vcmask 130048   ;;  %vm11_vm1 = vcmask 1048448   ;;  %vm18_vm2 = vcmask 917248   ;;  %vm25_vm3 = vcmask 786048   ;;  %s128_s0 = inlined_call_operand.vmem [shape: s32[16,16], index: 0, kind: input, shape index: {}]   ;;  %s129_s1 = inlined_call_operand.vmem [shape: s32[1,256], index: 1, kind: output, shape index: {}]  }
   0x1   :  { %v66_v0 = vld [vmem:[%s128_s0 + $0x7] ss:$8 sm:%s7_s6]   ;;  %s81_s10 = smov 112   ;;  %v68_v1 = vld [vmem:[%s128_s0 + $0x5] ss:$8 sm:%s21_s9]   ;;  %s14_s13 = smov 3 }
   0x2   :  { %9 = vrot.lane.b32.xlu0 %v66_v0, %s81_s10  ;;  %s82_s14 = smov 80   ;;  %v67_v2 = vld [vmem:[%s128_s0 + $0x6] ss:$8 sm:%s14_s13]   ;;  %s28_s17 = smov 3  ;;  %vm32_vm4 = vcmask 654848   ;;  %vm39_vm5 = vcmask 523648  }
   0x3   :  { %23 = vrot.lane.b32.xlu1 %v68_v1, %s82_s14  ;;  %v69_v3 = vld [vmem:[%s128_s0 + $0x4] ss:$8 sm:%s28_s17]   ;;  %s35_s20 = smov 3  ;;  %s42_s21 = smov 3  ;;  %vm46_vm6 = vcmask 392448   ;;  %vm53_vm7 = vcmask 261248  }
   0x4   :  { %s83_s22 = smov 96   ;;  %s84_s23 = smov 64   ;;  %v70_v4 = vld [vmem:[%s128_s0 + $0x3] ss:$8 sm:%s35_s20]   ;;  %v71_v5 = vld [vmem:[%s128_s0 + $0x2] ss:$8 sm:%s42_s21]  }
   0x5   :  { %s2_s26 = smov 3  ;;  %s49_s29 = smov 3 }
   0x6   :  { %16 = vrot.lane.b32.xlu0 %v67_v2, %s83_s22  ;;  %v3_v6 = vld [vmem:[%s128_s0] ss:$8 sm:%s2_s26]   ;;  %s85_s3 = smov 48   ;;  %s86_s4 = smov 32  }
   0x7   :  { %30 = vrot.lane.b32.xlu1 %v69_v3, %s84_s23  ;;  %5 = vst.msk [vmem:[#allocation0] ss:$8 sm:$0x3] %vm4_vm0, %v3_v6   ;;  %v72_v7 = vld [vmem:[%s128_s0 + $0x1] ss:$8 sm:%s49_s29]   ;;  %s87_s0 = smov 16  }
   0xa   :  { %37 = vrot.lane.b32.xlu0 %v70_v4, %s85_s3 }
   0xb   :  { %44 = vrot.lane.b32.xlu1 %v71_v5, %s86_s4 }
   0xe   :  { %51 = vrot.lane.b32.xlu0 %v72_v7, %s87_s0 }
  0x74   :  { %v10_v8 = vpop.permute.xlu0 %9  }
  0x75   :  { %12 = vst.msk [vmem:[#allocation0] ss:$8 sm:$0x3] %vm11_vm1, %v10_v8   ;;  %v24_v9 = vpop.permute.xlu1 %23  }
  0x78   :  { %v17_v10 = vpop.permute.xlu0 %16  }
  0x79   :  { %19 = vst.msk [vmem:[#allocation0] ss:$8 sm:$0x3] %vm18_vm2, %v17_v10   ;;  %v31_v11 = vpop.permute.xlu1 %30  }
  0x7a   :  { %26 = vst.msk [vmem:[#allocation0] ss:$8 sm:$0x3] %vm25_vm3, %v24_v9  }
  0x7b   :  { %33 = vst.msk [vmem:[#allocation0] ss:$8 sm:$0x3] %vm32_vm4, %v31_v11  }
  0x7c   :  { %v38_v12 = vpop.permute.xlu0 %37  }
  0x7d   :  { %40 = vst.msk [vmem:[#allocation0] ss:$8 sm:$0x3] %vm39_vm5, %v38_v12   ;;  %v45_v13 = vpop.permute.xlu1 %44  }
  0x7e   :  { %47 = vst.msk [vmem:[#allocation0] ss:$8 sm:$0x3] %vm46_vm6, %v45_v13  }
  0x80   :  { %v52_v14 = vpop.permute.xlu0 %51  }
  0x81   :  { %54 = vst.msk [vmem:[#allocation0] ss:$8 sm:$0x3] %vm53_vm7, %v52_v14  }
  0x88   :  { %v58_v15 = vld [vmem:[#allocation0] sm:$0x1]  ;;  %v62_v16 = vld [vmem:[#allocation0 + $0x8] sm:$0x1] }
  0x89   :  { %60 = vst [vmem:[%s129_s1] sm:$0x1] %v58_v15  ;;  %73 = vst [vmem:[%s129_s1 + $0x1] sm:$0x1] %v62_v16 }

// kernel: a_call__.1
= control target key start
LH: loop header
LB: loop body
LE: loop exit
PB: predicated region body
PF: predicated region fallthrough
CT: control target
= control target key end

     0   :  { %s2178_s17 = smov 0   ;;  %s3338_s0 = inlined_call_operand.vmem [shape: f32[2,6,256], index: 0, kind: input, shape index: {}]   ;;  %s3339_s1 = inlined_call_operand.vmem [shape: f32[6,6,1], index: 1, kind: input, shape index: {}]   ;;  %s3340_s2 = inlined_call_operand.vmem [shape: f32[6,1], index: 2, kind: input, shape index: {}]   ;;  %s3341_s3 = inlined_call_operand.vmem [shape: f32[9,2,1], index: 3, kind: input, shape index: {}]   ;;  %s3342_s4 = inlined_call_operand.vmem [shape: f32[2,1], index: 4, kind: input, shape index: {}]   ;;  %s3343_s5 = inlined_call_operand.vmem [shape: f32[15,2,1], index: 5, kind: input, shape index: {}]   ;;  %s3344_s6 = inlined_call_operand.vmem [shape: f32[2,1], index: 6, kind: input, shape index: {}]   ;;  %s3345_s7 = inlined_call_operand.vmem [shape: f32[15,2,1], index: 7, kind: input, shape index: {}]   ;;  %s3346_s8 = inlined_call_operand.vmem [shape: f32[2,1], index: 8, kind: input, shape index: {}]   ;;  %s3347_s9 = inlined_call_operand.vmem [shape: s32[1,256], index: 9, kind: input, shape index: {}]   ;;  %s3348_s10 = inlined_call_operand.vmem [shape: s32[1,256], index: 10, kind: input, shape index: {}]   ;;  %s3349_s11 = inlined_call_operand.vmem [shape: f32[2,6,256], index: 11, kind: output, shape index: {}]  }
   0x1 LB: > { %s1953_s18 = sadd.s32 4294967295, %s2095_s17   ;;  %p1957_p0 = scmp.ge.s32.totalorder %s2095_s17, 1  ;;  %s2095_s17 = sphi %s2178_s17, %s21_s17  }
   0x2   : > { %p337_p1 = scmp.lt.s32.totalorder %s2095_s17, 3 }
   0x4   : > { %p338_p2 = pnand %p1957_p0, %p337_p1 }
   0x6   : > { %341 = sbr.rel (%p338_p2) target bundleno = 874 (0x36a), region = 64 }
   0xd   : > { %v1963_v0 = vld [vmem:[%s3339_s1 + $0x10] sm:$0x3f]  ;;  %v391_v1 = vld [vmem:[%s3339_s1] sm:$0x3f]  ;;  %v3386_v2 = vmov 0   ;;  %p377_p3 = scmp.lt.s32.totalorder %s1953_s18, 1  ;;  %v397_v18 = vlaneseq }
   0xe   : > { %2037 = vset.pattern.permute.xlu1 %v3386_v2  ;;  %2036 = vset.pattern.permute.xlu0 %v3386_v2  ;;  %v1964_v3 = vld [vmem:[%s3339_s1 + $0x18] sm:$0x3f]  ;;  %v1962_v4 = vld [vmem:[%s3339_s1 + $0x8] sm:$0x3f]  ;;  %v1965_v6 = vld [vmem:[%s3339_s1 + $0x20] sm:$0x3f] }
   0xf   : > { %432 = vperm.xlu1 %2037, %v1963_v0   ;;  %394 = vperm.xlu0 %2036, %v391_v1   ;;  %v1966_v5 = vld [vmem:[%s3339_s1 + $0x28] sm:$0x3f]  ;;  %v537_v7 = vld [vmem:[%s3341_s3] sm:$0x3]  ;;  %v1968_v9 = vld [vmem:[%s3341_s3 + $0x4] sm:$0x3] }
  0x10   : > { %v504_v8 = vld [vmem:[%s3340_s2] sm:$0x3f]  ;;  %v1970_v11 = vld [vmem:[%s3341_s3 + $0x8] sm:$0x3]  ;;  %v1969_v12 = vld [vmem:[%s3341_s3 + $0x6] sm:$0x3] }
  0x11   : > { %v1967_v10 = vld [vmem:[%s3341_s3 + $0x2] sm:$0x3]  ;;  %v1972_v13 = vld [vmem:[%s3341_s3 + $0xc] sm:$0x3]  ;;  %v1971_v14 = vld [vmem:[%s3341_s3 + $0xa] sm:$0x3] }
  0x12   : > { %v1974_v15 = vld [vmem:[%s3341_s3 + $0x10] sm:$0x3]  ;;  %v1973_v16 = vld [vmem:[%s3341_s3 + $0xe] sm:$0x3]  ;;  %v780_v17 = vld [vmem:[%s3342_s4] sm:$0x3] }
  0x13   : > { %451 = vperm.xlu1 %2037, %v1964_v3   ;;  %413 = vperm.xlu0 %2036, %v1962_v4   ;;  %s3551_s18 = smov (!%p377_p3, %s1953_s18), 1  ;;  %v398_v19 = vshrl.u32 %v397_v18, 7  ;;  %s2098_s23 = smov 17  }
  0x14   : > { %s3350_s19 = sshll.u32 %s3551_s18, 4  ;;  %s2099_s24 = smov 16  }
  0x15   : > { %s2252_s22 = scalar_lea.vmem %s3338_s0, %s3350_s19  ;;  %v2254_v20 = vsub.s32 0, %v398_v19  ;;  %v2256_v21 = vsub.s32 1, %v398_v19  ;;  %v437_v24 = vsub.s32 2, %v398_v19  ;;  %v456_v27 = vsub.s32 3, %v398_v19  ;;  %s2100_s25 = smov 15  }
  0x16   : > { %v2259_v22 = vld [vmem:[%s2252_s22] sm:$0x3f]  ;;  %v2262_v23 = vld [vmem:[%s2252_s22 + $0x8] sm:$0x3f]  ;;  %v475_v32 = vsub.s32 4, %v398_v19  ;;  %v494_v39 = vsub.s32 5, %v398_v19 }
  0x17   : > { %489 = vperm.xlu1 %2037, %v1966_v5   ;;  %470 = vperm.xlu0 %2036, %v1965_v6   ;;  %v400_v28 = vrot.slane %v2259_v22, %v2254_v20  ;;  %v404_v29 = vrot.slane %v2262_v23, %v2254_v20  ;;  %v419_v30 = vrot.slane %v2259_v22, %v2256_v21  ;;  %s2101_s26 = smov 1   ;;  %s3372_s27 = smov 127   ;;  %v1985_v19 = vld [vmem:[%s3343_s5 + $0x16] sm:$0x3] }
  0x18   : > { %v423_v31 = vrot.slane %v2262_v23, %v2256_v21  ;;  %v438_v33 = vrot.slane %v2259_v22, %v437_v24  ;;  %v442_v34 = vrot.slane %v2262_v23, %v437_v24  ;;  %v457_v36 = vrot.slane %v2259_v22, %v456_v27  ;;  %s3370_s28 = smov 113   ;;  %s3353_s29 = smov 112   ;;  %v1984_v24 = vld [vmem:[%s3343_s5 + $0x14] sm:$0x3] }
  0x19   : > { %v461_v37 = vrot.slane %v2262_v23, %v456_v27  ;;  %v476_v44 = vrot.slane %v2259_v22, %v475_v32  ;;  %v480_v45 = vrot.slane %v2262_v23, %v475_v32  ;;  %v495_v50 = vrot.slane %v2259_v22, %v494_v39  ;;  %s3351_s30 = smov 111   ;;  %v1210_v27 = vld [vmem:[%s3344_s6] sm:$0x3]  ;;  %s2106_s19 = smov 33  }
  0x1a   : > { %v499_v51 = vrot.slane %v2262_v23, %v494_v39  ;;  %s2107_s21 = smov 32   ;;  %s3431_s12 = smov 111  }
  0x1b   : > { %540 = vperm.xlu1 %2037, %v537_v7   ;;  %507 = vperm.xlu0 %2036, %v504_v8   ;;  %v1975_v8 = vld [vmem:[%s3343_s5 + $0x2] sm:$0x3]  ;;  %s3432_s13 = sshll.u32 %s3551_s18, 4  ;;  %s2109_s20 = smov 97  }
  0x1c   : > { %s2671_s16 = scalar_lea.vmem %s3349_s11, %s3432_s13  ;;  %s2110_s18 = smov 96  }
  0x1d   : > { %s2115_s13 = smov 126   ;;  %s3493_s14 = smov 113  }
  0x1e   : > { %s2117_s15 = smov 110  }
  0x1f   : > { %604 = vperm.xlu1 %2037, %v1968_v9   ;;  %571 = vperm.xlu0 %2036, %v1967_v10   ;;  %v878_v9 = vld [vmem:[%s3343_s5] sm:$0x3]  ;;  %v1977_v10 = vld [vmem:[%s3343_s5 + $0x6] sm:$0x3] }
  0x23   : > { %646 = vperm.xlu1 %2037, %v1970_v11   ;;  %635 = vperm.xlu0 %2036, %v1969_v12   ;;  %v1976_v11 = vld [vmem:[%s3343_s5 + $0x4] sm:$0x3]  ;;  %v1979_v12 = vld [vmem:[%s3343_s5 + $0xa] sm:$0x3] }
  0x27   : > { %710 = vperm.xlu1 %2037, %v1972_v13   ;;  %677 = vperm.xlu0 %2036, %v1971_v14   ;;  %v1978_v13 = vld [vmem:[%s3343_s5 + $0x8] sm:$0x3]  ;;  %v1981_v14 = vld [vmem:[%s3343_s5 + $0xe] sm:$0x3] }
  0x2b   : > { %773 = vperm.xlu1 %2037, %v1974_v15   ;;  %741 = vperm.xlu0 %2036, %v1973_v16   ;;  %v1980_v15 = vld [vmem:[%s3343_s5 + $0xc] sm:$0x3]  ;;  %v1983_v16 = vld [vmem:[%s3343_s5 + $0x12] sm:$0x3] }
  0x2f   : > { %783 = vperm.xlu0 %2036, %v780_v17   ;;  %v1982_v17 = vld [vmem:[%s3343_s5 + $0x10] sm:$0x3] }
  0x8e   : > { %v433_v25 = vpop.permute.xlu1 %432  ;;  %v395_v26 = vpop.permute.xlu0 %394 }
  0x8f   : > { %v405_v40 = vmul.f32 %v400_v28, %v395_v26  ;;  %v406_v41 = vmul.f32 %v404_v29, %v395_v26  ;;  %v443_v46 = vmul.f32 %v438_v33, %v433_v25  ;;  %v444_v47 = vmul.f32 %v442_v34, %v433_v25  ;;  %v1987_v25 = vld [vmem:[%s3343_s5 + $0x1a] sm:$0x3]  ;;  %v1986_v26 = vld [vmem:[%s3343_s5 + $0x18] sm:$0x3]  ;;  %v1988_v28 = vld [vmem:[%s3343_s5 + $0x1c] sm:$0x3] }
  0x92   : > { %v452_v35 = vpop.permute.xlu1 %451  ;;  %v414_v38 = vpop.permute.xlu0 %413 }
  0x93   : > { %v424_v42 = vmul.f32 %v419_v30, %v414_v38  ;;  %v425_v43 = vmul.f32 %v423_v31, %v414_v38  ;;  %v462_v53 = vmul.f32 %v457_v36, %v452_v35  ;;  %v463_v54 = vmul.f32 %v461_v37, %v452_v35  ;;  %v2379_v35 = vld [vmem:[%s3347_s9] sm:$0x3] }
  0x94   : > { %v2384_v36 = vld [vmem:[%s3348_s10] sm:$0x3]  ;;  %vm3355_vm0 = vcmp.ge.s32.totalorder %v2379_v35, 1  ;;  %vm3361_vm11 = vcmp.lt.s32.totalorder %v2379_v35, 15 }
  0x95   : > { %v426_v48 = vadd.f32 %v424_v42, %v405_v40  ;;  %v427_v49 = vadd.f32 %v425_v43, %v406_v41  ;;  %vm3360_vm1 = vcmp.ge.s32.totalorder %v2384_v36, 1  ;;  %vm3363_vm3 = vcmp.lt.s32.totalorder %v2384_v36, 15 }
  0x96   : > { %v471_v52 = vpop.permute.xlu0 %470  ;;  %v490_v57 = vpop.permute.xlu1 %489  ;;  %vm523_vm2 = vmand %vm3355_vm0, %vm3360_vm1  ;;  %v554_v42 = vsel %vm3355_vm0, 1, %v3386_v2  ;;  %v2410_v43 = vand.u32 127, %v397_v18 }
  0x97   : > { %v445_v55 = vadd.f32 %v443_v46, %v426_v48  ;;  %v446_v56 = vadd.f32 %v444_v47, %v427_v49  ;;  %v481_v60 = vmul.f32 %v476_v44, %v471_v52  ;;  %v482_v61 = vmul.f32 %v480_v45, %v471_v52  ;;  %vm586_vm4 = vmand %vm3355_vm0, %vm3363_vm3 }
  0x98   : > { %v500_v62 = vmul.f32 %v495_v50, %v490_v57  ;;  %v501_v63 = vmul.f32 %v499_v51, %v490_v57  ;;  %v524_v41 = vsel %vm523_vm2, 1, %v3386_v2  ;;  %v558_v48 = vrot.slane %v554_v42, %v2254_v20 }
  0x99   : > { %v464_v58 = vadd.f32 %v462_v53, %v445_v55  ;;  %v465_v59 = vadd.f32 %v463_v54, %v446_v56  ;;  %v528_v45 = vrot.slane %v524_v41, %v2254_v20  ;;  %v532_v46 = vrot.slane %v524_v41, %v2256_v21 }
  0x9a   : > { %v508_v5 = vpop.permute.xlu0 %507  ;;  %v2364_v29 = vpop.permute.xlu1 %540  ;;  %v587_v49 = vsel %vm586_vm4, 1, %v3386_v2  ;;  %v562_v50 = vrot.slane %v554_v42, %v2256_v21  ;;  %v618_v51 = vsel %vm3360_vm1, 1, %v3386_v2  ;;  %vm3358_vm5 = vcmp.lt.s32.totalorder %v2410_v43, 16  ;;  %vm692_vm4 = vmand %vm3361_vm11, %vm3360_vm1 }
  0x9b   : > { %v483_v0 = vadd.f32 %v481_v60, %v464_v58  ;;  %v484_v1 = vadd.f32 %v482_v61, %v465_v59  ;;  %vm3359_vm6 = vcmp.lt.s32.totalorder %v2410_v43, 17  ;;  %v591_v18 = vrot.slane %v587_v49, %v2254_v20 }
  0x9c   : > { %v595_v52 = vrot.slane %v587_v49, %v2256_v21  ;;  %vm2424_vm7 = vcmp.eq.s32.totalorder %v528_v45, 1  ;;  %vm2428_vm8 = vcmp.eq.s32.totalorder %v532_v46, 1  ;;  %vm2432_vm9 = vcmp.eq.s32.totalorder %v558_v48, 1 }
  0x9d   : > { %v502_v3 = vadd.f32 %v500_v62, %v483_v0  ;;  %v503_v4 = vadd.f32 %v501_v63, %v484_v1  ;;  %v622_v58 = vrot.slane %v618_v51, %v2254_v20  ;;  %vm2437_vm10 = vcmp.eq.s32.totalorder %v562_v50, 1 }
  0x9e   : > { %v2366_v30 = vpop.permute.xlu0 %571  ;;  %v2368_v31 = vpop.permute.xlu1 %604  ;;  %vm3356_vm12 = vcmp.lt.s32.totalorder %v2410_v43, 15  ;;  %v626_v0 = vrot.slane %v618_v51, %v2256_v21  ;;  %vm2452_vm13 = vcmp.eq.s32.totalorder %v591_v18, 1  ;;  %vm2456_vm14 = vcmp.eq.s32.totalorder %v595_v52, 1 }
  0x9f   : > { %v2280_v6 = vadd.f32 %v508_v5, %v502_v3  ;;  %v2282_v7 = vadd.f32 %v508_v5, %v503_v4  ;;  %v660_v4 = vsel %vm3363_vm3, 1, %v3386_v2  ;;  %vm3357_vm15 = vcmp.lt.s32.totalorder %v2410_v43, 1 }
  0xa0   : > { %vm2468_vm2 = vcmp.eq.s32.totalorder %v622_v58, 1  ;;  %vm2488_vm0 = vcmp.eq.s32.totalorder %v626_v0, 1  ;;  %v724_v46 = vsel %vm3361_vm11, 1, %v3386_v2 }
  0xa1   : > { %3395 = vst [vmem:[#allocation2_spill] sm:$0xff] %v2282_v7  ;;  %514 = vrot.lane.b32.xlu0 %v2282_v7, %s2098_s23  ;;  %512 = vrot.lane.b32.xlu1 %v2280_v6, %s2098_s23  ;;  %v732_v0 = vrot.slane %v724_v46, %v2256_v21 }
  0xa2   : > { %v2370_v32 = vpop.permute.xlu0 %635  ;;  %v2372_v33 = vpop.permute.xlu1 %646 }
  0xa5   : > { %549 = vrot.lane.b32.xlu0 %v2282_v7, %s2099_s24  ;;  %547 = vrot.lane.b32.xlu1 %v2280_v6, %s2099_s24 }
  0xa6   : > { %v2374_v34 = vpop.permute.xlu0 %677  ;;  %v2386_v37 = vpop.permute.xlu1 %710 }
  0xa9   : > { %578 = vrot.lane.b32.xlu0 %v2280_v6, %s2100_s25  ;;  %580 = vrot.lane.b32.xlu1 %v2282_v7, %s2100_s25 }
  0xaa   : > { %v2388_v38 = vpop.permute.xlu0 %741  ;;  %v2397_v39 = vpop.permute.xlu1 %773 }
  0xad   : > { %613 = vrot.lane.b32.xlu0 %v2282_v7, %s2101_s26  ;;  %611 = vrot.lane.b32.xlu1 %v2280_v6, %s2101_s26 }
  0xae   : > { %v2399_v40 = vpop.permute.xlu0 %783 }
  0xb1   : > { %655 = vrot.lane.b32.xlu0 %v2282_v7, %s3372_s27  ;;  %653 = vrot.lane.b32.xlu1 %v2280_v6, %s3372_s27 }
  0xb5   : > { %684 = vrot.lane.b32.xlu0 %v2280_v6, %s3370_s28  ;;  %686 = vrot.lane.b32.xlu1 %v2282_v7, %s3370_s28 }
  0xb9   : > { %717 = vrot.lane.b32.xlu0 %v2280_v6, %s3353_s29  ;;  %719 = vrot.lane.b32.xlu1 %v2282_v7, %s3353_s29  ;;  %s2108_s29 = smov 31  }
  0xbd   : > { %750 = vrot.lane.b32.xlu0 %v2282_v7, %s3351_s30  ;;  %748 = vrot.lane.b32.xlu1 %v2280_v6, %s3351_s30  ;;  %s3430_s30 = smov 112  }
  0xc1   : > { %912 = vperm.xlu0 %2036, %v1975_v8   ;;  %881 = vperm.xlu1 %2037, %v878_v9  }
  0xc5   : > { %963 = vperm.xlu0 %2036, %v1977_v10   ;;  %944 = vperm.xlu1 %2037, %v1976_v11  }
  0xc9   : > { %1001 = vperm.xlu0 %2036, %v1979_v12   ;;  %982 = vperm.xlu1 %2037, %v1978_v13  }
  0xcd   : > { %1031 = vperm.xlu0 %2036, %v1981_v14   ;;  %1020 = vperm.xlu1 %2037, %v1980_v15  }
  0xd1   : > { %1069 = vperm.xlu0 %2036, %v1983_v16   ;;  %1050 = vperm.xlu1 %2037, %v1982_v17  }
  0xd5   : > { %1107 = vperm.xlu0 %2036, %v1985_v19   ;;  %1088 = vperm.xlu1 %2037, %v1984_v24   ;;  %v3410_v19 = vmov 0  ;;  %v664_v24 = vrot.slane %v660_v4, %v2254_v20 }
  0xd6   : > { %v3411_v19 = vsel %vm2488_vm0, 4294967295, %v3410_v19 }
  0xd9   : > { %1171 = vperm.xlu0 %2036, %v1987_v25   ;;  %1140 = vperm.xlu1 %2037, %v1986_v26  }
  0xdd   : > { %1213 = vperm.xlu0 %2036, %v1210_v27   ;;  %1203 = vperm.xlu1 %2037, %v1988_v28   ;;  %v668_v27 = vrot.slane %v660_v4, %v2256_v21  ;;  %v693_v28 = vsel %vm692_vm4, 1, %v3386_v2  ;;  %vm2517_vm4 = vcmp.eq.s32.totalorder %v664_v24, 1 }
  0xde   : > { %v697_v51 = vrot.slane %v693_v28, %v2254_v20  ;;  %v701_v18 = vrot.slane %v693_v28, %v2256_v21 }
  0xe0   : > { %vm2538_vm1 = vcmp.eq.s32.totalorder %v697_v51, 1 }
 0x113   : > { %v515_v44 = vpop.permute.xlu0 %514  ;;  %v513_v47 = vpop.permute.xlu1 %512 }
 0x114   : > { %v519_v62 = vsel %vm3359_vm6, %v513_v47, %v515_v44  ;;  %v520_v63 = vsel %vm3359_vm6, %v515_v44, %v513_v47  ;;  %vm3364_vm6 = vcmp.lt.s32.totalorder %v2410_v43, 113 }
 0x115   : > { %v535_v12 = vsel %vm2424_vm7, %v520_v63, 0.0  ;;  %v536_v13 = vsel %vm2428_vm8, %v519_v62, 0.0  ;;  %v728_v63 = vrot.slane %v724_v46, %v2254_v20 }
 0x116   : > { %v543_v41 = vmul.f32 %v2364_v29, %v535_v12  ;;  %v544_v42 = vmul.f32 %v2364_v29, %v536_v13 }
 0x117   : > { %v550_v55 = vpop.permute.xlu0 %549  ;;  %v548_v57 = vpop.permute.xlu1 %547 }
 0x118   : > { %v552_v60 = vsel %vm3358_vm5, %v548_v57, %v550_v55  ;;  %v553_v61 = vsel %vm3358_vm5, %v550_v55, %v548_v57  ;;  %vm755_vm5 = vmand %vm3361_vm11, %vm3363_vm3  ;;  %vm2542_vm11 = vcmp.eq.s32.totalorder %v701_v18, 1  ;;  %vm2562_vm3 = vcmp.eq.s32.totalorder %v732_v0, 1 }
 0x119   : > { %v565_v5 = vsel %vm2432_vm9, %v553_v61, 0.0  ;;  %v566_v8 = vsel %vm2437_vm10, %v552_v60, 0.0  ;;  %v3412_v60 = vmov 0  ;;  %v3414_v61 = vmov 0 }
 0x11a   : > { %v574_v25 = vmul.f32 %v2366_v30, %v565_v5  ;;  %v575_v26 = vmul.f32 %v2366_v30, %v566_v8  ;;  %v3413_v60 = vsel %vm2517_vm4, 4294967295, %v3412_v60 }
 0x11b   : > { %v579_v9 = vpop.permute.xlu0 %578  ;;  %v581_v10 = vpop.permute.xlu1 %580 }
 0x11c   : > { %v583_v14 = vsel %vm3356_vm12, %v579_v9, %v581_v10  ;;  %v584_v15 = vsel %vm3356_vm12, %v581_v10, %v579_v9  ;;  %vm3362_vm12 = vcmp.lt.s32.totalorder %v2410_v43, 127  ;;  %v576_v52 = vadd.f32 %v574_v25, %v543_v41 }
 0x11d   : > { %v598_v16 = vsel %vm2452_vm13, %v584_v15, 0.0  ;;  %v599_v17 = vsel %vm2456_vm14, %v583_v14, 0.0  ;;  %v577_v55 = vadd.f32 %v575_v26, %v544_v42  ;;  %v649_v9 = vmul.f32 %v2372_v33, %v2280_v6 }
 0x11e   : > { %v607_v47 = vmul.f32 %v2368_v31, %v598_v16  ;;  %v608_v30 = vmul.f32 %v2368_v31, %v599_v17  ;;  %v3416_v10 = vmov 0  ;;  %v3418_v14 = vmov 0 }
 0x11f   : > { %v614_v44 = vpop.permute.xlu0 %613  ;;  %v612_v45 = vpop.permute.xlu1 %611  ;;  %v3417_v10 = vsel %vm2538_vm1, 4294967295, %v3416_v10  ;;  %v3419_v14 = vsel %vm2542_vm11, 4294967295, %v3418_v14  ;;  %v756_v15 = vsel %vm755_vm5, 1, %v3386_v2  ;;  %v650_v16 = vmul.f32 %v2372_v33, %v2282_v7 }
 0x120   : > { %v616_v48 = vsel %vm3357_vm15, %v612_v45, %v614_v44  ;;  %v617_v49 = vsel %vm3357_vm15, %v614_v44, %v612_v45  ;;  %vm2521_vm15 = vcmp.eq.s32.totalorder %v668_v27, 1  ;;  %v610_v4 = vadd.f32 %v608_v30, %v577_v55 }
 0x121   : > { %v629_v29 = vsel %vm2468_vm2, %v617_v49, 0.0  ;;  %v630_v50 = vsel %vm2488_vm0, %v616_v48, 0.0  ;;  %v3415_v61 = vsel %vm2521_vm15, 4294967295, %v3414_v61  ;;  %vm2558_vm5 = vcmp.eq.s32.totalorder %v728_v63, 1 }
 0x122   : > { %v638_v31 = vmul.f32 %v2370_v32, %v629_v29  ;;  %v639_v57 = vmul.f32 %v2370_v32, %v630_v50  ;;  %v609_v32 = vadd.f32 %v607_v47, %v576_v52  ;;  %v3420_v41 = vmov 0 }
 0x123   : > { %v656_v58 = vpop.permute.xlu0 %655  ;;  %v654_v62 = vpop.permute.xlu1 %653  ;;  %v3421_v41 = vsel %vm2558_vm5, 4294967295, %v3420_v41  ;;  %v3422_v33 = vmov 0  ;;  %v760_v45 = vrot.slane %v756_v15, %v2254_v20  ;;  %v764_v46 = vrot.slane %v756_v15, %v2256_v21 }
 0x124   : > { %v658_v5 = vsel %vm3362_vm12, %v654_v62, %v656_v58  ;;  %v659_v8 = vsel %vm3362_vm12, %v656_v58, %v654_v62  ;;  %v640_v12 = vadd.f32 %v638_v31, %v609_v32  ;;  %v641_v13 = vadd.f32 %v639_v57, %v610_v4 }
 0x125   : > { %v671_v17 = vsel %vm2517_vm4, %v658_v5, 0.0  ;;  %v672_v24 = vsel %vm2521_vm15, %v659_v8, 0.0  ;;  %vm3367_vm12 = vcmp.lt.s32.totalorder %v2410_v43, 112  ;;  %v3423_v33 = vsel %vm2562_vm3, 4294967295, %v3422_v33 }
 0x126   : > { %v652_v47 = vadd.f32 %v650_v16, %v641_v13  ;;  %v651_v30 = vadd.f32 %v649_v9, %v640_v12  ;;  %v680_v48 = vmul.f32 %v2374_v34, %v671_v17  ;;  %v681_v49 = vmul.f32 %v2374_v34, %v672_v24 }
 0x127   : > { %v685_v25 = vpop.permute.xlu0 %684  ;;  %v687_v26 = vpop.permute.xlu1 %686  ;;  %v3424_v57 = vmov 0  ;;  %v3426_v58 = vmov 0 }
 0x128   : > { %v689_v27 = vsel %vm3364_vm6, %v685_v25, %v687_v26  ;;  %v690_v28 = vsel %vm3364_vm6, %v687_v26, %v685_v25  ;;  %vm2589_vm6 = vcmp.eq.s32.totalorder %v764_v46, 1  ;;  %v683_v62 = vadd.f32 %v681_v49, %v652_v47 }
 0x129   : > { %v704_v42 = vsel %vm2538_vm1, %v689_v27, 0.0  ;;  %v705_v44 = vsel %vm2542_vm11, %v690_v28, 0.0  ;;  %vm2585_vm11 = vcmp.eq.s32.totalorder %v760_v45, 1  ;;  %v3427_v58 = vsel %vm2589_vm6, 4294967295, %v3426_v58 }
 0x12a   : > { %v713_v51 = vmul.f32 %v2386_v37, %v704_v42  ;;  %v714_v18 = vmul.f32 %v2386_v37, %v705_v44  ;;  %v3425_v57 = vsel %vm2585_vm11, 4294967295, %v3424_v57  ;;  %v682_v37 = vadd.f32 %v680_v48, %v651_v30 }
 0x12b   : > { %v718_v29 = vpop.permute.xlu0 %717  ;;  %v720_v50 = vpop.permute.xlu1 %719 }
 0x12c   : > { %v722_v52 = vsel %vm3367_vm12, %v718_v29, %v720_v50  ;;  %v723_v55 = vsel %vm3367_vm12, %v720_v50, %v718_v29  ;;  %v715_v5 = vadd.f32 %v713_v51, %v682_v37  ;;  %v716_v8 = vadd.f32 %v714_v18, %v683_v62 }
 0x12d   : > { %v735_v31 = vsel %vm2558_vm5, %v722_v52, 0.0  ;;  %v736_v34 = vsel %vm2562_vm3, %v723_v55, 0.0  ;;  %vm3428_vm12 = vcmp.lt.s32.totalorder %v2410_v43, 111 }
 0x12e   : > { %v744_v63 = vmul.f32 %v2388_v38, %v735_v31  ;;  %v745_v0 = vmul.f32 %v2388_v38, %v736_v34  ;;  %vm3429_vm3 = vmmov %vm3428_vm12 }
 0x12f   : > { %v751_v32 = vpop.permute.xlu0 %750  ;;  %v749_v4 = vpop.permute.xlu1 %748 }
 0x130   : > { %v753_v9 = vsel %vm3428_vm12, %v749_v4, %v751_v32  ;;  %v754_v12 = vsel %vm3429_vm3, %v751_v32, %v749_v4  ;;  %v746_v16 = vadd.f32 %v744_v63, %v715_v5  ;;  %v747_v17 = vadd.f32 %v745_v0, %v716_v8 }
 0x131   : > { %v767_v13 = vsel %vm2585_vm11, %v753_v9, 0.0  ;;  %v768_v15 = vsel %vm2589_vm6, %v754_v12, 0.0  ;;  %vm3434_vm11 = vcmp.lt.s32.totalorder %v2384_v36, 15 }
 0x132   : > { %v776_v38 = vmul.f32 %v2397_v39, %v767_v13  ;;  %v777_v24 = vmul.f32 %v2397_v39, %v768_v15 }
 0x134   : > { %v778_v25 = vadd.f32 %v776_v38, %v746_v16  ;;  %v779_v26 = vadd.f32 %v777_v24, %v747_v17 }
 0x136   : > { %v786_v27 = vadd.f32 %v2399_v40, %v778_v25  ;;  %v787_v28 = vadd.f32 %v2399_v40, %v779_v26 }
 0x138   : > { %v790_v42 = vmul.f32 0.70710677, %v786_v27  ;;  %v791_v44 = vmul.f32 0.70710677, %v787_v28 }
 0x13a   : > { %v792_v45 = vand.u32 2147483647, %v790_v42  ;;  %v793_v46 = vand.u32 2147483647, %v791_v44  ;;  %vm832_vm3 = vcmp.lt.f32.partialorder %v790_v42, 0.0  ;;  %vm833_vm12 = vcmp.lt.f32.partialorder %v791_v44, 0.0 }
 0x13c   : > { %v794_v47 = vmul.f32 0.3275911, %v792_v45  ;;  %v795_v30 = vmul.f32 0.3275911, %v793_v46  ;;  %v820_v29 = vsub.f32 0.0, %v792_v45  ;;  %v821_v50 = vsub.f32 0.0, %v793_v46 }
 0x13e   : > { %v796_v48 = vadd.f32 1.0, %v794_v47  ;;  %v797_v49 = vadd.f32 1.0, %v795_v30  ;;  %v822_v39 = vmul.f32 %v820_v29, %v792_v45  ;;  %v823_v55 = vmul.f32 %v821_v50, %v793_v46 }
 0x13f   : > { %v788_v50 = vmul.f32 0.5, %v786_v27 }
 0x140   : > { %2038 = vrcp.f32 %v796_v48  ;;  %v824_v37 = vmul.f32 1.442695, %v822_v39  ;;  %v826_v63 = vmul.f32 1.442695, %v823_v55  ;;  %v789_v55 = vmul.f32 0.5, %v787_v28 }
 0x141   : > { %2040 = vrcp.f32 %v797_v49 }
 0x142   : > { %2042 = vpow2.f32 %v824_v37 }
 0x143   : > { %2044 = vpow2.f32 %v826_v63 }
 0x14a   : > { %v2039_v51 = vpop.eup %2038 }
 0x14b   : > { %v2041_v18 = vpop.eup %2040  ;;  %v802_v52 = vmul.f32 1.0614054, %v2039_v51 }
 0x14c   : > { %v803_v31 = vmul.f32 1.0614054, %v2041_v18  ;;  %v2043_v24 = vpop.eup %2042 }
 0x14d   : > { %v804_v34 = vadd.f32 -1.4531521, %v802_v52  ;;  %v2045_v26 = vpop.eup %2044 }
 0x14e   : > { %v805_v40 = vadd.f32 -1.4531521, %v803_v31 }
 0x14f   : > { %v806_v62 = vmul.f32 %v2039_v51, %v804_v34 }
 0x150   : > { %v807_v0 = vmul.f32 %v2041_v18, %v805_v40 }
 0x151   : > { %v808_v32 = vadd.f32 1.4214138, %v806_v62 }
 0x152   : > { %v809_v4 = vadd.f32 1.4214138, %v807_v0 }
 0x153   : > { %v810_v5 = vmul.f32 %v2039_v51, %v808_v32 }
 0x154   : > { %v811_v8 = vmul.f32 %v2041_v18, %v809_v4 }
 0x155   : > { %v812_v9 = vadd.f32 -0.28449672, %v810_v5 }
 0x156   : > { %v813_v12 = vadd.f32 -0.28449672, %v811_v8 }
 0x157   : > { %v814_v13 = vmul.f32 %v2039_v51, %v812_v9 }
 0x158   : > { %v815_v15 = vmul.f32 %v2041_v18, %v813_v12 }
 0x159   : > { %v816_v16 = vadd.f32 0.2548296, %v814_v13 }
 0x15a   : > { %v817_v17 = vadd.f32 0.2548296, %v815_v15 }
 0x15b   : > { %v818_v38 = vmul.f32 %v2039_v51, %v816_v16 }
 0x15c   : > { %v819_v25 = vmul.f32 %v2041_v18, %v817_v17 }
 0x15d   : > { %v828_v45 = vmul.f32 %v2043_v24, %v818_v38 }
 0x15e   : > { %v829_v46 = vmul.f32 %v2045_v26, %v819_v25 }
 0x15f   : > { %v830_v47 = vsub.f32 1.0, %v828_v45 }
 0x160   : > { %v831_v30 = vsub.f32 1.0, %v829_v46 }
 0x161   : > { %v834_v48 = vsub.f32 0.0, %v830_v47 }
 0x162   : > { %v835_v49 = vsub.f32 0.0, %v831_v30 }
 0x163   : > { %v836_v29 = vsel %vm832_vm3, %v834_v48, %v830_v47 }
 0x164   : > { %v837_v39 = vsel %vm833_vm12, %v835_v49, %v831_v30  ;;  %v838_v52 = vadd.f32 1.0, %v836_v29 }
 0x165   : > { %v839_v31 = vadd.f32 1.0, %v837_v39 }
 0x166   : > { %v840_v34 = vmul.f32 %v838_v52, %v788_v50 }
 0x167   : > { %v841_v40 = vmul.f32 %v839_v31, %v789_v55 }
 0x168   : > { %v844_v51 = vrot.slane %v840_v34, 6  ;;  %v2608_v18 = vadd.f32 %v840_v34, %v2259_v22 }
 0x169   : > { %v845_v37 = vrot.slane %v841_v40, 6  ;;  %v2611_v62 = vadd.f32 %v841_v40, %v2262_v23 }
 0x16a   : > { %v848_v42 = vadd.f32 %v844_v51, %v2280_v6  ;;  %v2615_v44 = vmul.f32 0.70710677, %v2608_v18 }
 0x16b   : > { %v849_v27 = vadd.f32 %v845_v37, %v2282_v7  ;;  %v2619_v28 = vmul.f32 0.70710677, %v2611_v62 }
 0x16c   : > { %v2621_v63 = vrot.slane %v848_v42, 2  ;;  %v1708_v0 = vand.u32 2147483647, %v2615_v44  ;;  %vm1748_vm3 = vcmp.lt.f32.partialorder %v2615_v44, 0.0  ;;  %v1705_v44 = vmul.f32 0.5, %v2611_v62 }
 0x16d   : > { %v2624_v22 = vrot.slane %v849_v27, 2  ;;  %v1709_v32 = vand.u32 2147483647, %v2619_v28  ;;  %vm1749_vm12 = vcmp.lt.f32.partialorder %v2619_v28, 0.0  ;;  %v1308_v62 = vld [vmem:[%s3345_s7] sm:$0x3] }
 0x16e   : > { %v1710_v23 = vmul.f32 0.3275911, %v1708_v0  ;;  %856 = vrot.lane.b32.xlu1 %v2621_v63, %s2106_s19  ;;  %v1736_v9 = vsub.f32 0.0, %v1708_v0 }
 0x16f   : > { %v1711_v4 = vmul.f32 0.3275911, %v1709_v32  ;;  %858 = vrot.lane.b32.xlu0 %v2624_v22, %s2106_s19  ;;  %v1737_v12 = vsub.f32 0.0, %v1709_v32  ;;  %s2111_s19 = smov 95  }
 0x170   : > { %v1712_v5 = vadd.f32 1.0, %v1710_v23  ;;  %v1738_v15 = vmul.f32 %v1736_v9, %v1708_v0 }
 0x171   : > { %v1713_v8 = vadd.f32 1.0, %v1711_v4  ;;  %v1739_v38 = vmul.f32 %v1737_v12, %v1709_v32  ;;  %v1704_v12 = vmul.f32 0.5, %v2608_v18 }
 0x172   : > { %2046 = vrcp.f32 %v1712_v5  ;;  %888 = vrot.lane.b32.xlu1 %v2621_v63, %s2107_s21  ;;  %v1740_v45 = vmul.f32 1.442695, %v1738_v15 }
 0x173   : > { %2048 = vrcp.f32 %v1713_v8  ;;  %890 = vrot.lane.b32.xlu0 %v2624_v22, %s2107_s21  ;;  %v1742_v47 = vmul.f32 1.442695, %v1739_v38  ;;  %v1990_v38 = vld [vmem:[%s3345_s7 + $0x4] sm:$0x3] }
 0x174   : > { %2050 = vpow2.f32 %v1740_v45  ;;  %v1994_v45 = vld [vmem:[%s3345_s7 + $0xc] sm:$0x3] }
 0x175   : > { %2052 = vpow2.f32 %v1742_v47  ;;  %v2708_v47 = vpop.permute.xlu1 %881 }
 0x176   : > { %921 = vrot.lane.b32.xlu1 %v2624_v22, %s2108_s29 }
 0x177   : > { %919 = vrot.lane.b32.xlu0 %v2621_v63, %s2108_s29 }
 0x17a   : > { %951 = vrot.lane.b32.xlu1 %v2621_v63, %s2098_s23 }
 0x17b   : > { %953 = vrot.lane.b32.xlu0 %v2624_v22, %s2098_s23 }
 0x17c   : > { %v2047_v13 = vpop.eup %2046 }
 0x17d   : > { %v2049_v16 = vpop.eup %2048  ;;  %v1718_v17 = vmul.f32 1.0614054, %v2047_v13 }
 0x17e   : > { %v1719_v24 = vmul.f32 1.0614054, %v2049_v16  ;;  %972 = vrot.lane.b32.xlu1 %v2624_v22, %s2099_s24  ;;  %v2051_v37 = vpop.eup %2050 }
 0x17f   : > { %v1720_v25 = vadd.f32 -1.4531521, %v1718_v17  ;;  %970 = vrot.lane.b32.xlu0 %v2621_v63, %s2099_s24  ;;  %v2053_v27 = vpop.eup %2052  ;;  %v1989_v17 = vld [vmem:[%s3345_s7 + $0x2] sm:$0x3] }
 0x180   : > { %v1721_v26 = vadd.f32 -1.4531521, %v1719_v24  ;;  %v1991_v24 = vld [vmem:[%s3345_s7 + $0x6] sm:$0x3] }
 0x181   : > { %v1722_v46 = vmul.f32 %v2047_v13, %v1720_v25  ;;  %v1992_v25 = vld [vmem:[%s3345_s7 + $0x8] sm:$0x3] }
 0x182   : > { %v1723_v30 = vmul.f32 %v2049_v16, %v1721_v26  ;;  %989 = vrot.lane.b32.xlu1 %v2621_v63, %s2100_s25  ;;  %v1993_v26 = vld [vmem:[%s3345_s7 + $0xa] sm:$0x3] }
 0x183   : > { %v1724_v48 = vadd.f32 1.4214138, %v1722_v46  ;;  %991 = vrot.lane.b32.xlu0 %v2624_v22, %s2100_s25  ;;  %v1995_v46 = vld [vmem:[%s3345_s7 + $0xe] sm:$0x3] }
 0x184   : > { %v1725_v49 = vadd.f32 1.4214138, %v1723_v30  ;;  %v2710_v30 = vpop.permute.xlu0 %912 }
 0x185   : > { %v1726_v29 = vmul.f32 %v2047_v13, %v1724_v48  ;;  %v1996_v48 = vld [vmem:[%s3345_s7 + $0x10] sm:$0x3] }
 0x186   : > { %v1727_v50 = vmul.f32 %v2049_v16, %v1725_v49  ;;  %1010 = vrot.lane.b32.xlu1 %v2624_v22, %s2101_s26  ;;  %v1997_v49 = vld [vmem:[%s3345_s7 + $0x12] sm:$0x3] }
 0x187   : > { %v1728_v39 = vadd.f32 -0.28449672, %v1726_v29  ;;  %1008 = vrot.lane.b32.xlu0 %v2621_v63, %s2101_s26  ;;  %v1998_v29 = vld [vmem:[%s3345_s7 + $0x14] sm:$0x3] }
 0x188   : > { %v1729_v52 = vadd.f32 -0.28449672, %v1727_v50  ;;  %v2721_v50 = vpop.permute.xlu1 %944 }
 0x189   : > { %v1730_v55 = vmul.f32 %v2047_v13, %v1728_v39  ;;  %v1999_v39 = vld [vmem:[%s3345_s7 + $0x16] sm:$0x3] }
 0x18a   : > { %v1731_v31 = vmul.f32 %v2049_v16, %v1729_v52  ;;  %1040 = vrot.lane.b32.xlu1 %v2624_v22, %s3372_s27  ;;  %v2726_v52 = vpop.permute.xlu0 %963 }
 0x18b   : > { %v1732_v34 = vadd.f32 0.2548296, %v1730_v55  ;;  %1038 = vrot.lane.b32.xlu0 %v2621_v63, %s3372_s27  ;;  %v2000_v55 = vld [vmem:[%s3345_s7 + $0x18] sm:$0x3] }
 0x18c   : > { %v1733_v40 = vadd.f32 0.2548296, %v1731_v31  ;;  %v2001_v31 = vld [vmem:[%s3345_s7 + $0x1a] sm:$0x3] }
 0x18d   : > { %v1734_v51 = vmul.f32 %v2047_v13, %v1732_v34  ;;  %v2734_v34 = vpop.permute.xlu1 %982 }
 0x18e   : > { %v1735_v42 = vmul.f32 %v2049_v16, %v1733_v40  ;;  %1057 = vrot.lane.b32.xlu1 %v2621_v63, %s3370_s28  ;;  %v2736_v40 = vpop.permute.xlu0 %1001 }
 0x18f   : > { %v1744_v0 = vmul.f32 %v2051_v37, %v1734_v51  ;;  %1059 = vrot.lane.b32.xlu0 %v2624_v22, %s3370_s28  ;;  %v2002_v51 = vld [vmem:[%s3345_s7 + $0x1c] sm:$0x3]  ;;  %v1640_v37 = vld [vmem:[%s3346_s8] sm:$0x3] }
 0x190   : > { %v1745_v32 = vmul.f32 %v2053_v27, %v1735_v42 }
 0x191   : > { %v1746_v23 = vsub.f32 1.0, %v1744_v0  ;;  %v2744_v42 = vpop.permute.xlu1 %1020 }
 0x192   : > { %v1747_v4 = vsub.f32 1.0, %v1745_v32  ;;  %1078 = vrot.lane.b32.xlu1 %v2624_v22, %s3430_s30  ;;  %v2746_v27 = vpop.permute.xlu0 %1031 }
 0x193   : > { %v1750_v5 = vsub.f32 0.0, %v1746_v23  ;;  %1076 = vrot.lane.b32.xlu0 %v2621_v63, %s3430_s30 }
 0x194   : > { %v1751_v8 = vsub.f32 0.0, %v1747_v4 }
 0x195   : > { %v1752_v9 = vsel %vm1748_vm3, %v1750_v5, %v1746_v23  ;;  %v2748_v0 = vpop.permute.xlu1 %1050  ;;  %vm863_vm3 = vcmp.ge.s32.totalorder %v2379_v35, 2 }
 0x196   : > { %v1753_v13 = vsel %vm1749_vm12, %v1751_v8, %v1747_v4  ;;  %v1754_v15 = vadd.f32 1.0, %v1752_v9  ;;  %1095 = vrot.lane.b32.xlu1 %v2621_v63, %s3431_s12  ;;  %v2750_v32 = vpop.permute.xlu0 %1069  ;;  %vm3433_vm12 = vcmp.ge.s32.totalorder %v2384_v36, 1  ;;  %vm926_vm5 = vmand %vm863_vm3, %vm3434_vm11  ;;  %vm860_vm11 = vcmp.lt.s32.totalorder %v2410_v43, 33 }
 0x197   : > { %v1755_v16 = vadd.f32 1.0, %v1753_v13  ;;  %1097 = vrot.lane.b32.xlu0 %v2624_v22, %s3431_s12  ;;  %vm864_vm6 = vmand %vm863_vm3, %vm3433_vm12  ;;  %vm892_vm12 = vcmp.lt.s32.totalorder %v2410_v43, 32 }
 0x198   : > { %v1756_v18 = vmul.f32 %v1754_v15, %v1704_v12 }
 0x199   : > { %v1757_v28 = vmul.f32 %v1755_v16, %v1705_v44  ;;  %v2752_v23 = vpop.permute.xlu1 %1088 }
 0x19a   : > { %1758 = vst [vmem:[%s2671_s16] sm:$0x3] %v1756_v18  ;;  %1116 = vrot.lane.b32.xlu1 %v2624_v22, %s2109_s20  ;;  %v2754_v4 = vpop.permute.xlu0 %1107  ;;  %v895_v18 = vsel %vm863_vm3, 1, %v3386_v2 }
 0x19b   : > { %1759 = vst [vmem:[%s2671_s16 + $0x8] sm:$0x3] %v1757_v28  ;;  %1114 = vrot.lane.b32.xlu0 %v2621_v63, %s2109_s20 }
 0x19d   : > { %v2756_v5 = vpop.permute.xlu1 %1140 }
 0x19e   : > { %1149 = vrot.lane.b32.xlu1 %v2624_v22, %s2110_s18  ;;  %v2758_v8 = vpop.permute.xlu0 %1171 }
 0x19f   : > { %1147 = vrot.lane.b32.xlu0 %v2621_v63, %s2110_s18 }
 0x1a1   : > { %v2760_v9 = vpop.permute.xlu1 %1203 }
 0x1a2   : > { %1178 = vrot.lane.b32.xlu1 %v2621_v63, %s2111_s19  ;;  %v2762_v12 = vpop.permute.xlu0 %1213 }
 0x1a3   : > { %1180 = vrot.lane.b32.xlu0 %v2624_v22, %s2111_s19 }
 0x1a6   : > { %1311 = vperm.xlu1 %2037, %v1308_v62   ;;  %v865_v62 = vsel %vm864_vm6, 1, %v3386_v2  ;;  %vm923_vm6 = vcmp.lt.s32.totalorder %v2410_v43, 31 }
 0x1a7   : > { %1330 = vperm.xlu0 %2036, %v1989_v17  }
 0x1aa   : > { %1349 = vperm.xlu1 %2037, %v1990_v38   ;;  %v927_v38 = vsel %vm926_vm5, 1, %v3386_v2 }
 0x1ab   : > { %1368 = vperm.xlu0 %2036, %v1991_v24   ;;  %v899_v24 = vrot.slane %v895_v18, %v2254_v20 }
 0x1ad   : > { %vm2781_vm5 = vcmp.eq.s32.totalorder %v899_v24, 1 }
 0x1ae   : > { %1401 = vperm.xlu1 %2037, %v1992_v25   ;;  %v903_v25 = vrot.slane %v895_v18, %v2256_v21 }
 0x1af   : > { %1432 = vperm.xlu0 %2036, %v1993_v26   ;;  %v869_v26 = vrot.slane %v865_v62, %v2254_v20 }
 0x1b0   : > { %vm2785_vm3 = vcmp.eq.s32.totalorder %v903_v25, 1 }
 0x1b1   : > { %vm2789_vm1 = vcmp.eq.s32.totalorder %v869_v26, 1 }
 0x1b2   : > { %1451 = vperm.xlu1 %2037, %v1994_v45   ;;  %v873_v45 = vrot.slane %v865_v62, %v2256_v21 }
 0x1b3   : > { %1462 = vperm.xlu0 %2036, %v1995_v46  }
 0x1b4   : > { %vm2793_vm15 = vcmp.eq.s32.totalorder %v873_v45, 1 }
 0x1b6   : > { %1481 = vperm.xlu1 %2037, %v1996_v48   ;;  %v931_v48 = vrot.slane %v927_v38, %v2254_v20 }
 0x1b7   : > { %1512 = vperm.xlu0 %2036, %v1997_v49   ;;  %v935_v49 = vrot.slane %v927_v38, %v2256_v21 }
 0x1b8   : > { %vm2797_vm4 = vcmp.eq.s32.totalorder %v931_v48, 1 }
 0x1b9   : > { %vm2801_vm0 = vcmp.eq.s32.totalorder %v935_v49, 1 }
 0x1ba   : > { %1544 = vperm.xlu1 %2037, %v1998_v29  }
 0x1bb   : > { %1563 = vperm.xlu0 %2036, %v1999_v39  }
 0x1be   : > { %1582 = vperm.xlu1 %2037, %v2000_v55  }
 0x1bf   : > { %1601 = vperm.xlu0 %2036, %v2001_v31  }
 0x1c2   : > { %1633 = vperm.xlu1 %2037, %v2002_v51  }
 0x1c3   : > { %1643 = vperm.xlu0 %2036, %v1640_v37  }
 0x1e0   : > { %v857_v13 = vpop.permute.xlu1 %856 }
 0x1e1   : > { %v859_v15 = vpop.permute.xlu0 %858 }
 0x1e2   : > { %v861_v62 = vsel %vm860_vm11, %v857_v13, %v859_v15  ;;  %v862_v38 = vsel %vm860_vm11, %v859_v15, %v857_v13 }
 0x1e3   : > { %v876_v13 = vsel %vm2789_vm1, %v862_v38, 0.0  ;;  %v877_v15 = vsel %vm2793_vm15, %v861_v62, 0.0  ;;  %vm3449_vm1 = vcmp.lt.s32.totalorder %v2410_v43, 16 }
 0x1e4   : > { %v889_v44 = vpop.permute.xlu1 %888  ;;  %vm3450_vm15 = vmmov %vm3449_vm1  ;;  %v885_v2 = vmul.f32 %v2708_v47, %v877_v15 }
 0x1e5   : > { %v891_v16 = vpop.permute.xlu0 %890 }
 0x1e6   : > { %v893_v31 = vsel %vm892_vm12, %v889_v44, %v891_v16  ;;  %v894_v51 = vsel %vm892_vm12, %v891_v16, %v889_v44  ;;  %vm3447_vm12 = vcmp.lt.s32.totalorder %v2410_v43, 17 }
 0x1e7   : > { %v906_v45 = vsel %vm2781_vm5, %v894_v51, 0.0  ;;  %v907_v7 = vsel %vm2785_vm3, %v893_v31, 0.0  ;;  %vm3448_vm11 = vmmov %vm3447_vm12  ;;  %vm3453_vm5 = vcmp.lt.s32.totalorder %v2410_v43, 1 }
 0x1e8   : > { %v922_v28 = vpop.permute.xlu1 %921  ;;  %v915_v55 = vmul.f32 %v2710_v30, %v906_v45  ;;  %v916_v31 = vmul.f32 %v2710_v30, %v907_v7  ;;  %vm3454_vm3 = vmmov %vm3453_vm5 }
 0x1e9   : > { %v920_v17 = vpop.permute.xlu0 %919 }
 0x1ea   : > { %v924_v44 = vsel %vm923_vm6, %v920_v17, %v922_v28  ;;  %v925_v16 = vsel %vm923_vm6, %v922_v28, %v920_v17  ;;  %vm1121_vm6 = vcmp.lt.s32.totalorder %v2379_v35, 14 }
 0x1eb   : > { %v938_v28 = vsel %vm2797_vm4, %v925_v16, 0.0  ;;  %v939_v17 = vsel %vm2801_vm0, %v924_v44, 0.0  ;;  %vm3451_vm0 = vcmp.lt.s32.totalorder %v2410_v43, 15 }
 0x1ec   : > { %v952_v46 = vpop.permute.xlu1 %951  ;;  %v947_v38 = vmul.f32 %v2721_v50, %v938_v28  ;;  %v948_v7 = vmul.f32 %v2721_v50, %v939_v17  ;;  %vm3452_vm4 = vmmov %vm3451_vm0 }
 0x1ed   : > { %v954_v29 = vpop.permute.xlu0 %953 }
 0x1ee   : > { %v955_v48 = vsel %vm3447_vm12, %v952_v46, %v954_v29  ;;  %v956_v49 = vsel %vm3448_vm11, %v954_v29, %v952_v46  ;;  %v884_v46 = vmul.f32 %v2708_v47, %v876_v13  ;;  %vm3455_vm12 = vnez %v3411_v19 }
 0x1ef   : > { %v957_v29 = vsel %vm2424_vm7, %v956_v49, 0.0  ;;  %v958_v62 = vsel %vm2428_vm8, %v955_v48, 0.0  ;;  %vm3456_vm11 = vcmp.ge.s32.totalorder %v2384_v36, 1 }
 0x1f0   : > { %v973_v24 = vpop.permute.xlu1 %972  ;;  %v917_v16 = vadd.f32 %v915_v55, %v884_v46  ;;  %v966_v45 = vmul.f32 %v2726_v52, %v957_v29  ;;  %v967_v50 = vmul.f32 %v2726_v52, %v958_v62 }
 0x1f1   : > { %v971_v26 = vpop.permute.xlu0 %970 }
 0x1f2   : > { %v974_v51 = vsel %vm3449_vm1, %v971_v26, %v973_v24  ;;  %v975_v37 = vsel %vm3450_vm15, %v973_v24, %v971_v26  ;;  %v918_v26 = vadd.f32 %v916_v31, %v885_v2  ;;  %v949_v17 = vadd.f32 %v947_v38, %v917_v16  ;;  %vm1122_vm1 = vmand %vm1121_vm6, %vm3456_vm11 }
 0x1f3   : > { %v976_v25 = vsel %vm2432_vm9, %v975_v37, 0.0  ;;  %v977_v47 = vsel %vm2437_vm10, %v974_v51, 0.0  ;;  %v3457_v16 = vmov 0   ;;  %vm3458_vm15 = vcmp.lt.s32.totalorder %v2410_v43, 127 }
 0x1f4   : > { %v990_v39 = vpop.permute.xlu1 %989  ;;  %v985_v55 = vmul.f32 %v2734_v34, %v976_v25  ;;  %v986_v31 = vmul.f32 %v2734_v34, %v977_v47 }
 0x1f5   : > { %v992_v18 = vpop.permute.xlu0 %991 }
 0x1f6   : > { %v993_v30 = vsel %vm3451_vm0, %v990_v39, %v992_v18  ;;  %v994_v24 = vsel %vm3452_vm4, %v992_v18, %v990_v39  ;;  %v950_v39 = vadd.f32 %v948_v7, %v918_v26  ;;  %v968_v18 = vadd.f32 %v966_v45, %v949_v17  ;;  %vm3459_vm0 = vmmov %vm3458_vm15 }
 0x1f7   : > { %v995_v15 = vsel %vm2452_vm13, %v994_v24, 0.0  ;;  %v996_v48 = vsel %vm2456_vm14, %v993_v30, 0.0  ;;  %v1123_v26 = vsel %vm1122_vm1, 1, %v3457_v16  ;;  %vm3460_vm4 = vnez %v3413_v60 }
 0x1f8   : > { %v1011_v44 = vpop.permute.xlu1 %1010  ;;  %v969_v46 = vadd.f32 %v967_v50, %v950_v39  ;;  %v1004_v2 = vmul.f32 %v2736_v40, %v995_v15  ;;  %v1005_v29 = vmul.f32 %v2736_v40, %v996_v48  ;;  %v987_v34 = vadd.f32 %v985_v55, %v968_v18 }
 0x1f9   : > { %v1009_v13 = vpop.permute.xlu0 %1008  ;;  %v1034_v15 = vmul.f32 %v2746_v27, %v2621_v63  ;;  %vm3464_vm1 = vcmp.lt.s32.totalorder %v2410_v43, 112 }
 0x1fa   : > { %v1012_v49 = vsel %vm3453_vm5, %v1009_v13, %v1011_v44  ;;  %v1013_v28 = vsel %vm3454_vm3, %v1011_v44, %v1009_v13  ;;  %v988_v38 = vadd.f32 %v986_v31, %v969_v46  ;;  %v1006_v25 = vadd.f32 %v1004_v2, %v987_v34 }
 0x1fb   : > { %v1014_v52 = vsel %vm2468_vm2, %v1013_v28, 0.0  ;;  %v1015_v51 = vsel %vm3455_vm12, %v1012_v49, 0.0  ;;  %v1127_v49 = vrot.slane %v1123_v26, %v2254_v20  ;;  %v1131_v28 = vrot.slane %v1123_v26, %v2256_v21 }
 0x1fc   : > { %v1041_v37 = vpop.permute.xlu1 %1040  ;;  %v1023_v7 = vmul.f32 %v2744_v42, %v1014_v52  ;;  %v1024_v30 = vmul.f32 %v2744_v42, %v1015_v51  ;;  %v1007_v47 = vadd.f32 %v1005_v29, %v988_v38  ;;  %v1035_v42 = vmul.f32 %v2746_v27, %v2624_v22 }
 0x1fd   : > { %v1039_v62 = vpop.permute.xlu0 %1038  ;;  %vm3461_vm5 = vnez %v3415_v61  ;;  %vm3462_vm3 = vcmp.lt.s32.totalorder %v2410_v43, 113  ;;  %v1154_v22 = vsel %vm1121_vm6, 1, %v3457_v16  ;;  %vm3475_vm12 = vcmp.lt.s32.totalorder %v2410_v43, 111 }
 0x1fe   : > { %v1042_v40 = vsel %vm3458_vm15, %v1039_v62, %v1041_v37  ;;  %v1043_v45 = vsel %vm3459_vm0, %v1041_v37, %v1039_v62  ;;  %v1025_v50 = vadd.f32 %v1023_v7, %v1006_v25  ;;  %v1026_v13 = vadd.f32 %v1024_v30, %v1007_v47  ;;  %vm3463_vm11 = vmmov %vm3462_vm3 }
 0x1ff   : > { %v1044_v17 = vsel %vm3460_vm4, %v1042_v40, 0.0  ;;  %v1045_v39 = vsel %vm3461_vm5, %v1043_v45, 0.0  ;;  %vm3465_vm15 = vmmov %vm3464_vm1  ;;  %vm3466_vm0 = vnez %v3417_v10  ;;  %vm2909_vm4 = vcmp.eq.s32.totalorder %v1131_v28, 1 }
 0x200   : > { %v1058_v24 = vpop.permute.xlu1 %1057  ;;  %v1037_v27 = vadd.f32 %v1035_v42, %v1026_v13  ;;  %v1036_v52 = vadd.f32 %v1034_v15, %v1025_v50  ;;  %v1053_v18 = vmul.f32 %v2748_v0, %v1044_v17  ;;  %v1054_v46 = vmul.f32 %v2748_v0, %v1045_v39 }
 0x201   : > { %v1060_v44 = vpop.permute.xlu0 %1059  ;;  %v1162_v13 = vrot.slane %v1154_v22, %v2256_v21 }
 0x202   : > { %v1061_v55 = vsel %vm3462_vm3, %v1058_v24, %v1060_v44  ;;  %v1062_v63 = vsel %vm3463_vm11, %v1060_v44, %v1058_v24  ;;  %vm3467_vm3 = vnez %v3419_v14  ;;  %vm3468_vm11 = vcmp.lt.s32.totalorder %v2384_v36, 15 }
 0x203   : > { %v1063_v2 = vsel %vm3466_vm0, %v1061_v55, 0.0  ;;  %v1064_v29 = vsel %vm3467_vm3, %v1062_v63, 0.0  ;;  %vm1185_vm5 = vmand %vm1121_vm6, %vm3468_vm11  ;;  %vm3473_vm0 = vnez %v3421_v41  ;;  %vm3474_vm3 = vnez %v3423_v33 }
 0x204   : > { %v1079_v48 = vpop.permute.xlu1 %1078  ;;  %vm3476_vm6 = vmmov %vm3475_vm12  ;;  %v1072_v25 = vmul.f32 %v2750_v32, %v1063_v2  ;;  %v1073_v47 = vmul.f32 %v2750_v32, %v1064_v29  ;;  %v1158_v44 = vrot.slane %v1154_v22, %v2254_v20  ;;  %v1186_v26 = vsel %vm1185_vm5, 1, %v3457_v16 }
 0x205   : > { %v1077_v31 = vpop.permute.xlu0 %1076  ;;  %v1055_v40 = vadd.f32 %v1053_v18, %v1036_v52  ;;  %v1056_v45 = vadd.f32 %v1054_v46, %v1037_v27  ;;  %vm1151_vm11 = vcmp.lt.s32.totalorder %v2410_v43, 96  ;;  %v1190_v39 = vrot.slane %v1186_v26, %v2254_v20 }
 0x206   : > { %v1080_v51 = vsel %vm3464_vm1, %v1077_v31, %v1079_v48  ;;  %v1081_v37 = vsel %vm3465_vm15, %v1079_v48, %v1077_v31  ;;  %vm1118_vm1 = vcmp.lt.s32.totalorder %v2410_v43, 97  ;;  %vm2905_vm15 = vcmp.eq.s32.totalorder %v1127_v49, 1 }
 0x207   : > { %v1082_v7 = vsel %vm3473_vm0, %v1080_v51, 0.0  ;;  %v1083_v36 = vsel %vm3474_vm3, %v1081_v37, 0.0  ;;  %v1194_v55 = vrot.slane %v1186_v26, %v2256_v21  ;;  %v1074_v63 = vadd.f32 %v1072_v25, %v1055_v40 }
 0x208   : > { %v1096_v62 = vpop.permute.xlu1 %1095  ;;  %v1091_v15 = vmul.f32 %v2752_v23, %v1082_v7  ;;  %v1092_v42 = vmul.f32 %v2752_v23, %v1083_v36  ;;  %v1075_v31 = vadd.f32 %v1073_v47, %v1056_v45  ;;  %vm2945_vm5 = vcmp.eq.s32.totalorder %v1158_v44, 1 }
 0x209   : > { %v1098_v34 = vpop.permute.xlu0 %1097  ;;  %vm1379_vm3 = vcmp.lt.s32.totalorder %v2410_v43, 14 }
 0x20a   : > { %v1099_v30 = vsel %vm3475_vm12, %v1096_v62, %v1098_v34  ;;  %v1100_v24 = vsel %vm3476_vm6, %v1098_v34, %v1096_v62  ;;  %vm3477_vm12 = vnez %v3425_v57  ;;  %vm3478_vm6 = vnez %v3427_v58 }
 0x20b   : > { %v1101_v48 = vsel %vm3477_vm12, %v1099_v30, 0.0  ;;  %v1102_v32 = vsel %vm3478_vm6, %v1100_v24, 0.0  ;;  %v1093_v46 = vadd.f32 %v1091_v15, %v1074_v63  ;;  %v1094_v2 = vadd.f32 %v1092_v42, %v1075_v31 }
 0x20c   : > { %v1117_v50 = vpop.permute.xlu1 %1116  ;;  %v1110_v27 = vmul.f32 %v2754_v4, %v1101_v48  ;;  %v1111_v52 = vmul.f32 %v2754_v4, %v1102_v32  ;;  %vm1290_vm12 = vcmp.lt.s32.totalorder %v2410_v43, 18 }
 0x20d   : > { %v1115_v49 = vpop.permute.xlu0 %1114 }
 0x20e   : > { %v1119_v28 = vsel %vm1118_vm1, %v1115_v49, %v1117_v50  ;;  %v1120_v17 = vsel %vm1118_vm1, %v1117_v50, %v1115_v49  ;;  %vm2949_vm1 = vcmp.eq.s32.totalorder %v1162_v13, 1  ;;  %v1113_v24 = vadd.f32 %v1111_v52, %v1094_v2 }
 0x20f   : > { %v1134_v23 = vsel %vm2905_vm15, %v1119_v28, 0.0  ;;  %v1135_v22 = vsel %vm2909_vm4, %v1120_v17, 0.0  ;;  %vm2964_vm4 = vcmp.eq.s32.totalorder %v1190_v39, 1  ;;  %vm2968_vm15 = vcmp.eq.s32.totalorder %v1194_v55, 1 }
 0x210   : > { %v1150_v18 = vpop.permute.xlu1 %1149  ;;  %v1143_v62 = vmul.f32 %v2756_v5, %v1134_v23  ;;  %v1144_v34 = vmul.f32 %v2756_v5, %v1135_v22  ;;  %v1112_v5 = vadd.f32 %v1110_v27, %v1093_v46 }
 0x211   : > { %v1148_v29 = vpop.permute.xlu0 %1147 }
 0x212   : > { %v1152_v4 = vsel %vm1151_vm11, %v1148_v29, %v1150_v18  ;;  %v1153_v38 = vsel %vm1151_vm11, %v1150_v18, %v1148_v29  ;;  %v1145_v40 = vadd.f32 %v1143_v62, %v1112_v5  ;;  %v1146_v45 = vadd.f32 %v1144_v34, %v1113_v24 }
 0x213   : > { %v1165_v0 = vsel %vm2945_vm5, %v1152_v4, 0.0  ;;  %v1166_v7 = vsel %vm2949_vm1, %v1153_v38, 0.0  ;;  %vm3487_vm11 = vcmp.lt.s32.totalorder %v2410_v43, 95 }
 0x214   : > { %v1174_v25 = vmul.f32 %v2758_v8, %v1165_v0  ;;  %v1175_v47 = vmul.f32 %v2758_v8, %v1166_v7  ;;  %v1179_v44 = vpop.permute.xlu1 %1178  ;;  %vm3488_vm5 = vmmov %vm3487_vm11 }
 0x215   : > { %v1181_v26 = vpop.permute.xlu0 %1180 }
 0x216   : > { %v1183_v50 = vsel %vm3487_vm11, %v1179_v44, %v1181_v26  ;;  %v1184_v13 = vsel %vm3488_vm5, %v1181_v26, %v1179_v44  ;;  %v1176_v48 = vadd.f32 %v1174_v25, %v1145_v40  ;;  %v1177_v32 = vadd.f32 %v1175_v47, %v1146_v45 }
 0x217   : > { %v1197_v15 = vsel %vm2964_vm4, %v1183_v50, 0.0  ;;  %v1198_v42 = vsel %vm2968_vm15, %v1184_v13, 0.0 }
 0x218   : > { %v1206_v8 = vmul.f32 %v2760_v9, %v1197_v15  ;;  %v1207_v49 = vmul.f32 %v2760_v9, %v1198_v42 }
 0x21a   : > { %v1208_v28 = vadd.f32 %v1206_v8, %v1176_v48  ;;  %v1209_v17 = vadd.f32 %v1207_v49, %v1177_v32 }
 0x21c   : > { %v1216_v39 = vadd.f32 %v2762_v12, %v1208_v28  ;;  %v1217_v55 = vadd.f32 %v2762_v12, %v1209_v17 }
 0x21e   : > { %v1220_v63 = vmul.f32 0.70710677, %v1216_v39  ;;  %v1221_v31 = vmul.f32 0.70710677, %v1217_v55 }
 0x220   : > { %v1222_v23 = vand.u32 2147483647, %v1220_v63  ;;  %v1223_v22 = vand.u32 2147483647, %v1221_v31  ;;  %vm1262_vm1 = vcmp.lt.f32.partialorder %v1220_v63, 0.0  ;;  %vm1263_vm15 = vcmp.lt.f32.partialorder %v1221_v31, 0.0 }
 0x222   : > { %v1224_v27 = vmul.f32 0.3275911, %v1222_v23  ;;  %v1225_v52 = vmul.f32 0.3275911, %v1223_v22  ;;  %v1250_v18 = vsub.f32 0.0, %v1222_v23  ;;  %v1251_v46 = vsub.f32 0.0, %v1223_v22 }
 0x224   : > { %v1226_v51 = vadd.f32 1.0, %v1224_v27  ;;  %v1227_v37 = vadd.f32 1.0, %v1225_v52  ;;  %v1252_v9 = vmul.f32 %v1250_v18, %v1222_v23  ;;  %v1253_v34 = vmul.f32 %v1251_v46, %v1223_v22  ;;  %v2987_v52 = vld [vmem:[%s2252_s22] sm:$0x3f] }
 0x225   : > { %3489 = vst [vmem:[#allocation3_spill] sm:$0xff] %v2987_v52 }
 0x226   : > { %2054 = vrcp.f32 %v1226_v51  ;;  %v1254_v0 = vmul.f32 1.442695, %v1252_v9  ;;  %v1256_v36 = vmul.f32 1.442695, %v1253_v34  ;;  %v1762_v51 = vrot.slane %v2987_v52, 2 }
 0x227   : > { %2056 = vrcp.f32 %v1227_v37  ;;  %v1218_v37 = vmul.f32 0.5, %v1216_v39 }
 0x228   : > { %2058 = vpow2.f32 %v1254_v0 }
 0x229   : > { %2060 = vpow2.f32 %v1256_v36 }
 0x230   : > { %v2055_v2 = vpop.eup %2054 }
 0x231   : > { %v2057_v29 = vpop.eup %2056  ;;  %v1232_v62 = vmul.f32 1.0614054, %v2055_v2 }
 0x232   : > { %v1233_v4 = vmul.f32 1.0614054, %v2057_v29  ;;  %v2059_v42 = vpop.eup %2058 }
 0x233   : > { %v1234_v38 = vadd.f32 -1.4531521, %v1232_v62  ;;  %v2061_v32 = vpop.eup %2060 }
 0x234   : > { %v1235_v12 = vadd.f32 -1.4531521, %v1233_v4 }
 0x235   : > { %v1236_v7 = vmul.f32 %v2055_v2, %v1234_v38 }
 0x236   : > { %v1237_v30 = vmul.f32 %v2057_v29, %v1235_v12 }
 0x237   : > { %v1238_v5 = vadd.f32 1.4214138, %v1236_v7  ;;  %v3491_v7 = vld [vmem:[#allocation2_spill] sm:$0xff] }
 0x238   : > { %v1239_v24 = vadd.f32 1.4214138, %v1237_v30 }
 0x239   : > { %v1240_v25 = vmul.f32 %v2055_v2, %v1238_v5 }
 0x23a   : > { %v1241_v47 = vmul.f32 %v2057_v29, %v1239_v24 }
 0x23b   : > { %v1242_v44 = vadd.f32 -0.28449672, %v1240_v25 }
 0x23c   : > { %v1243_v26 = vadd.f32 -0.28449672, %v1241_v47 }
 0x23d   : > { %v1244_v40 = vmul.f32 %v2055_v2, %v1242_v44 }
 0x23e   : > { %v1245_v45 = vmul.f32 %v2057_v29, %v1243_v26 }
 0x23f   : > { %v1246_v50 = vadd.f32 0.2548296, %v1244_v40 }
 0x240   : > { %v1247_v13 = vadd.f32 0.2548296, %v1245_v45 }
 0x241   : > { %v1248_v15 = vmul.f32 %v2055_v2, %v1246_v50  ;;  %v2991_v2 = vld [vmem:[%s2252_s22 + $0x8] sm:$0x3f]  ;;  %s2112_s22 = smov 18  }
 0x242   : > { %v1249_v48 = vmul.f32 %v2057_v29, %v1247_v13  ;;  %3490 = vst [vmem:[#allocation4_spill] sm:$0xff] %v2991_v2  ;;  %v1763_v9 = vrot.slane %v2991_v2, 2  ;;  %v1219_v29 = vmul.f32 0.5, %v1217_v55 }
 0x243   : > { %v1258_v8 = vmul.f32 %v2059_v42, %v1248_v15 }
 0x244   : > { %v1259_v49 = vmul.f32 %v2061_v32, %v1249_v48 }
 0x245   : > { %v1260_v28 = vsub.f32 1.0, %v1258_v8 }
 0x246   : > { %v1261_v17 = vsub.f32 1.0, %v1259_v49 }
 0x247   : > { %v1264_v23 = vsub.f32 0.0, %v1260_v28 }
 0x248   : > { %v1265_v22 = vsub.f32 0.0, %v1261_v17 }
 0x249   : > { %v1266_v27 = vsel %vm1262_vm1, %v1264_v23, %v1260_v28 }
 0x24a   : > { %v1267_v18 = vsel %vm1263_vm15, %v1265_v22, %v1261_v17  ;;  %v1268_v46 = vadd.f32 1.0, %v1266_v27  ;;  %vm3494_vm15 = vcmp.ge.s32.totalorder %v2379_v35, 1 }
 0x24b   : > { %v1269_v62 = vadd.f32 1.0, %v1267_v18 }
 0x24c   : > { %v1270_v34 = vmul.f32 %v1268_v46, %v1218_v37 }
 0x24d   : > { %v1271_v4 = vmul.f32 %v1269_v62, %v1219_v29 }
 0x24e   : > { %v1274_v38 = vrot.slane %v1270_v34, 4  ;;  %v2994_v63 = vadd.f32 %v1762_v51, %v1270_v34 }
 0x24f   : > { %v1275_v31 = vrot.slane %v1271_v4, 4  ;;  %v2996_v12 = vadd.f32 %v1763_v9, %v1271_v4 }
 0x250   : > { %v1278_v0 = vadd.f32 %v1274_v38, %v2280_v6  ;;  %v3000_v39 = vmul.f32 0.70710677, %v2994_v63 }
 0x251   : > { %v1279_v36 = vadd.f32 %v1275_v31, %v3491_v7  ;;  %v3004_v30 = vmul.f32 0.70710677, %v2996_v12 }
 0x252   : > { %v3006_v55 = vrot.slane %v1278_v0, 4  ;;  %v1772_v5 = vand.u32 2147483647, %v3000_v39  ;;  %vm1812_vm4 = vcmp.lt.f32.partialorder %v3000_v39, 0.0 }
 0x253   : > { %v3009_v24 = vrot.slane %v1279_v36, 4  ;;  %v1773_v25 = vand.u32 2147483647, %v3004_v30  ;;  %vm1813_vm11 = vcmp.lt.f32.partialorder %v3004_v30, 0.0 }
 0x254   : > { %v1774_v47 = vmul.f32 0.3275911, %v1772_v5  ;;  %1286 = vrot.lane.b32.xlu1 %v3006_v55, %s2112_s22  ;;  %v1800_v40 = vsub.f32 0.0, %v1772_v5 }
 0x255   : > { %v1775_v6 = vmul.f32 0.3275911, %v1773_v25  ;;  %1288 = vrot.lane.b32.xlu0 %v3009_v24, %s2112_s22  ;;  %v1801_v45 = vsub.f32 0.0, %v1773_v25 }
 0x256   : > { %v1776_v44 = vadd.f32 1.0, %v1774_v47  ;;  %v1802_v13 = vmul.f32 %v1800_v40, %v1772_v5  ;;  %v1768_v40 = vmul.f32 0.5, %v2994_v63  ;;  %v3062_v63 = vpop.permute.xlu1 %1311 }
 0x257   : > { %v1777_v26 = vadd.f32 1.0, %v1775_v6  ;;  %v1803_v48 = vmul.f32 %v1801_v45, %v1773_v25 }
 0x258   : > { %2062 = vrcp.f32 %v1776_v44  ;;  %1318 = vrot.lane.b32.xlu1 %v3006_v55, %s2098_s23  ;;  %v1804_v28 = vmul.f32 1.442695, %v1802_v13  ;;  %v1769_v13 = vmul.f32 0.5, %v2996_v12  ;;  %v3064_v12 = vpop.permute.xlu0 %1330 }
 0x259   : > { %2064 = vrcp.f32 %v1777_v26  ;;  %1320 = vrot.lane.b32.xlu0 %v3009_v24, %s2098_s23  ;;  %s2113_s23 = smov 14   ;;  %v1806_v23 = vmul.f32 1.442695, %v1803_v48 }
 0x25a   : > { %2066 = vpow2.f32 %v1804_v28 }
 0x25b   : > { %2068 = vpow2.f32 %v1806_v23 }
 0x25c   : > { %1339 = vrot.lane.b32.xlu1 %v3009_v24, %s2099_s24 }
 0x25d   : > { %1337 = vrot.lane.b32.xlu0 %v3006_v55, %s2099_s24  ;;  %s2114_s24 = smov 2  }
 0x260   : > { %1356 = vrot.lane.b32.xlu1 %v3006_v55, %s2100_s25 }
 0x261   : > { %1358 = vrot.lane.b32.xlu0 %v3009_v24, %s2100_s25  ;;  %s3492_s25 = smov 127  }
 0x262   : > { %v2063_v50 = vpop.eup %2062 }
 0x263   : > { %v2065_v15 = vpop.eup %2064  ;;  %v1782_v42 = vmul.f32 1.0614054, %v2063_v50 }
 0x264   : > { %v1783_v32 = vmul.f32 1.0614054, %v2065_v15  ;;  %1377 = vrot.lane.b32.xlu1 %v3009_v24, %s2113_s23  ;;  %v2067_v31 = vpop.eup %2066 }
 0x265   : > { %v1784_v8 = vadd.f32 -1.4531521, %v1782_v42  ;;  %1375 = vrot.lane.b32.xlu0 %v3006_v55, %s2113_s23  ;;  %v2069_v7 = vpop.eup %2068 }
 0x266   : > { %v1785_v49 = vadd.f32 -1.4531521, %v1783_v32  ;;  %v3066_v32 = vpop.permute.xlu1 %1349 }
 0x267   : > { %v1786_v17 = vmul.f32 %v2063_v50, %v1784_v8  ;;  %v3068_v8 = vpop.permute.xlu0 %1368 }
 0x268   : > { %v1787_v22 = vmul.f32 %v2065_v15, %v1785_v49  ;;  %1408 = vrot.lane.b32.xlu1 %v3006_v55, %s2114_s24 }
 0x269   : > { %v1788_v27 = vadd.f32 1.4214138, %v1786_v17  ;;  %1410 = vrot.lane.b32.xlu0 %v3009_v24, %s2114_s24 }
 0x26a   : > { %v1789_v51 = vadd.f32 1.4214138, %v1787_v22  ;;  %v3070_v49 = vpop.permute.xlu1 %1401 }
 0x26b   : > { %v1790_v37 = vmul.f32 %v2063_v50, %v1788_v27  ;;  %v3072_v28 = vpop.permute.xlu0 %1432 }
 0x26c   : > { %v1791_v18 = vmul.f32 %v2065_v15, %v1789_v51  ;;  %1441 = vrot.lane.b32.xlu1 %v3009_v24, %s2101_s26 }
 0x26d   : > { %v1792_v46 = vadd.f32 -0.28449672, %v1790_v37  ;;  %1439 = vrot.lane.b32.xlu0 %v3006_v55, %s2101_s26  ;;  %s2116_s26 = smov 114  }
 0x26e   : > { %v1793_v9 = vadd.f32 -0.28449672, %v1791_v18  ;;  %v3074_v17 = vpop.permute.xlu1 %1451 }
 0x26f   : > { %v1794_v29 = vmul.f32 %v2063_v50, %v1792_v46  ;;  %v3076_v23 = vpop.permute.xlu0 %1462 }
 0x270   : > { %v1795_v62 = vmul.f32 %v2065_v15, %v1793_v9  ;;  %1471 = vrot.lane.b32.xlu1 %v3009_v24, %s3492_s25 }
 0x271   : > { %v1796_v34 = vadd.f32 0.2548296, %v1794_v29  ;;  %1469 = vrot.lane.b32.xlu0 %v3006_v55, %s3492_s25 }
 0x272   : > { %v1797_v4 = vadd.f32 0.2548296, %v1795_v62  ;;  %v3078_v22 = vpop.permute.xlu1 %1481 }
 0x273   : > { %v1798_v38 = vmul.f32 %v2063_v50, %v1796_v34  ;;  %v3080_v27 = vpop.permute.xlu0 %1512 }
 0x274   : > { %v1799_v0 = vmul.f32 %v2065_v15, %v1797_v4  ;;  %1488 = vrot.lane.b32.xlu1 %v3006_v55, %s2115_s13  ;;  %v3097_v4 = vld [vmem:[%s3348_s10] sm:$0x3] }
 0x275   : > { %v1808_v36 = vmul.f32 %v2067_v31, %v1798_v38  ;;  %1490 = vrot.lane.b32.xlu0 %v3009_v24, %s2115_s13  ;;  %vm3392_vm5 = vcmp.ge.s32.totalorder %v3097_v4, 2  ;;  %vm3391_vm1 = vcmp.lt.s32.totalorder %v3097_v4, 14 }
 0x276   : > { %v1809_v5 = vmul.f32 %v2069_v7, %v1799_v0  ;;  %v3082_v51 = vpop.permute.xlu1 %1544 }
 0x277   : > { %v1810_v25 = vsub.f32 1.0, %v1808_v36  ;;  %v3084_v37 = vpop.permute.xlu0 %1563 }
 0x278   : > { %v1811_v47 = vsub.f32 1.0, %v1809_v5  ;;  %1521 = vrot.lane.b32.xlu1 %v3009_v24, %s2116_s26 }
 0x279   : > { %v1814_v6 = vsub.f32 0.0, %v1810_v25  ;;  %1519 = vrot.lane.b32.xlu0 %v3006_v55, %s2116_s26 }
 0x27a   : > { %v1815_v44 = vsub.f32 0.0, %v1811_v47  ;;  %v3086_v18 = vpop.permute.xlu1 %1582 }
 0x27b   : > { %v1816_v26 = vsel %vm1812_vm4, %v1814_v6, %v1810_v25  ;;  %v3088_v46 = vpop.permute.xlu0 %1601  ;;  %vm1294_vm4 = vmand %vm3494_vm15, %vm3392_vm5 }
 0x27c   : > { %v1817_v45 = vsel %vm1813_vm11, %v1815_v44, %v1811_v47  ;;  %v1818_v50 = vadd.f32 1.0, %v1816_v26  ;;  %1551 = vrot.lane.b32.xlu1 %v3006_v55, %s3493_s14  ;;  %vm3495_vm11 = vmmov %vm3494_vm15  ;;  %v1295_v0 = vsel %vm1294_vm4, 1, %v3457_v16  ;;  %vm3500_vm4 = vcmp.lt.s32.totalorder %v2410_v43, 17 }
 0x27d   : > { %v1819_v15 = vadd.f32 1.0, %v1817_v45  ;;  %1553 = vrot.lane.b32.xlu0 %v3009_v24, %s3493_s14  ;;  %vm1383_vm6 = vmand %vm3495_vm11, %vm3391_vm1  ;;  %v1299_v25 = vrot.slane %v1295_v0, %v2254_v20  ;;  %v1303_v47 = vrot.slane %v1295_v0, %v2256_v21  ;;  %vm3502_vm1 = vcmp.lt.s32.totalorder %v2410_v43, 16 }
 0x27e   : > { %v1820_v39 = vmul.f32 %v1818_v50, %v1768_v40  ;;  %v3090_v9 = vpop.permute.xlu1 %1633  ;;  %v1384_v5 = vsel %vm1383_vm6, 1, %v3457_v16  ;;  %v1415_v40 = vsel %vm3392_vm5, 1, %v3457_v16  ;;  %vm3501_vm11 = vmmov %vm3500_vm4 }
 0x27f   : > { %v1821_v42 = vmul.f32 %v1819_v15, %v1769_v13  ;;  %v3092_v29 = vpop.permute.xlu0 %1643  ;;  %v1388_v26 = vrot.slane %v1384_v5, %v2254_v20  ;;  %v1392_v45 = vrot.slane %v1384_v5, %v2256_v21  ;;  %vm3119_vm15 = vcmp.eq.s32.totalorder %v1299_v25, 1  ;;  %vm3503_vm5 = vmmov %vm3502_vm1 }
 0x280   : > { %v1824_v48 = vrot.slane %v1820_v39, 6  ;;  %1572 = vrot.lane.b32.xlu1 %v3009_v24, %s3430_s30  ;;  %vm3123_vm6 = vcmp.eq.s32.totalorder %v1303_v47, 1  ;;  %v1419_v0 = vrot.slane %v1415_v40, %v2254_v20  ;;  %v1423_v5 = vrot.slane %v1415_v40, %v2256_v21 }
 0x281   : > { %v1825_v30 = vrot.slane %v1821_v42, 6  ;;  %1570 = vrot.lane.b32.xlu0 %v3006_v55, %s3430_s30 }
 0x282   : > { %1828 = vst [vmem:[%s2671_s16] sm:$0xc] %v1824_v48 }
 0x283   : > { %1829 = vst [vmem:[%s2671_s16 + $0x8] sm:$0xc] %v1825_v30 }
 0x284   : > { %1591 = vrot.lane.b32.xlu1 %v3009_v24, %s3431_s12 }
 0x285   : > { %1589 = vrot.lane.b32.xlu0 %v3006_v55, %s3431_s12 }
 0x288   : > { %1608 = vrot.lane.b32.xlu1 %v3006_v55, %s2117_s15 }
 0x289   : > { %1610 = vrot.lane.b32.xlu0 %v3009_v24, %s2117_s15 }
 0x2c6   : > { %v1287_v62 = vpop.permute.xlu1 %1286 }
 0x2c7   : > { %v1289_v34 = vpop.permute.xlu0 %1288 }
 0x2c8   : > { %v1291_v42 = vsel %vm1290_vm12, %v1287_v62, %v1289_v34  ;;  %v1292_v48 = vsel %vm1290_vm12, %v1289_v34, %v1287_v62  ;;  %vm3146_vm12 = vcmp.eq.s32.totalorder %v1392_v45, 1 }
 0x2ca   : > { %v1319_v38 = vpop.permute.xlu1 %1318 }
 0x2cb   : > { %v1321_v31 = vpop.permute.xlu0 %1320 }
 0x2cc   : > { %v1322_v15 = vsel %vm3500_vm4, %v1319_v38, %v1321_v31  ;;  %v1323_v39 = vsel %vm3501_vm11, %v1321_v31, %v1319_v38  ;;  %vm3138_vm4 = vcmp.eq.s32.totalorder %v1388_v26, 1  ;;  %v1306_v31 = vsel %vm3119_vm15, %v1292_v48, 0.0 }
 0x2cd   : > { %v1324_v62 = vsel %vm2424_vm7, %v1323_v39, 0.0  ;;  %v1325_v34 = vsel %vm2428_vm8, %v1322_v15, 0.0  ;;  %vm3163_vm8 = vcmp.eq.s32.totalorder %v1419_v0, 1  ;;  %vm3167_vm15 = vcmp.eq.s32.totalorder %v1423_v5, 1 }
 0x2ce   : > { %v1340_v7 = vpop.permute.xlu1 %1339  ;;  %v1333_v13 = vmul.f32 %v3064_v12, %v1324_v62  ;;  %v1334_v15 = vmul.f32 %v3064_v12, %v1325_v34  ;;  %vm3519_vm11 = vcmp.lt.s32.totalorder %v3097_v4, 14 }
 0x2cf   : > { %v1338_v36 = vpop.permute.xlu0 %1337  ;;  %v1495_v45 = vsel %vm3519_vm11, 1, %v3457_v16 }
 0x2d0   : > { %v1341_v25 = vsel %vm3502_vm1, %v1338_v36, %v1340_v7  ;;  %v1342_v47 = vsel %vm3503_vm5, %v1340_v7, %v1338_v36  ;;  %vm1412_vm1 = vcmp.lt.s32.totalorder %v2410_v43, 2  ;;  %v1307_v7 = vsel %vm3123_vm6, %v1291_v42, 0.0 }
 0x2d1   : > { %vm3508_vm5 = vcmp.lt.s32.totalorder %v2410_v43, 15  ;;  %v1343_v54 = vsel %vm2432_vm9, %v1342_v47, 0.0  ;;  %v1344_v26 = vsel %vm2437_vm10, %v1341_v25, 0.0  ;;  %v1315_v39 = vmul.f32 %v3062_v63, %v1307_v7 }
 0x2d2   : > { %v1357_v6 = vpop.permute.xlu1 %1356  ;;  %vm3509_vm7 = vmmov %vm3508_vm5  ;;  %v1352_v0 = vmul.f32 %v3066_v32, %v1343_v54  ;;  %v1353_v12 = vmul.f32 %v3066_v32, %v1344_v26  ;;  %vm3514_vm9 = vcmp.lt.s32.totalorder %v2410_v43, 1  ;;  %vm3518_vm6 = vnez %v3411_v19 }
 0x2d3   : > { %v1359_v44 = vpop.permute.xlu0 %1358  ;;  %v1336_v3 = vadd.f32 %v1334_v15, %v1315_v39  ;;  %vm3515_vm10 = vmmov %vm3514_vm9  ;;  %v1499_v39 = vrot.slane %v1495_v45, %v2254_v20 }
 0x2d4   : > { %v1360_v36 = vsel %vm3508_vm5, %v1357_v6, %v1359_v44  ;;  %v1361_v53 = vsel %vm3509_vm7, %v1359_v44, %v1357_v6  ;;  %v1314_v44 = vmul.f32 %v3062_v63, %v1306_v31  ;;  %vm1523_vm7 = vcmp.lt.s32.totalorder %v2410_v43, 114 }
 0x2d5   : > { %v1362_v42 = vsel %vm2452_vm13, %v1361_v53, 0.0  ;;  %v1363_v48 = vsel %vm2456_vm14, %v1360_v36, 0.0  ;;  %v1355_v36 = vadd.f32 %v1353_v12, %v1336_v3  ;;  %vm3516_vm13 = vcmp.ge.s32.totalorder %v3097_v4, 2 }
 0x2d6   : > { %v1378_v30 = vpop.permute.xlu1 %1377  ;;  %v1335_v25 = vadd.f32 %v1333_v13, %v1314_v44  ;;  %v1371_v47 = vmul.f32 %v3068_v8, %v1362_v42  ;;  %v1372_v62 = vmul.f32 %v3068_v8, %v1363_v48  ;;  %vm3517_vm14 = vcmp.lt.s32.totalorder %v2379_v35, 15 }
 0x2d7   : > { %v1376_v2 = vpop.permute.xlu0 %1375  ;;  %v1503_v42 = vrot.slane %v1495_v45, %v2256_v21  ;;  %v1466_v3 = vmul.f32 %v3076_v23, %v3009_v24 }
 0x2d8   : > { %v1380_v56 = vsel %vm1379_vm3, %v1376_v2, %v1378_v30  ;;  %v1381_v59 = vsel %vm1379_vm3, %v1378_v30, %v1376_v2  ;;  %v1354_v7 = vadd.f32 %v1352_v0, %v1335_v25  ;;  %vm1526_vm3 = vmand %vm3517_vm14, %vm3516_vm13  ;;  %v1374_v13 = vadd.f32 %v1372_v62, %v1355_v36 }
 0x2d9   : > { %v1395_v30 = vsel %vm3138_vm4, %v1381_v59, 0.0  ;;  %v1396_v1 = vsel %vm3146_vm12, %v1380_v56, 0.0  ;;  %v1527_v59 = vsel %vm1526_vm3, 1, %v3457_v16  ;;  %vm3520_vm4 = vcmp.lt.s32.totalorder %v2410_v43, 127  ;;  %vm3532_vm13 = vmmov %vm3519_vm11 }
 0x2da   : > { %v1409_v50 = vpop.permute.xlu1 %1408  ;;  %v1404_v53 = vmul.f32 %v3070_v49, %v1395_v30  ;;  %v1405_v54 = vmul.f32 %v3070_v49, %v1396_v1  ;;  %vm3521_vm12 = vmmov %vm3520_vm4  ;;  %v1531_v30 = vrot.slane %v1527_v59, %v2254_v20  ;;  %v1465_v1 = vmul.f32 %v3076_v23, %v3006_v55 }
 0x2db   : > { %v1411_v6 = vpop.permute.xlu0 %1410  ;;  %vm3238_vm5 = vcmp.eq.s32.totalorder %v1503_v42, 1  ;;  %vm1615_vm3 = vmand %vm3517_vm14, %vm3532_vm13 }
 0x2dc   : > { %v1413_v5 = vsel %vm1412_vm1, %v1409_v50, %v1411_v6  ;;  %v1414_v2 = vsel %vm1412_vm1, %v1411_v6, %v1409_v50  ;;  %v1373_v50 = vadd.f32 %v1371_v47, %v1354_v7  ;;  %v1407_v11 = vadd.f32 %v1405_v54, %v1374_v13 }
 0x2dd   : > { %v1426_v34 = vsel %vm3163_vm8, %v1414_v2, 0.0  ;;  %v1427_v31 = vsel %vm3167_vm15, %v1413_v5, 0.0  ;;  %vm3234_vm1 = vcmp.eq.s32.totalorder %v1499_v39, 1  ;;  %vm3526_vm8 = vnez %v3413_v60 }
 0x2de   : > { %v1442_v63 = vpop.permute.xlu1 %1441  ;;  %v1435_v49 = vmul.f32 %v3072_v28, %v1426_v34  ;;  %v1436_v15 = vmul.f32 %v3072_v28, %v1427_v31  ;;  %v1406_v6 = vadd.f32 %v1404_v53, %v1373_v50  ;;  %vm3527_vm15 = vnez %v3415_v61 }
 0x2df   : > { %v1440_v32 = vpop.permute.xlu0 %1439  ;;  %v1616_v35 = vsel %vm1615_vm3, 1, %v3457_v16 }
 0x2e0   : > { %v1443_v52 = vsel %vm3514_vm9, %v1440_v32, %v1442_v63  ;;  %v1444_v38 = vsel %vm3515_vm10, %v1442_v63, %v1440_v32  ;;  %v1437_v0 = vadd.f32 %v1435_v49, %v1406_v6  ;;  %v1438_v12 = vadd.f32 %v1436_v15, %v1407_v11 }
 0x2e1   : > { %v1445_v8 = vsel %vm2468_vm2, %v1444_v38, 0.0  ;;  %v1446_v26 = vsel %vm3518_vm6, %v1443_v52, 0.0  ;;  %vm1492_vm2 = vcmp.lt.s32.totalorder %v2410_v43, 126  ;;  %vm3251_vm9 = vcmp.eq.s32.totalorder %v1531_v30, 1 }
 0x2e2   : > { %v1472_v40 = vpop.permute.xlu1 %1471  ;;  %v1454_v44 = vmul.f32 %v3074_v17, %v1445_v8  ;;  %v1455_v19 = vmul.f32 %v3074_v17, %v1446_v26  ;;  %v1535_v17 = vrot.slane %v1527_v59, %v2256_v21  ;;  %vm3533_vm6 = vcmp.lt.s32.totalorder %v2410_v43, 113 }
 0x2e3   : > { %v1470_v56 = vpop.permute.xlu0 %1469  ;;  %vm3534_vm11 = vmmov %vm3533_vm6 }
 0x2e4   : > { %v1473_v28 = vsel %vm3520_vm4, %v1470_v56, %v1472_v40  ;;  %v1474_v2 = vsel %vm3521_vm12, %v1472_v40, %v1470_v56  ;;  %v1456_v63 = vadd.f32 %v1454_v44, %v1437_v0  ;;  %v1457_v25 = vadd.f32 %v1455_v19, %v1438_v12 }
 0x2e5   : > { %v1475_v34 = vsel %vm3526_vm8, %v1473_v28, 0.0  ;;  %v1476_v55 = vsel %vm3527_vm15, %v1474_v2, 0.0  ;;  %vm3255_vm10 = vcmp.eq.s32.totalorder %v1535_v17, 1  ;;  %vm3536_vm4 = vnez %v3419_v14 }
 0x2e6   : > { %v1489_v48 = vpop.permute.xlu1 %1488  ;;  %v1468_v60 = vadd.f32 %v1466_v3, %v1457_v25  ;;  %v1467_v7 = vadd.f32 %v1465_v1, %v1456_v63  ;;  %v1484_v53 = vmul.f32 %v3078_v22, %v1475_v34  ;;  %v1485_v54 = vmul.f32 %v3078_v22, %v1476_v55  ;;  %v3548_v3 = vld [vmem:[#allocation3_spill] sm:$0xff] }
 0x2e7   : > { %v1491_v5 = vpop.permute.xlu0 %1490  ;;  %vm3537_vm12 = vcmp.lt.s32.totalorder %v2410_v43, 112  ;;  %v1624_v0 = vrot.slane %v1616_v35, %v2256_v21  ;;  %vm3540_vm8 = vcmp.lt.s32.totalorder %v2410_v43, 111  ;;  %vm3542_vm15 = vnez %v3425_v57 }
 0x2e8   : > { %v1493_v24 = vsel %vm1492_vm2, %v1489_v48, %v1491_v5  ;;  %v1494_v23 = vsel %vm1492_vm2, %v1491_v5, %v1489_v48  ;;  %v1486_v56 = vadd.f32 %v1484_v53, %v1467_v7  ;;  %v1487_v59 = vadd.f32 %v1485_v54, %v1468_v60 }
 0x2e9   : > { %v1506_v8 = vsel %vm3234_vm1, %v1493_v24, 0.0  ;;  %v1507_v26 = vsel %vm3238_vm5, %v1494_v23, 0.0  ;;  %vm3535_vm2 = vnez %v3417_v10  ;;  %vm3538_vm1 = vmmov %vm3537_vm12  ;;  %vm3539_vm5 = vnez %v3423_v33 }
 0x2ea   : > { %v1522_v32 = vpop.permute.xlu1 %1521  ;;  %v1515_v15 = vmul.f32 %v3080_v27, %v1506_v8  ;;  %v1516_v4 = vmul.f32 %v3080_v27, %v1507_v26  ;;  %v1620_v27 = vrot.slane %v1616_v35, %v2254_v20  ;;  %vm3313_vm13 = vcmp.eq.s32.totalorder %v1624_v0, 1 }
 0x2eb   : > { %v1520_v31 = vpop.permute.xlu0 %1519 }
 0x2ec   : > { %v1524_v36 = vsel %vm1523_vm7, %v1520_v31, %v1522_v32  ;;  %v1525_v61 = vsel %vm1523_vm7, %v1522_v32, %v1520_v31  ;;  %v1517_v12 = vadd.f32 %v1515_v15, %v1486_v56  ;;  %v1518_v5 = vadd.f32 %v1516_v4, %v1487_v59 }
 0x2ed   : > { %v1538_v50 = vsel %vm3251_vm9, %v1524_v36, 0.0  ;;  %v1539_v13 = vsel %vm3255_vm10, %v1525_v61, 0.0  ;;  %vm1612_vm7 = vcmp.lt.s32.totalorder %v2410_v43, 110  ;;  %vm3543_vm9 = vnez %v3427_v58 }
 0x2ee   : > { %v1552_v40 = vpop.permute.xlu1 %1551  ;;  %v1547_v11 = vmul.f32 %v3082_v51, %v1538_v50  ;;  %v1548_v44 = vmul.f32 %v3082_v51, %v1539_v13  ;;  %vm3309_vm10 = vcmp.eq.s32.totalorder %v1620_v27, 1 }
 0x2ef   : > { %v1554_v45 = vpop.permute.xlu0 %1553 }
 0x2f0   : > { %v1555_v22 = vsel %vm3533_vm6, %v1552_v40, %v1554_v45  ;;  %v1556_v49 = vsel %vm3534_vm11, %v1554_v45, %v1552_v40  ;;  %v1549_v30 = vadd.f32 %v1547_v11, %v1517_v12  ;;  %v1550_v17 = vadd.f32 %v1548_v44, %v1518_v5 }
 0x2f1   : > { %v1557_v19 = vsel %vm3535_vm2, %v1555_v22, 0.0  ;;  %v1558_v39 = vsel %vm3536_vm4, %v1556_v49, 0.0 }
 0x2f2   : > { %v1573_v6 = vpop.permute.xlu1 %1572  ;;  %v1566_v51 = vmul.f32 %v3084_v37, %v1557_v19  ;;  %v1567_v28 = vmul.f32 %v3084_v37, %v1558_v39 }
 0x2f3   : > { %v1571_v42 = vpop.permute.xlu0 %1570 }
 0x2f4   : > { %v1574_v48 = vsel %vm3537_vm12, %v1571_v42, %v1573_v6  ;;  %v1575_v16 = vsel %vm3538_vm1, %v1573_v6, %v1571_v42  ;;  %v1569_v47 = vadd.f32 %v1567_v28, %v1550_v17 }
 0x2f5   : > { %v1576_v10 = vsel %vm3473_vm0, %v1574_v48, 0.0  ;;  %v1577_v14 = vsel %vm3539_vm5, %v1575_v16, 0.0  ;;  %vm3541_vm0 = vmmov %vm3540_vm8 }
 0x2f6   : > { %v1592_v2 = vpop.permute.xlu1 %1591  ;;  %v1585_v20 = vmul.f32 %v3086_v18, %v1576_v10  ;;  %v1586_v21 = vmul.f32 %v3086_v18, %v1577_v14  ;;  %v1568_v18 = vadd.f32 %v1566_v51, %v1549_v30 }
 0x2f7   : > { %v1590_v1 = vpop.permute.xlu0 %1589 }
 0x2f8   : > { %v1593_v41 = vsel %vm3540_vm8, %v1590_v1, %v1592_v2  ;;  %v1594_v33 = vsel %vm3541_vm0, %v1592_v2, %v1590_v1  ;;  %v1587_v55 = vadd.f32 %v1585_v20, %v1568_v18  ;;  %v1588_v24 = vadd.f32 %v1586_v21, %v1569_v47 }
 0x2f9   : > { %v1595_v63 = vsel %vm3542_vm15, %v1593_v41, 0.0  ;;  %v1596_v37 = vsel %vm3543_vm9, %v1594_v33, 0.0  ;;  %v1830_v18 = vrot.slane %v3548_v3, 4 }
 0x2fa   : > { %v1604_v62 = vmul.f32 %v3088_v46, %v1595_v63  ;;  %v1605_v32 = vmul.f32 %v3088_v46, %v1596_v37  ;;  %v1609_v34 = vpop.permute.xlu1 %1608 }
 0x2fb   : > { %v1611_v57 = vpop.permute.xlu0 %1610 }
 0x2fc   : > { %v1613_v58 = vsel %vm1612_vm7, %v1609_v34, %v1611_v57  ;;  %v1614_v23 = vsel %vm1612_vm7, %v1611_v57, %v1609_v34  ;;  %v1606_v38 = vadd.f32 %v1604_v62, %v1587_v55  ;;  %v1607_v60 = vadd.f32 %v1605_v32, %v1588_v24  ;;  %v3549_v34 = vld [vmem:[#allocation4_spill] sm:$0xff] }
 0x2fd   : > { %v1627_v31 = vsel %vm3309_vm10, %v1613_v58, 0.0  ;;  %v1628_v52 = vsel %vm3313_vm13, %v1614_v23, 0.0  ;;  %v1831_v57 = vrot.slane %v3549_v34, 4 }
 0x2fe   : > { %v1636_v46 = vmul.f32 %v3090_v9, %v1627_v31  ;;  %v1637_v7 = vmul.f32 %v3090_v9, %v1628_v52 }
 0x300   : > { %v1638_v36 = vadd.f32 %v1636_v46, %v1606_v38  ;;  %v1639_v61 = vadd.f32 %v1637_v7, %v1607_v60 }
 0x302   : > { %v1646_v53 = vadd.f32 %v3092_v29, %v1638_v36  ;;  %v1647_v54 = vadd.f32 %v3092_v29, %v1639_v61 }
 0x304   : > { %v1650_v43 = vmul.f32 0.70710677, %v1646_v53  ;;  %v1651_v8 = vmul.f32 0.70710677, %v1647_v54  ;;  %v1648_v47 = vmul.f32 0.5, %v1646_v53  ;;  %v1649_v55 = vmul.f32 0.5, %v1647_v54 }
 0x306   : > { %v1652_v26 = vand.u32 2147483647, %v1650_v43  ;;  %v1653_v40 = vand.u32 2147483647, %v1651_v8  ;;  %vm1692_vm14 = vcmp.lt.f32.partialorder %v1650_v43, 0.0  ;;  %vm1693_vm3 = vcmp.lt.f32.partialorder %v1651_v8, 0.0 }
 0x308   : > { %v1654_v45 = vmul.f32 0.3275911, %v1652_v26  ;;  %v1655_v50 = vmul.f32 0.3275911, %v1653_v40  ;;  %v1680_v49 = vsub.f32 0.0, %v1652_v26  ;;  %v1681_v15 = vsub.f32 0.0, %v1653_v40 }
 0x30a   : > { %v1656_v13 = vadd.f32 1.0, %v1654_v45  ;;  %v1657_v22 = vadd.f32 1.0, %v1655_v50  ;;  %v1682_v9 = vmul.f32 %v1680_v49, %v1652_v26  ;;  %v1683_v59 = vmul.f32 %v1681_v15, %v1653_v40 }
 0x30c   : > { %2070 = vrcp.f32 %v1656_v13  ;;  %v1684_v44 = vmul.f32 1.442695, %v1682_v9  ;;  %v1686_v39 = vmul.f32 1.442695, %v1683_v59 }
 0x30d   : > { %2072 = vrcp.f32 %v1657_v22 }
 0x30e   : > { %2074 = vpow2.f32 %v1684_v44 }
 0x30f   : > { %2076 = vpow2.f32 %v1686_v39 }
 0x316   : > { %v2071_v4 = vpop.eup %2070 }
 0x317   : > { %v2073_v35 = vpop.eup %2072  ;;  %v1662_v56 = vmul.f32 1.0614054, %v2071_v4 }
 0x318   : > { %v1663_v6 = vmul.f32 1.0614054, %v2073_v35  ;;  %v2075_v30 = vpop.eup %2074 }
 0x319   : > { %v1664_v11 = vadd.f32 -1.4531521, %v1662_v56  ;;  %v2077_v1 = vpop.eup %2076 }
 0x31a   : > { %v1665_v29 = vadd.f32 -1.4531521, %v1663_v6 }
 0x31b   : > { %v1666_v19 = vmul.f32 %v2071_v4, %v1664_v11 }
 0x31c   : > { %v1667_v42 = vmul.f32 %v2073_v35, %v1665_v29 }
 0x31d   : > { %v1668_v48 = vadd.f32 1.4214138, %v1666_v19 }
 0x31e   : > { %v1669_v16 = vadd.f32 1.4214138, %v1667_v42 }
 0x31f   : > { %v1670_v27 = vmul.f32 %v2071_v4, %v1668_v48 }
 0x320   : > { %v1671_v0 = vmul.f32 %v2073_v35, %v1669_v16 }
 0x321   : > { %v1672_v12 = vadd.f32 -0.28449672, %v1670_v27 }
 0x322   : > { %v1673_v5 = vadd.f32 -0.28449672, %v1671_v0 }
 0x323   : > { %v1674_v10 = vmul.f32 %v2071_v4, %v1672_v12 }
 0x324   : > { %v1675_v14 = vmul.f32 %v2073_v35, %v1673_v5 }
 0x325   : > { %v1676_v51 = vadd.f32 0.2548296, %v1674_v10 }
 0x326   : > { %v1677_v28 = vadd.f32 0.2548296, %v1675_v14 }
 0x327   : > { %v1678_v2 = vmul.f32 %v2071_v4, %v1676_v51 }
 0x328   : > { %v1679_v17 = vmul.f32 %v2073_v35, %v1677_v28 }
 0x329   : > { %v1688_v20 = vmul.f32 %v2075_v30, %v1678_v2 }
 0x32a   : > { %v1689_v21 = vmul.f32 %v2077_v1, %v1679_v17 }
 0x32b   : > { %v1690_v41 = vsub.f32 1.0, %v1688_v20 }
 0x32c   : > { %v1691_v33 = vsub.f32 1.0, %v1689_v21 }
 0x32d   : > { %v1694_v63 = vsub.f32 0.0, %v1690_v41 }
 0x32e   : > { %v1695_v37 = vsub.f32 0.0, %v1691_v33 }
 0x32f   : > { %v1696_v25 = vsel %vm1692_vm14, %v1694_v63, %v1690_v41 }
 0x330   : > { %v1697_v62 = vsel %vm1693_vm3, %v1695_v37, %v1691_v33  ;;  %v1698_v32 = vadd.f32 1.0, %v1696_v25 }
 0x331   : > { %v1699_v24 = vadd.f32 1.0, %v1697_v62 }
 0x332   : > { %v1700_v58 = vmul.f32 %v1698_v32, %v1648_v47 }
 0x333   : > { %v1701_v23 = vmul.f32 %v1699_v24, %v1649_v55 }
 0x334   : > { %v1834_v31 = vadd.f32 %v1830_v18, %v1700_v58 }
 0x335   : > { %v1835_v52 = vadd.f32 %v1831_v57, %v1701_v23 }
 0x336   : > { %v1838_v38 = vmul.f32 0.70710677, %v1834_v31  ;;  %v1836_v1 = vmul.f32 0.5, %v1834_v31 }
 0x337   : > { %v1839_v60 = vmul.f32 0.70710677, %v1835_v52  ;;  %v1837_v41 = vmul.f32 0.5, %v1835_v52 }
 0x338   : > { %v1840_v46 = vand.u32 2147483647, %v1838_v38  ;;  %vm1880_vm6 = vcmp.lt.f32.partialorder %v1838_v38, 0.0 }
 0x339   : > { %v1841_v7 = vand.u32 2147483647, %v1839_v60  ;;  %vm1881_vm11 = vcmp.lt.f32.partialorder %v1839_v60, 0.0 }
 0x33a   : > { %v1842_v36 = vmul.f32 0.3275911, %v1840_v46  ;;  %v1868_v53 = vsub.f32 0.0, %v1840_v46 }
 0x33b   : > { %v1843_v61 = vmul.f32 0.3275911, %v1841_v7  ;;  %v1869_v26 = vsub.f32 0.0, %v1841_v7 }
 0x33c   : > { %v1844_v43 = vadd.f32 1.0, %v1842_v36  ;;  %v1870_v45 = vmul.f32 %v1868_v53, %v1840_v46 }
 0x33d   : > { %v1845_v8 = vadd.f32 1.0, %v1843_v61  ;;  %v1871_v13 = vmul.f32 %v1869_v26, %v1841_v7 }
 0x33e   : > { %2078 = vrcp.f32 %v1844_v43  ;;  %v1872_v4 = vmul.f32 1.442695, %v1870_v45 }
 0x33f   : > { %2080 = vrcp.f32 %v1845_v8  ;;  %v1874_v35 = vmul.f32 1.442695, %v1871_v13 }
 0x340   : > { %2082 = vpow2.f32 %v1872_v4 }
 0x341   : > { %2084 = vpow2.f32 %v1874_v35 }
 0x348   : > { %v2079_v40 = vpop.eup %2078 }
 0x349   : > { %v2081_v54 = vpop.eup %2080  ;;  %v1850_v50 = vmul.f32 1.0614054, %v2079_v40 }
 0x34a   : > { %v1851_v22 = vmul.f32 1.0614054, %v2081_v54  ;;  %v2083_v0 = vpop.eup %2082 }
 0x34b   : > { %v1852_v49 = vadd.f32 -1.4531521, %v1850_v50  ;;  %v2085_v5 = vpop.eup %2084 }
 0x34c   : > { %v1853_v15 = vadd.f32 -1.4531521, %v1851_v22 }
 0x34d   : > { %v1854_v9 = vmul.f32 %v2079_v40, %v1852_v49 }
 0x34e   : > { %v1855_v56 = vmul.f32 %v2081_v54, %v1853_v15 }
 0x34f   : > { %v1856_v59 = vadd.f32 1.4214138, %v1854_v9 }
 0x350   : > { %v1857_v6 = vadd.f32 1.4214138, %v1855_v56 }
 0x351   : > { %v1858_v11 = vmul.f32 %v2079_v40, %v1856_v59 }
 0x352   : > { %v1859_v29 = vmul.f32 %v2081_v54, %v1857_v6 }
 0x353   : > { %v1860_v44 = vadd.f32 -0.28449672, %v1858_v11 }
 0x354   : > { %v1861_v19 = vadd.f32 -0.28449672, %v1859_v29 }
 0x355   : > { %v1862_v39 = vmul.f32 %v2079_v40, %v1860_v44 }
 0x356   : > { %v1863_v42 = vmul.f32 %v2081_v54, %v1861_v19 }
 0x357   : > { %v1864_v48 = vadd.f32 0.2548296, %v1862_v39 }
 0x358   : > { %v1865_v16 = vadd.f32 0.2548296, %v1863_v42 }
 0x359   : > { %v1866_v27 = vmul.f32 %v2079_v40, %v1864_v48 }
 0x35a   : > { %v1867_v12 = vmul.f32 %v2081_v54, %v1865_v16 }
 0x35b   : > { %v1876_v10 = vmul.f32 %v2083_v0, %v1866_v27 }
 0x35c   : > { %v1877_v14 = vmul.f32 %v2085_v5, %v1867_v12 }
 0x35d   : > { %v1878_v51 = vsub.f32 1.0, %v1876_v10 }
 0x35e   : > { %v1879_v28 = vsub.f32 1.0, %v1877_v14 }
 0x35f   : > { %v1882_v2 = vsub.f32 0.0, %v1878_v51 }
 0x360   : > { %v1883_v30 = vsub.f32 0.0, %v1879_v28 }
 0x361   : > { %v1884_v17 = vsel %vm1880_vm6, %v1882_v2, %v1878_v51 }
 0x362   : > { %v1885_v20 = vsel %vm1881_vm11, %v1883_v30, %v1879_v28  ;;  %v1886_v21 = vadd.f32 1.0, %v1884_v17 }
 0x363   : > { %v1887_v33 = vadd.f32 1.0, %v1885_v20 }
 0x364   : > { %v1888_v63 = vmul.f32 %v1886_v21, %v1836_v1 }
 0x365   : > { %v1889_v37 = vmul.f32 %v1887_v33, %v1837_v41 }
 0x366   : > { %v1892_v25 = vrot.slane %v1888_v63, 4 }
 0x367   : > { %v1893_v3 = vrot.slane %v1889_v37, 4 }
 0x368   : > { %1896 = vst [vmem:[%s2671_s16] sm:$0x30] %v1892_v25 }
 0x369   : > { %1897 = vst [vmem:[%s2671_s16 + $0x8] sm:$0x30] %v1893_v3 }
 0x36a PF: > { %s21_s17 = sadd.s32 1, %s2095_s17  }
 0x36b   : > { %p18_p4 = scmp.ge.s32.totalorder %s21_s17, 4  }
 0x36d   :  { %20 = sbr.rel (!%p18_p4) target bundleno = 1 (0x1), region = 135 }

</bundles_post_ra>
